<compile_context>
chip_gen: v7x
topology: tpu7x:2x2x1
jax: 0.10.0
libtpu: 0.0.40
codegen_flags: <defaults>
</compile_context>

<pallas_src>
import functools
import math

import jax
import jax.numpy as jnp
import numpy as np
from jax.experimental import pallas as pl
from jax.experimental.pallas import tpu as pltpu


def _layer_norm(x, g, b, eps=1e-5):
    mu = jnp.mean(x, axis=-1, keepdims=True)
    xc = x - mu
    var = jnp.mean(xc * xc, axis=-1, keepdims=True)
    return xc * jax.lax.rsqrt(var + eps) * g + b


def _decoder_kernel(tgt_ref, mem_ref, qpos_ref, mpos_ref,
                    in_w_ref, in_b_ref, out_w_ref, out_b_ref,
                    w1_ref, b1_ref, w2_ref, b2_ref,
                    ln_g_ref, ln_b_ref, fn_g_ref, fn_b_ref,
                    o_ref, state_ref, *, nhead):
    bf16 = jnp.bfloat16
    f32 = jnp.float32
    l = pl.program_id(1)

    # First layer for this batch element: load its queries into the carried state.
    @pl.when(l == 0)
    def _():
        state_ref[...] = tgt_ref[...]

    t = state_ref[...]                       # (Lt, D) running target state, f32
    mem = mem_ref[...]                       # (Lm, D)
    qpos = qpos_ref[...]                     # (Lt, D)
    mpos = mpos_ref[...]                     # (Lm, D)

    D = t.shape[-1]
    hd = D // nhead
    scale = 1.0 / math.sqrt(hd)

    def mha(q_in, k_in, v_in, wq, wk, wv, bq, bk, bv, wo, bo):
        # Projections: bf16 operands, f32 accumulation, f32 bias add.
        q = jnp.dot(q_in.astype(bf16), wq, preferred_element_type=f32) + bq
        k = jnp.dot(k_in.astype(bf16), wk, preferred_element_type=f32) + bk
        v = jnp.dot(v_in.astype(bf16), wv, preferred_element_type=f32) + bv
        q16, k16, v16 = q.astype(bf16), k.astype(bf16), v.astype(bf16)
        acc = None
        for h in range(nhead):               # static unroll; 2-D MXU ops only
            lo, hi = h * hd, (h + 1) * hd
            s = jax.lax.dot_general(q16[:, lo:hi], k16[:, lo:hi],
                                    (((1,), (1,)), ((), ())),
                                    preferred_element_type=f32) * scale
            s = s - jnp.max(s, axis=-1, keepdims=True)
            p = jnp.exp(s)                                            # f32
            inv = pl.reciprocal(jnp.sum(p, axis=-1, keepdims=True), approx=True)
            # Fold 1/row_sum into the (Lq, hd) context instead of the (Lq, Lk) probs.
            oh = jnp.dot(p.astype(bf16), v16[:, lo:hi],
                         preferred_element_type=f32) * inv            # (Lq, hd)
            # concat(heads) @ Wout  ==  sum_h head_h @ Wout[h*hd:(h+1)*hd, :]
            ph = jnp.dot(oh.astype(bf16), wo[lo:hi, :],
                         preferred_element_type=f32)                  # (Lq, D)
            acc = ph if acc is None else acc + ph
        return acc + bo                       # bo is (1, D) f32

    # Layer-resident weights, selected by the layer grid coordinate (leading-axis
    # dynamic index on VMEM refs — plain address arithmetic, no relayout).
    wo_sa, bo_sa = out_w_ref[l, 0], out_b_ref[l, 0]
    wo_ca, bo_ca = out_w_ref[l, 1], out_b_ref[l, 1]

    # --- self-attention: q = k = tgt + query_pos, v = tgt ---
    qk = t + qpos
    sa = mha(qk, qk, t,
             in_w_ref[l, 0], in_w_ref[l, 1], in_w_ref[l, 2],
             in_b_ref[l, 0], in_b_ref[l, 1], in_b_ref[l, 2],
             wo_sa, bo_sa)
    t = _layer_norm(t + sa, ln_g_ref[l, 0], ln_b_ref[l, 0])

    # --- cross-attention: q = tgt + query_pos, k = memory + pos, v = memory ---
    ca = mha(t + qpos, mem + mpos, mem,
             in_w_ref[l, 3], in_w_ref[l, 4], in_w_ref[l, 5],
             in_b_ref[l, 3], in_b_ref[l, 4], in_b_ref[l, 5],
             wo_ca, bo_ca)
    t = _layer_norm(t + ca, ln_g_ref[l, 1], ln_b_ref[l, 1])

    # --- feed-forward ---
    hidden = jnp.maximum(
        jnp.dot(t.astype(bf16), w1_ref[l], preferred_element_type=f32)
        + b1_ref[l], 0.0)
    ff = jnp.dot(hidden.astype(bf16), w2_ref[l],
                 preferred_element_type=f32) + b2_ref[l]
    t = _layer_norm(t + ff, ln_g_ref[l, 2], ln_b_ref[l, 2])

    state_ref[...] = t

    # Last layer: final decoder LayerNorm, store the lane-dense (Lt, D) slab once.
    @pl.when(l == pl.num_programs(1) - 1)
    def _():
        o_ref[...] = _layer_norm(t, fn_g_ref[...], fn_b_ref[...]).astype(o_ref.dtype)


def transformer_decoder(tgt, memory, query_pos, pos, params, *, nhead):
    """TransformerDecoder forward.  Inputs in torch seq-first layout:
    tgt (Lt, bs, D), memory (Lm, bs, D), query_pos (Lt, bs, D), pos (Lm, bs, D).
    Returns (1, Lt, bs, D) matching `output.unsqueeze(0)`."""
    Lt, bs, D = tgt.shape
    Lm = memory.shape[0]
    num_layers = params["in_w"].shape[0]
    F = params["w1"].shape[-1]
    f32 = jnp.float32
    bf16 = jnp.bfloat16

    # batch-first activations (small one-time pass), f32 for the elementwise math
    t_b = jnp.transpose(tgt, (1, 0, 2)).astype(f32)        # (bs, Lt, D)
    m_b = jnp.transpose(memory, (1, 0, 2)).astype(f32)     # (bs, Lm, D)
    qp_b = jnp.transpose(query_pos, (1, 0, 2)).astype(f32)
    mp_b = jnp.transpose(pos, (1, 0, 2)).astype(f32)

    # matmul weights in bf16 (halves HBM/VMEM traffic, MXU-native); biases/LN f32
    in_w = params["in_w"].astype(bf16)
    out_w = params["out_w"].astype(bf16)
    w1 = params["w1"].astype(bf16)
    w2 = params["w2"].astype(bf16)
    in_b = params["in_b"].astype(f32)
    out_b = params["out_b"].astype(f32)
    b1 = params["b1"].astype(f32)
    b2 = params["b2"].astype(f32)
    ln_g = params["ln_g"].astype(f32)
    ln_b = params["ln_b"].astype(f32)
    fn_g = params["norm_g"].astype(f32)
    fn_b = params["norm_b"].astype(f32)

    kernel = functools.partial(_decoder_kernel, nhead=nhead)

    # Whole-array, VMEM-resident block (fetched once per call, never re-DMA'd).
    def resident(shape):
        return pl.BlockSpec(shape, lambda b, l: (0,) * len(shape))

    out = pl.pallas_call(
        kernel,
        out_shape=jax.ShapeDtypeStruct((bs, Lt, D), f32),
        grid_spec=pltpu.PrefetchScalarGridSpec(
            num_scalar_prefetch=0,
            grid=(bs, num_layers),            # batch outer (parallel), layers inner
            in_specs=[
                pl.BlockSpec((None, Lt, D), lambda b, l: (b, 0, 0)),   # tgt
                pl.BlockSpec((None, Lm, D), lambda b, l: (b, 0, 0)),   # memory
                pl.BlockSpec((None, Lt, D), lambda b, l: (b, 0, 0)),   # query_pos
                pl.BlockSpec((None, Lm, D), lambda b, l: (b, 0, 0)),   # pos
                resident((num_layers, 6, D, D)),     # QKV in_proj W (self 0..2, cross 3..5)
                resident((num_layers, 6, 1, D)),     # QKV in_proj b
                resident((num_layers, 2, D, D)),     # attn out_proj W
                resident((num_layers, 2, 1, D)),     # attn out_proj b
                resident((num_layers, D, F)),        # ffn W1
                resident((num_layers, 1, F)),        # ffn b1
                resident((num_layers, F, D)),        # ffn W2
                resident((num_layers, 1, D)),        # ffn b2
                resident((num_layers, 3, 1, D)),     # LayerNorm gamma (3 norms/layer)
                resident((num_layers, 3, 1, D)),     # LayerNorm beta
                resident((1, D)),                    # final norm gamma
                resident((1, D)),                    # final norm beta
            ],
            out_specs=pl.BlockSpec((None, Lt, D), lambda b, l: (b, 0, 0)),
            scratch_shapes=[pltpu.VMEM((Lt, D), f32)],
        ),
        compiler_params=pltpu.CompilerParams(
            dimension_semantics=("parallel", "arbitrary"),
            vmem_limit_bytes=64 * 1024 * 1024),
    )(t_b, m_b, qp_b, mp_b,
      in_w, in_b, out_w, out_b, w1, b1, w2, b2, ln_g, ln_b, fn_g, fn_b)

    # back to torch layout (Lt, bs, D), then the module's `unsqueeze(0)`.
    return jnp.transpose(out, (1, 0, 2))[None]


def reference(tgt, memory, query_pos, pos, params, nhead):
    """Pure-JAX f32 transcription of the PyTorch forward (for verification)."""
    Lt, bs, D = tgt.shape
    num_layers = params["in_w"].shape[0]
    hd = D // nhead
    scale = 1.0 / math.sqrt(hd)

    def layer_norm(x, g, b, eps=1e-5):
        mu = jnp.mean(x, axis=-1, keepdims=True)
        xc = x - mu
        var = jnp.mean(xc * xc, axis=-1, keepdims=True)
        return xc / jnp.sqrt(var + eps) * g + b

    def mha(q_in, k_in, v_in, wq, wk, wv, bq, bk, bv, wo, bo):
        q = q_in @ wq + bq[0]
        k = k_in @ wk + bk[0]
        v = v_in @ wv + bv[0]
        outs = []
        for h in range(nhead):
            sl = slice(h * hd, (h + 1) * hd)
            s = (q[:, sl] @ k[:, sl].T) * scale
            p = jax.nn.softmax(s, axis=-1)
            outs.append(p @ v[:, sl])
        return jnp.concatenate(outs, axis=-1) @ wo + bo[0]

    p = params
    outs = []
    for b in range(bs):
        t = tgt[:, b, :]
        mem = memory[:, b, :]
        qp = query_pos[:, b, :]
        mp = pos[:, b, :]
        for l in range(num_layers):
            qk = t + qp
            sa = mha(qk, qk, t,
                     p["in_w"][l, 0], p["in_w"][l, 1], p["in_w"][l, 2],
                     p["in_b"][l, 0], p["in_b"][l, 1], p["in_b"][l, 2],
                     p["out_w"][l, 0], p["out_b"][l, 0])
            t = layer_norm(t + sa, p["ln_g"][l, 0], p["ln_b"][l, 0])
            ca = mha(t + qp, mem + mp, mem,
                     p["in_w"][l, 3], p["in_w"][l, 4], p["in_w"][l, 5],
                     p["in_b"][l, 3], p["in_b"][l, 4], p["in_b"][l, 5],
                     p["out_w"][l, 1], p["out_b"][l, 1])
            t = layer_norm(t + ca, p["ln_g"][l, 1], p["ln_b"][l, 1])
            hidden = jnp.maximum(t @ p["w1"][l] + p["b1"][l], 0.0)
            ff = hidden @ p["w2"][l] + p["b2"][l]
            t = layer_norm(t + ff, p["ln_g"][l, 2], p["ln_b"][l, 2])
        t = layer_norm(t, p["norm_g"], p["norm_b"])
        outs.append(t)
    return jnp.stack(outs, axis=1)[None]     # (1, Lt, bs, D)


def make_params(key, num_layers, d_model, dim_ff):
    ks = jax.random.split(key, 12)
    u = lambda k, shape, s=0.2: jax.random.uniform(k, shape, jnp.float32, -s, s)
    return {
        # QKV in_proj, leading-axis packed: axis 1 = [selfQ, selfK, selfV, crossQ, crossK, crossV]
        "in_w": u(ks[0], (num_layers, 6, d_model, d_model)),
        "in_b": u(ks[1], (num_layers, 6, 1, d_model)),
        # attn out_proj; axis 1: [0]=self-attn, [1]=cross-attn
        "out_w": u(ks[2], (num_layers, 2, d_model, d_model)),
        "out_b": u(ks[3], (num_layers, 2, 1, d_model)),
        # FFN
        "w1": u(ks[4], (num_layers, d_model, dim_ff)),
        "b1": u(ks[5], (num_layers, 1, dim_ff)),
        "w2": u(ks[6], (num_layers, dim_ff, d_model)),
        "b2": u(ks[7], (num_layers, 1, d_model)),
        # LayerNorms 1..3 per layer (axis 1) and the decoder's final norm
        "ln_g": 1.0 + u(ks[8], (num_layers, 3, 1, d_model), 0.1),
        "ln_b": u(ks[9], (num_layers, 3, 1, d_model), 0.1),
        "norm_g": 1.0 + u(ks[10], (1, d_model), 0.1),
        "norm_b": u(ks[11], (1, d_model), 0.1),
    }


if __name__ == "__main__":
    Lt, Lm, bs = 8, 16, 2            # num queries, memory length, batch
    d_model, nhead, dim_ff, num_layers = 32, 4, 64, 2

    key = jax.random.PRNGKey(0)
    kt, km, kq, kp, kw = jax.random.split(key, 5)
    tgt = jax.random.normal(kt, (Lt, bs, d_model), jnp.float32)
    memory = jax.random.normal(km, (Lm, bs, d_model), jnp.float32)
    query_pos = 0.1 * jax.random.normal(kq, (Lt, bs, d_model), jnp.float32)
    pos = 0.1 * jax.random.normal(kp, (Lm, bs, d_model), jnp.float32)
    params = make_params(kw, num_layers, d_model, dim_ff)

    run = jax.jit(functools.partial(transformer_decoder, nhead=nhead))
    out = jax.block_until_ready(run(tgt, memory, query_pos, pos, params))

    # Tolerance loosened vs. the f32 reference because the kernel uses bf16 MXU
    # operands and an approximate (EUP) reciprocal in the softmax.
    ref = reference(tgt, memory, query_pos, pos, params, nhead)
    np.testing.assert_allclose(np.asarray(out), np.asarray(ref),
                               rtol=5e-2, atol=5e-2)
    print("KERNEL_OK")
</pallas_src>

<mosaic_0001>
module attributes {stable_mosaic.version = 11 : i64} {
  func.func @_decoder_kernel(%arg0: i32, %arg1: i32, %arg2: memref<1x8x32xf32, #tpu.memory_space<vmem>>, %arg3: memref<1x16x32xf32, #tpu.memory_space<vmem>>, %arg4: memref<1x8x32xf32, #tpu.memory_space<vmem>>, %arg5: memref<1x16x32xf32, #tpu.memory_space<vmem>>, %arg6: memref<2x6x32x32xbf16, #tpu.memory_space<vmem>>, %arg7: memref<2x6x1x32xf32, #tpu.memory_space<vmem>>, %arg8: memref<2x2x32x32xbf16, #tpu.memory_space<vmem>>, %arg9: memref<2x2x1x32xf32, #tpu.memory_space<vmem>>, %arg10: memref<2x32x64xbf16, #tpu.memory_space<vmem>>, %arg11: memref<2x1x64xf32, #tpu.memory_space<vmem>>, %arg12: memref<2x64x32xbf16, #tpu.memory_space<vmem>>, %arg13: memref<2x1x32xf32, #tpu.memory_space<vmem>>, %arg14: memref<2x3x1x32xf32, #tpu.memory_space<vmem>>, %arg15: memref<2x3x1x32xf32, #tpu.memory_space<vmem>>, %arg16: memref<1x32xf32, #tpu.memory_space<vmem>>, %arg17: memref<1x32xf32, #tpu.memory_space<vmem>>, %arg18: memref<1x8x32xf32, #tpu.memory_space<vmem>>, %arg19: memref<8x32xf32, #tpu.memory_space<vmem>>) attributes {dimension_semantics = [#tpu.dimension_semantics<parallel>, #tpu.dimension_semantics<arbitrary>], iteration_bounds = array<i64: 2, 2>, scalar_prefetch = 0 : i64, scratch_operands = 1 : i64, tpu.core_type = #tpu.core_type<tc>, window_params = [{transform_indices = @transform_0, window_bounds = array<i64: 1, 8, 32>}, {transform_indices = @transform_1, window_bounds = array<i64: 1, 16, 32>}, {transform_indices = @transform_2, window_bounds = array<i64: 1, 8, 32>}, {transform_indices = @transform_3, window_bounds = array<i64: 1, 16, 32>}, {pipeline_mode = #tpu.pipeline_mode<synchronous>, transform_indices = @transform_4, window_bounds = array<i64: 2, 6, 32, 32>}, {pipeline_mode = #tpu.pipeline_mode<synchronous>, transform_indices = @transform_5, window_bounds = array<i64: 2, 6, 1, 32>}, {pipeline_mode = #tpu.pipeline_mode<synchronous>, transform_indices = @transform_6, window_bounds = array<i64: 2, 2, 32, 32>}, {pipeline_mode = #tpu.pipeline_mode<synchronous>, transform_indices = @transform_7, window_bounds = array<i64: 2, 2, 1, 32>}, {pipeline_mode = #tpu.pipeline_mode<synchronous>, transform_indices = @transform_8, window_bounds = array<i64: 2, 32, 64>}, {pipeline_mode = #tpu.pipeline_mode<synchronous>, transform_indices = @transform_9, window_bounds = array<i64: 2, 1, 64>}, {pipeline_mode = #tpu.pipeline_mode<synchronous>, transform_indices = @transform_10, window_bounds = array<i64: 2, 64, 32>}, {pipeline_mode = #tpu.pipeline_mode<synchronous>, transform_indices = @transform_11, window_bounds = array<i64: 2, 1, 32>}, {pipeline_mode = #tpu.pipeline_mode<synchronous>, transform_indices = @transform_12, window_bounds = array<i64: 2, 3, 1, 32>}, {pipeline_mode = #tpu.pipeline_mode<synchronous>, transform_indices = @transform_13, window_bounds = array<i64: 2, 3, 1, 32>}, {pipeline_mode = #tpu.pipeline_mode<synchronous>, transform_indices = @transform_14, window_bounds = array<i64: 1, 32>}, {pipeline_mode = #tpu.pipeline_mode<synchronous>, transform_indices = @transform_15, window_bounds = array<i64: 1, 32>}, {transform_indices = @transform_16, window_bounds = array<i64: 1, 8, 32>}]} {
    %c0_i32 = arith.constant 0 : i32
    %0 = arith.cmpi eq, %arg1, %c0_i32 : i32
    %1 = arith.extui %0 : i1 to i32
    %c0_i32_0 = arith.constant 0 : i32
    %2 = arith.cmpi ne, %1, %c0_i32_0 : i32
    scf.if %2 {
      %c0_154 = arith.constant 0 : index
      %c0_155 = arith.constant 0 : index
      %c0_156 = arith.constant 0 : index
      %376 = vector.load %arg2[%c0_154, %c0_155, %c0_156] : memref<1x8x32xf32, #tpu.memory_space<vmem>>, vector<1x8x32xf32>
      %377 = vector.shape_cast %376 : vector<1x8x32xf32> to vector<8x32xf32>
      %c0_157 = arith.constant 0 : index
      %c0_158 = arith.constant 0 : index
      %378 = vector.load %arg19[%c0_157, %c0_158] : memref<8x32xf32, #tpu.memory_space<vmem>>, vector<8x32xf32>
      tpu.vector_store %arg19[%c0_157, %c0_158], %377 {strides = array<i32>} : memref<8x32xf32, #tpu.memory_space<vmem>>, vector<8x32xf32>,
    } else {
    }
    %c0 = arith.constant 0 : index
    %c0_1 = arith.constant 0 : index
    %3 = vector.load %arg19[%c0, %c0_1] : memref<8x32xf32, #tpu.memory_space<vmem>>, vector<8x32xf32>
    %c0_2 = arith.constant 0 : index
    %c0_3 = arith.constant 0 : index
    %c0_4 = arith.constant 0 : index
    %4 = vector.load %arg3[%c0_2, %c0_3, %c0_4] : memref<1x16x32xf32, #tpu.memory_space<vmem>>, vector<1x16x32xf32>
    %5 = vector.shape_cast %4 : vector<1x16x32xf32> to vector<16x32xf32>
    %c0_5 = arith.constant 0 : index
    %c0_6 = arith.constant 0 : index
    %c0_7 = arith.constant 0 : index
    %6 = vector.load %arg4[%c0_5, %c0_6, %c0_7] : memref<1x8x32xf32, #tpu.memory_space<vmem>>, vector<1x8x32xf32>
    %7 = vector.shape_cast %6 : vector<1x8x32xf32> to vector<8x32xf32>
    %c0_8 = arith.constant 0 : index
    %c0_9 = arith.constant 0 : index
    %c0_10 = arith.constant 0 : index
    %8 = vector.load %arg5[%c0_8, %c0_9, %c0_10] : memref<1x16x32xf32, #tpu.memory_space<vmem>>, vector<1x16x32xf32>
    %9 = vector.shape_cast %8 : vector<1x16x32xf32> to vector<16x32xf32>
    %10 = arith.index_cast %arg1 : i32 to index
    %c0_11 = arith.constant 0 : index
    %c0_12 = arith.constant 0 : index
    %c0_13 = arith.constant 0 : index
    %11 = vector.load %arg8[%10, %c0_11, %c0_12, %c0_13] : memref<2x2x32x32xbf16, #tpu.memory_space<vmem>>, vector<1x1x32x32xbf16>
    %12 = vector.shape_cast %11 : vector<1x1x32x32xbf16> to vector<32x32xbf16>
    %13 = arith.index_cast %arg1 : i32 to index
    %c0_14 = arith.constant 0 : index
    %c0_15 = arith.constant 0 : index
    %c0_16 = arith.constant 0 : index
    %14 = vector.load %arg9[%13, %c0_14, %c0_15, %c0_16] : memref<2x2x1x32xf32, #tpu.memory_space<vmem>>, vector<1x1x1x32xf32>
    %15 = vector.shape_cast %14 : vector<1x1x1x32xf32> to vector<1x32xf32>
    %16 = arith.index_cast %arg1 : i32 to index
    %c1 = arith.constant 1 : index
    %c0_17 = arith.constant 0 : index
    %c0_18 = arith.constant 0 : index
    %17 = vector.load %arg8[%16, %c1, %c0_17, %c0_18] : memref<2x2x32x32xbf16, #tpu.memory_space<vmem>>, vector<1x1x32x32xbf16>
    %18 = vector.shape_cast %17 : vector<1x1x32x32xbf16> to vector<32x32xbf16>
    %19 = arith.index_cast %arg1 : i32 to index
    %c1_19 = arith.constant 1 : index
    %c0_20 = arith.constant 0 : index
    %c0_21 = arith.constant 0 : index
    %20 = vector.load %arg9[%19, %c1_19, %c0_20, %c0_21] : memref<2x2x1x32xf32, #tpu.memory_space<vmem>>, vector<1x1x1x32xf32>
    %21 = vector.shape_cast %20 : vector<1x1x1x32xf32> to vector<1x32xf32>
    %22 = arith.addf %3, %7 : vector<8x32xf32>
    %23 = arith.index_cast %arg1 : i32 to index
    %c0_22 = arith.constant 0 : index
    %c0_23 = arith.constant 0 : index
    %c0_24 = arith.constant 0 : index
    %24 = vector.load %arg6[%23, %c0_22, %c0_23, %c0_24] : memref<2x6x32x32xbf16, #tpu.memory_space<vmem>>, vector<1x1x32x32xbf16>
    %25 = vector.shape_cast %24 : vector<1x1x32x32xbf16> to vector<32x32xbf16>
    %26 = arith.index_cast %arg1 : i32 to index
    %c1_25 = arith.constant 1 : index
    %c0_26 = arith.constant 0 : index
    %c0_27 = arith.constant 0 : index
    %27 = vector.load %arg6[%26, %c1_25, %c0_26, %c0_27] : memref<2x6x32x32xbf16, #tpu.memory_space<vmem>>, vector<1x1x32x32xbf16>
    %28 = vector.shape_cast %27 : vector<1x1x32x32xbf16> to vector<32x32xbf16>
    %29 = arith.index_cast %arg1 : i32 to index
    %c2 = arith.constant 2 : index
    %c0_28 = arith.constant 0 : index
    %c0_29 = arith.constant 0 : index
    %30 = vector.load %arg6[%29, %c2, %c0_28, %c0_29] : memref<2x6x32x32xbf16, #tpu.memory_space<vmem>>, vector<1x1x32x32xbf16>
    %31 = vector.shape_cast %30 : vector<1x1x32x32xbf16> to vector<32x32xbf16>
    %32 = arith.index_cast %arg1 : i32 to index
    %c0_30 = arith.constant 0 : index
    %c0_31 = arith.constant 0 : index
    %c0_32 = arith.constant 0 : index
    %33 = vector.load %arg7[%32, %c0_30, %c0_31, %c0_32] : memref<2x6x1x32xf32, #tpu.memory_space<vmem>>, vector<1x1x1x32xf32>
    %34 = vector.shape_cast %33 : vector<1x1x1x32xf32> to vector<1x32xf32>
    %35 = arith.index_cast %arg1 : i32 to index
    %c1_33 = arith.constant 1 : index
    %c0_34 = arith.constant 0 : index
    %c0_35 = arith.constant 0 : index
    %36 = vector.load %arg7[%35, %c1_33, %c0_34, %c0_35] : memref<2x6x1x32xf32, #tpu.memory_space<vmem>>, vector<1x1x1x32xf32>
    %37 = vector.shape_cast %36 : vector<1x1x1x32xf32> to vector<1x32xf32>
    %38 = arith.index_cast %arg1 : i32 to index
    %c2_36 = arith.constant 2 : index
    %c0_37 = arith.constant 0 : index
    %c0_38 = arith.constant 0 : index
    %39 = vector.load %arg7[%38, %c2_36, %c0_37, %c0_38] : memref<2x6x1x32xf32, #tpu.memory_space<vmem>>, vector<1x1x1x32xf32>
    %40 = vector.shape_cast %39 : vector<1x1x1x32xf32> to vector<1x32xf32>
    %41 = arith.truncf %22 : vector<8x32xf32> to vector<8x32xbf16>
    %cst = arith.constant dense<0.000000e+00> : vector<8x32xf32>
    %42 = tpu.matmul %41, %25, %cst {dimension_numbers = #tpu.dot_dimension_numbers<[1], [0], [0], [1], [0, 0, 1, 1], [], []>} : vector<8x32xbf16>, vector<32x32xbf16>, vector<8x32xf32> -> vector<8x32xf32>
    %43 = vector.broadcast %34 : vector<1x32xf32> to vector<8x32xf32>
    %44 = arith.addf %42, %43 : vector<8x32xf32>
    %45 = arith.truncf %22 : vector<8x32xf32> to vector<8x32xbf16>
    %cst_39 = arith.constant dense<0.000000e+00> : vector<8x32xf32>
    %46 = tpu.matmul %45, %28, %cst_39 {dimension_numbers = #tpu.dot_dimension_numbers<[1], [0], [0], [1], [0, 0, 1, 1], [], []>} : vector<8x32xbf16>, vector<32x32xbf16>, vector<8x32xf32> -> vector<8x32xf32>
    %47 = vector.broadcast %37 : vector<1x32xf32> to vector<8x32xf32>
    %48 = arith.addf %46, %47 : vector<8x32xf32>
    %49 = arith.truncf %3 : vector<8x32xf32> to vector<8x32xbf16>
    %cst_40 = arith.constant dense<0.000000e+00> : vector<8x32xf32>
    %50 = tpu.matmul %49, %31, %cst_40 {dimension_numbers = #tpu.dot_dimension_numbers<[1], [0], [0], [1], [0, 0, 1, 1], [], []>} : vector<8x32xbf16>, vector<32x32xbf16>, vector<8x32xf32> -> vector<8x32xf32>
    %51 = vector.broadcast %40 : vector<1x32xf32> to vector<8x32xf32>
    %52 = arith.addf %50, %51 : vector<8x32xf32>
    %53 = arith.truncf %44 : vector<8x32xf32> to vector<8x32xbf16>
    %54 = arith.truncf %48 : vector<8x32xf32> to vector<8x32xbf16>
    %55 = arith.truncf %52 : vector<8x32xf32> to vector<8x32xbf16>
    %56 = vector.extract_strided_slice %53 {offsets = [0, 0], sizes = [8, 8], strides = [1, 1]} : vector<8x32xbf16> to vector<8x8xbf16>
    %57 = vector.extract_strided_slice %54 {offsets = [0, 0], sizes = [8, 8], strides = [1, 1]} : vector<8x32xbf16> to vector<8x8xbf16>
    %cst_41 = arith.constant dense<0.000000e+00> : vector<8x8xf32>
    %58 = tpu.matmul %56, %57, %cst_41 {dimension_numbers = #tpu.dot_dimension_numbers<[1], [1], [0], [0], [0, 0, 1, 0], [], []>} : vector<8x8xbf16>, vector<8x8xbf16>, vector<8x8xf32> -> vector<8x8xf32>
    %cst_42 = arith.constant 0.353553385 : f32
    %59 = vector.broadcast %cst_42 : f32 to vector<8x8xf32>
    %60 = arith.mulf %58, %59 : vector<8x8xf32>
    %cst_43 = arith.constant dense<0xFF800000> : vector<8xf32>
    %61 = vector.multi_reduction <maximumf>, %60, %cst_43 [1] : vector<8x8xf32> to vector<8xf32>
    %62 = vector.shape_cast %61 : vector<8xf32> to vector<8x1xf32>
    %63 = vector.broadcast %62 : vector<8x1xf32> to vector<8x8xf32>
    %64 = arith.subf %60, %63 : vector<8x8xf32>
    %65 = math.exp %64 : vector<8x8xf32>
    %cst_44 = arith.constant dense<0.000000e+00> : vector<8xf32>
    %66 = vector.multi_reduction <add>, %65, %cst_44 [1] : vector<8x8xf32> to vector<8xf32>
    %67 = vector.shape_cast %66 : vector<8xf32> to vector<8x1xf32>
    %68 = tpu.reciprocal %67 {approx = true} : vector<8x1xf32> -> vector<8x1xf32>
    %69 = arith.truncf %65 : vector<8x8xf32> to vector<8x8xbf16>
    %70 = vector.extract_strided_slice %55 {offsets = [0, 0], sizes = [8, 8], strides = [1, 1]} : vector<8x32xbf16> to vector<8x8xbf16>
    %cst_45 = arith.constant dense<0.000000e+00> : vector<8x8xf32>
    %71 = tpu.matmul %69, %70, %cst_45 {dimension_numbers = #tpu.dot_dimension_numbers<[1], [0], [0], [1], [0, 0, 1, 1], [], []>} : vector<8x8xbf16>, vector<8x8xbf16>, vector<8x8xf32> -> vector<8x8xf32>
    %72 = vector.broadcast %68 : vector<8x1xf32> to vector<8x8xf32>
    %73 = arith.mulf %71, %72 : vector<8x8xf32>
    %74 = arith.truncf %73 : vector<8x8xf32> to vector<8x8xbf16>
    %75 = vector.extract_strided_slice %12 {offsets = [0, 0], sizes = [8, 32], strides = [1, 1]} : vector<32x32xbf16> to vector<8x32xbf16>
    %cst_46 = arith.constant dense<0.000000e+00> : vector<8x32xf32>
    %76 = tpu.matmul %74, %75, %cst_46 {dimension_numbers = #tpu.dot_dimension_numbers<[1], [0], [0], [1], [0, 0, 1, 1], [], []>} : vector<8x8xbf16>, vector<8x32xbf16>, vector<8x32xf32> -> vector<8x32xf32>
    %77 = vector.extract_strided_slice %53 {offsets = [0, 8], sizes = [8, 8], strides = [1, 1]} : vector<8x32xbf16> to vector<8x8xbf16>
    %78 = vector.extract_strided_slice %54 {offsets = [0, 8], sizes = [8, 8], strides = [1, 1]} : vector<8x32xbf16> to vector<8x8xbf16>
    %cst_47 = arith.constant dense<0.000000e+00> : vector<8x8xf32>
    %79 = tpu.matmul %77, %78, %cst_47 {dimension_numbers = #tpu.dot_dimension_numbers<[1], [1], [0], [0], [0, 0, 1, 0], [], []>} : vector<8x8xbf16>, vector<8x8xbf16>, vector<8x8xf32> -> vector<8x8xf32>
    %cst_48 = arith.constant 0.353553385 : f32
    %80 = vector.broadcast %cst_48 : f32 to vector<8x8xf32>
    %81 = arith.mulf %79, %80 : vector<8x8xf32>
    %cst_49 = arith.constant dense<0xFF800000> : vector<8xf32>
    %82 = vector.multi_reduction <maximumf>, %81, %cst_49 [1] : vector<8x8xf32> to vector<8xf32>
    %83 = vector.shape_cast %82 : vector<8xf32> to vector<8x1xf32>
    %84 = vector.broadcast %83 : vector<8x1xf32> to vector<8x8xf32>
    %85 = arith.subf %81, %84 : vector<8x8xf32>
    %86 = math.exp %85 : vector<8x8xf32>
    %cst_50 = arith.constant dense<0.000000e+00> : vector<8xf32>
    %87 = vector.multi_reduction <add>, %86, %cst_50 [1] : vector<8x8xf32> to vector<8xf32>
    %88 = vector.shape_cast %87 : vector<8xf32> to vector<8x1xf32>
    %89 = tpu.reciprocal %88 {approx = true} : vector<8x1xf32> -> vector<8x1xf32>
    %90 = arith.truncf %86 : vector<8x8xf32> to vector<8x8xbf16>
    %91 = vector.extract_strided_slice %55 {offsets = [0, 8], sizes = [8, 8], strides = [1, 1]} : vector<8x32xbf16> to vector<8x8xbf16>
    %cst_51 = arith.constant dense<0.000000e+00> : vector<8x8xf32>
    %92 = tpu.matmul %90, %91, %cst_51 {dimension_numbers = #tpu.dot_dimension_numbers<[1], [0], [0], [1], [0, 0, 1, 1], [], []>} : vector<8x8xbf16>, vector<8x8xbf16>, vector<8x8xf32> -> vector<8x8xf32>
    %93 = vector.broadcast %89 : vector<8x1xf32> to vector<8x8xf32>
    %94 = arith.mulf %92, %93 : vector<8x8xf32>
    %95 = arith.truncf %94 : vector<8x8xf32> to vector<8x8xbf16>
    %96 = vector.extract_strided_slice %12 {offsets = [8, 0], sizes = [8, 32], strides = [1, 1]} : vector<32x32xbf16> to vector<8x32xbf16>
    %cst_52 = arith.constant dense<0.000000e+00> : vector<8x32xf32>
    %97 = tpu.matmul %95, %96, %cst_52 {dimension_numbers = #tpu.dot_dimension_numbers<[1], [0], [0], [1], [0, 0, 1, 1], [], []>} : vector<8x8xbf16>, vector<8x32xbf16>, vector<8x32xf32> -> vector<8x32xf32>
    %98 = arith.addf %76, %97 : vector<8x32xf32>
    %99 = vector.extract_strided_slice %53 {offsets = [0, 16], sizes = [8, 8], strides = [1, 1]} : vector<8x32xbf16> to vector<8x8xbf16>
    %100 = vector.extract_strided_slice %54 {offsets = [0, 16], sizes = [8, 8], strides = [1, 1]} : vector<8x32xbf16> to vector<8x8xbf16>
    %cst_53 = arith.constant dense<0.000000e+00> : vector<8x8xf32>
    %101 = tpu.matmul %99, %100, %cst_53 {dimension_numbers = #tpu.dot_dimension_numbers<[1], [1], [0], [0], [0, 0, 1, 0], [], []>} : vector<8x8xbf16>, vector<8x8xbf16>, vector<8x8xf32> -> vector<8x8xf32>
    %cst_54 = arith.constant 0.353553385 : f32
    %102 = vector.broadcast %cst_54 : f32 to vector<8x8xf32>
    %103 = arith.mulf %101, %102 : vector<8x8xf32>
    %cst_55 = arith.constant dense<0xFF800000> : vector<8xf32>
    %104 = vector.multi_reduction <maximumf>, %103, %cst_55 [1] : vector<8x8xf32> to vector<8xf32>
    %105 = vector.shape_cast %104 : vector<8xf32> to vector<8x1xf32>
    %106 = vector.broadcast %105 : vector<8x1xf32> to vector<8x8xf32>
    %107 = arith.subf %103, %106 : vector<8x8xf32>
    %108 = math.exp %107 : vector<8x8xf32>
    %cst_56 = arith.constant dense<0.000000e+00> : vector<8xf32>
    %109 = vector.multi_reduction <add>, %108, %cst_56 [1] : vector<8x8xf32> to vector<8xf32>
    %110 = vector.shape_cast %109 : vector<8xf32> to vector<8x1xf32>
    %111 = tpu.reciprocal %110 {approx = true} : vector<8x1xf32> -> vector<8x1xf32>
    %112 = arith.truncf %108 : vector<8x8xf32> to vector<8x8xbf16>
    %113 = vector.extract_strided_slice %55 {offsets = [0, 16], sizes = [8, 8], strides = [1, 1]} : vector<8x32xbf16> to vector<8x8xbf16>
    %cst_57 = arith.constant dense<0.000000e+00> : vector<8x8xf32>
    %114 = tpu.matmul %112, %113, %cst_57 {dimension_numbers = #tpu.dot_dimension_numbers<[1], [0], [0], [1], [0, 0, 1, 1], [], []>} : vector<8x8xbf16>, vector<8x8xbf16>, vector<8x8xf32> -> vector<8x8xf32>
    %115 = vector.broadcast %111 : vector<8x1xf32> to vector<8x8xf32>
    %116 = arith.mulf %114, %115 : vector<8x8xf32>
    %117 = arith.truncf %116 : vector<8x8xf32> to vector<8x8xbf16>
    %118 = vector.extract_strided_slice %12 {offsets = [16, 0], sizes = [8, 32], strides = [1, 1]} : vector<32x32xbf16> to vector<8x32xbf16>
    %cst_58 = arith.constant dense<0.000000e+00> : vector<8x32xf32>
    %119 = tpu.matmul %117, %118, %cst_58 {dimension_numbers = #tpu.dot_dimension_numbers<[1], [0], [0], [1], [0, 0, 1, 1], [], []>} : vector<8x8xbf16>, vector<8x32xbf16>, vector<8x32xf32> -> vector<8x32xf32>
    %120 = arith.addf %98, %119 : vector<8x32xf32>
    %121 = vector.extract_strided_slice %53 {offsets = [0, 24], sizes = [8, 8], strides = [1, 1]} : vector<8x32xbf16> to vector<8x8xbf16>
    %122 = vector.extract_strided_slice %54 {offsets = [0, 24], sizes = [8, 8], strides = [1, 1]} : vector<8x32xbf16> to vector<8x8xbf16>
    %cst_59 = arith.constant dense<0.000000e+00> : vector<8x8xf32>
    %123 = tpu.matmul %121, %122, %cst_59 {dimension_numbers = #tpu.dot_dimension_numbers<[1], [1], [0], [0], [0, 0, 1, 0], [], []>} : vector<8x8xbf16>, vector<8x8xbf16>, vector<8x8xf32> -> vector<8x8xf32>
    %cst_60 = arith.constant 0.353553385 : f32
    %124 = vector.broadcast %cst_60 : f32 to vector<8x8xf32>
    %125 = arith.mulf %123, %124 : vector<8x8xf32>
    %cst_61 = arith.constant dense<0xFF800000> : vector<8xf32>
    %126 = vector.multi_reduction <maximumf>, %125, %cst_61 [1] : vector<8x8xf32> to vector<8xf32>
    %127 = vector.shape_cast %126 : vector<8xf32> to vector<8x1xf32>
    %128 = vector.broadcast %127 : vector<8x1xf32> to vector<8x8xf32>
    %129 = arith.subf %125, %128 : vector<8x8xf32>
    %130 = math.exp %129 : vector<8x8xf32>
    %cst_62 = arith.constant dense<0.000000e+00> : vector<8xf32>
    %131 = vector.multi_reduction <add>, %130, %cst_62 [1] : vector<8x8xf32> to vector<8xf32>
    %132 = vector.shape_cast %131 : vector<8xf32> to vector<8x1xf32>
    %133 = tpu.reciprocal %132 {approx = true} : vector<8x1xf32> -> vector<8x1xf32>
    %134 = arith.truncf %130 : vector<8x8xf32> to vector<8x8xbf16>
    %135 = vector.extract_strided_slice %55 {offsets = [0, 24], sizes = [8, 8], strides = [1, 1]} : vector<8x32xbf16> to vector<8x8xbf16>
    %cst_63 = arith.constant dense<0.000000e+00> : vector<8x8xf32>
    %136 = tpu.matmul %134, %135, %cst_63 {dimension_numbers = #tpu.dot_dimension_numbers<[1], [0], [0], [1], [0, 0, 1, 1], [], []>} : vector<8x8xbf16>, vector<8x8xbf16>, vector<8x8xf32> -> vector<8x8xf32>
    %137 = vector.broadcast %133 : vector<8x1xf32> to vector<8x8xf32>
    %138 = arith.mulf %136, %137 : vector<8x8xf32>
    %139 = arith.truncf %138 : vector<8x8xf32> to vector<8x8xbf16>
    %140 = vector.extract_strided_slice %12 {offsets = [24, 0], sizes = [8, 32], strides = [1, 1]} : vector<32x32xbf16> to vector<8x32xbf16>
    %cst_64 = arith.constant dense<0.000000e+00> : vector<8x32xf32>
    %141 = tpu.matmul %139, %140, %cst_64 {dimension_numbers = #tpu.dot_dimension_numbers<[1], [0], [0], [1], [0, 0, 1, 1], [], []>} : vector<8x8xbf16>, vector<8x32xbf16>, vector<8x32xf32> -> vector<8x32xf32>
    %142 = arith.addf %120, %141 : vector<8x32xf32>
    %143 = vector.broadcast %15 : vector<1x32xf32> to vector<8x32xf32>
    %144 = arith.addf %142, %143 : vector<8x32xf32>
    %145 = arith.addf %3, %144 : vector<8x32xf32>
    %146 = arith.index_cast %arg1 : i32 to index
    %c0_65 = arith.constant 0 : index
    %c0_66 = arith.constant 0 : index
    %c0_67 = arith.constant 0 : index
    %147 = vector.load %arg14[%146, %c0_65, %c0_66, %c0_67] : memref<2x3x1x32xf32, #tpu.memory_space<vmem>>, vector<1x1x1x32xf32>
    %148 = vector.shape_cast %147 : vector<1x1x1x32xf32> to vector<1x32xf32>
    %149 = arith.index_cast %arg1 : i32 to index
    %c0_68 = arith.constant 0 : index
    %c0_69 = arith.constant 0 : index
    %c0_70 = arith.constant 0 : index
    %150 = vector.load %arg15[%149, %c0_68, %c0_69, %c0_70] : memref<2x3x1x32xf32, #tpu.memory_space<vmem>>, vector<1x1x1x32xf32>
    %151 = vector.shape_cast %150 : vector<1x1x1x32xf32> to vector<1x32xf32>
    %cst_71 = arith.constant dense<0.000000e+00> : vector<8xf32>
    %152 = vector.multi_reduction <add>, %145, %cst_71 [1] : vector<8x32xf32> to vector<8xf32>
    %153 = vector.shape_cast %152 : vector<8xf32> to vector<8x1xf32>
    %cst_72 = arith.constant 3.200000e+01 : f32
    %154 = vector.broadcast %cst_72 : f32 to vector<8x1xf32>
    %155 = arith.divf %153, %154 : vector<8x1xf32>
    %156 = vector.broadcast %155 : vector<8x1xf32> to vector<8x32xf32>
    %157 = arith.subf %145, %156 : vector<8x32xf32>
    %158 = arith.mulf %157, %157 : vector<8x32xf32>
    %cst_73 = arith.constant dense<0.000000e+00> : vector<8xf32>
    %159 = vector.multi_reduction <add>, %158, %cst_73 [1] : vector<8x32xf32> to vector<8xf32>
    %160 = vector.shape_cast %159 : vector<8xf32> to vector<8x1xf32>
    %cst_74 = arith.constant 3.200000e+01 : f32
    %161 = vector.broadcast %cst_74 : f32 to vector<8x1xf32>
    %162 = arith.divf %160, %161 : vector<8x1xf32>
    %cst_75 = arith.constant 9.99999974E-6 : f32
    %163 = vector.broadcast %cst_75 : f32 to vector<8x1xf32>
    %164 = arith.addf %162, %163 : vector<8x1xf32>
    %165 = math.rsqrt %164 : vector<8x1xf32>
    %166 = vector.broadcast %165 : vector<8x1xf32> to vector<8x32xf32>
    %167 = arith.mulf %157, %166 : vector<8x32xf32>
    %168 = vector.broadcast %148 : vector<1x32xf32> to vector<8x32xf32>
    %169 = arith.mulf %167, %168 : vector<8x32xf32>
    %170 = vector.broadcast %151 : vector<1x32xf32> to vector<8x32xf32>
    %171 = arith.addf %169, %170 : vector<8x32xf32>
    %172 = arith.addf %171, %7 : vector<8x32xf32>
    %173 = arith.addf %5, %9 : vector<16x32xf32>
    %174 = arith.index_cast %arg1 : i32 to index
    %c3 = arith.constant 3 : index
    %c0_76 = arith.constant 0 : index
    %c0_77 = arith.constant 0 : index
    %175 = vector.load %arg6[%174, %c3, %c0_76, %c0_77] : memref<2x6x32x32xbf16, #tpu.memory_space<vmem>>, vector<1x1x32x32xbf16>
    %176 = vector.shape_cast %175 : vector<1x1x32x32xbf16> to vector<32x32xbf16>
    %177 = arith.index_cast %arg1 : i32 to index
    %c4 = arith.constant 4 : index
    %c0_78 = arith.constant 0 : index
    %c0_79 = arith.constant 0 : index
    %178 = vector.load %arg6[%177, %c4, %c0_78, %c0_79] : memref<2x6x32x32xbf16, #tpu.memory_space<vmem>>, vector<1x1x32x32xbf16>
    %179 = vector.shape_cast %178 : vector<1x1x32x32xbf16> to vector<32x32xbf16>
    %180 = arith.index_cast %arg1 : i32 to index
    %c5 = arith.constant 5 : index
    %c0_80 = arith.constant 0 : index
    %c0_81 = arith.constant 0 : index
    %181 = vector.load %arg6[%180, %c5, %c0_80, %c0_81] : memref<2x6x32x32xbf16, #tpu.memory_space<vmem>>, vector<1x1x32x32xbf16>
    %182 = vector.shape_cast %181 : vector<1x1x32x32xbf16> to vector<32x32xbf16>
    %183 = arith.index_cast %arg1 : i32 to index
    %c3_82 = arith.constant 3 : index
    %c0_83 = arith.constant 0 : index
    %c0_84 = arith.constant 0 : index
    %184 = vector.load %arg7[%183, %c3_82, %c0_83, %c0_84] : memref<2x6x1x32xf32, #tpu.memory_space<vmem>>, vector<1x1x1x32xf32>
    %185 = vector.shape_cast %184 : vector<1x1x1x32xf32> to vector<1x32xf32>
    %186 = arith.index_cast %arg1 : i32 to index
    %c4_85 = arith.constant 4 : index
    %c0_86 = arith.constant 0 : index
    %c0_87 = arith.constant 0 : index
    %187 = vector.load %arg7[%186, %c4_85, %c0_86, %c0_87] : memref<2x6x1x32xf32, #tpu.memory_space<vmem>>, vector<1x1x1x32xf32>
    %188 = vector.shape_cast %187 : vector<1x1x1x32xf32> to vector<1x32xf32>
    %189 = arith.index_cast %arg1 : i32 to index
    %c5_88 = arith.constant 5 : index
    %c0_89 = arith.constant 0 : index
    %c0_90 = arith.constant 0 : index
    %190 = vector.load %arg7[%189, %c5_88, %c0_89, %c0_90] : memref<2x6x1x32xf32, #tpu.memory_space<vmem>>, vector<1x1x1x32xf32>
    %191 = vector.shape_cast %190 : vector<1x1x1x32xf32> to vector<1x32xf32>
    %192 = arith.truncf %172 : vector<8x32xf32> to vector<8x32xbf16>
    %cst_91 = arith.constant dense<0.000000e+00> : vector<8x32xf32>
    %193 = tpu.matmul %192, %176, %cst_91 {dimension_numbers = #tpu.dot_dimension_numbers<[1], [0], [0], [1], [0, 0, 1, 1], [], []>} : vector<8x32xbf16>, vector<32x32xbf16>, vector<8x32xf32> -> vector<8x32xf32>
    %194 = vector.broadcast %185 : vector<1x32xf32> to vector<8x32xf32>
    %195 = arith.addf %193, %194 : vector<8x32xf32>
    %196 = arith.truncf %173 : vector<16x32xf32> to vector<16x32xbf16>
    %cst_92 = arith.constant dense<0.000000e+00> : vector<16x32xf32>
    %197 = tpu.matmul %196, %179, %cst_92 {dimension_numbers = #tpu.dot_dimension_numbers<[1], [0], [0], [1], [0, 0, 1, 1], [], []>} : vector<16x32xbf16>, vector<32x32xbf16>, vector<16x32xf32> -> vector<16x32xf32>
    %198 = vector.broadcast %188 : vector<1x32xf32> to vector<16x32xf32>
    %199 = arith.addf %197, %198 : vector<16x32xf32>
    %200 = arith.truncf %5 : vector<16x32xf32> to vector<16x32xbf16>
    %cst_93 = arith.constant dense<0.000000e+00> : vector<16x32xf32>
    %201 = tpu.matmul %200, %182, %cst_93 {dimension_numbers = #tpu.dot_dimension_numbers<[1], [0], [0], [1], [0, 0, 1, 1], [], []>} : vector<16x32xbf16>, vector<32x32xbf16>, vector<16x32xf32> -> vector<16x32xf32>
    %202 = vector.broadcast %191 : vector<1x32xf32> to vector<16x32xf32>
    %203 = arith.addf %201, %202 : vector<16x32xf32>
    %204 = arith.truncf %195 : vector<8x32xf32> to vector<8x32xbf16>
    %205 = arith.truncf %199 : vector<16x32xf32> to vector<16x32xbf16>
    %206 = arith.truncf %203 : vector<16x32xf32> to vector<16x32xbf16>
    %207 = vector.extract_strided_slice %204 {offsets = [0, 0], sizes = [8, 8], strides = [1, 1]} : vector<8x32xbf16> to vector<8x8xbf16>
    %208 = vector.extract_strided_slice %205 {offsets = [0, 0], sizes = [16, 8], strides = [1, 1]} : vector<16x32xbf16> to vector<16x8xbf16>
    %cst_94 = arith.constant dense<0.000000e+00> : vector<8x16xf32>
    %209 = tpu.matmul %207, %208, %cst_94 {dimension_numbers = #tpu.dot_dimension_numbers<[1], [1], [0], [0], [0, 0, 1, 0], [], []>} : vector<8x8xbf16>, vector<16x8xbf16>, vector<8x16xf32> -> vector<8x16xf32>
    %cst_95 = arith.constant 0.353553385 : f32
    %210 = vector.broadcast %cst_95 : f32 to vector<8x16xf32>
    %211 = arith.mulf %209, %210 : vector<8x16xf32>
    %cst_96 = arith.constant dense<0xFF800000> : vector<8xf32>
    %212 = vector.multi_reduction <maximumf>, %211, %cst_96 [1] : vector<8x16xf32> to vector<8xf32>
    %213 = vector.shape_cast %212 : vector<8xf32> to vector<8x1xf32>
    %214 = vector.broadcast %213 : vector<8x1xf32> to vector<8x16xf32>
    %215 = arith.subf %211, %214 : vector<8x16xf32>
    %216 = math.exp %215 : vector<8x16xf32>
    %cst_97 = arith.constant dense<0.000000e+00> : vector<8xf32>
    %217 = vector.multi_reduction <add>, %216, %cst_97 [1] : vector<8x16xf32> to vector<8xf32>
    %218 = vector.shape_cast %217 : vector<8xf32> to vector<8x1xf32>
    %219 = tpu.reciprocal %218 {approx = true} : vector<8x1xf32> -> vector<8x1xf32>
    %220 = arith.truncf %216 : vector<8x16xf32> to vector<8x16xbf16>
    %221 = vector.extract_strided_slice %206 {offsets = [0, 0], sizes = [16, 8], strides = [1, 1]} : vector<16x32xbf16> to vector<16x8xbf16>
    %cst_98 = arith.constant dense<0.000000e+00> : vector<8x8xf32>
    %222 = tpu.matmul %220, %221, %cst_98 {dimension_numbers = #tpu.dot_dimension_numbers<[1], [0], [0], [1], [0, 0, 1, 1], [], []>} : vector<8x16xbf16>, vector<16x8xbf16>, vector<8x8xf32> -> vector<8x8xf32>
    %223 = vector.broadcast %219 : vector<8x1xf32> to vector<8x8xf32>
    %224 = arith.mulf %222, %223 : vector<8x8xf32>
    %225 = arith.truncf %224 : vector<8x8xf32> to vector<8x8xbf16>
    %226 = vector.extract_strided_slice %18 {offsets = [0, 0], sizes = [8, 32], strides = [1, 1]} : vector<32x32xbf16> to vector<8x32xbf16>
    %cst_99 = arith.constant dense<0.000000e+00> : vector<8x32xf32>
    %227 = tpu.matmul %225, %226, %cst_99 {dimension_numbers = #tpu.dot_dimension_numbers<[1], [0], [0], [1], [0, 0, 1, 1], [], []>} : vector<8x8xbf16>, vector<8x32xbf16>, vector<8x32xf32> -> vector<8x32xf32>
    %228 = vector.extract_strided_slice %204 {offsets = [0, 8], sizes = [8, 8], strides = [1, 1]} : vector<8x32xbf16> to vector<8x8xbf16>
    %229 = vector.extract_strided_slice %205 {offsets = [0, 8], sizes = [16, 8], strides = [1, 1]} : vector<16x32xbf16> to vector<16x8xbf16>
    %cst_100 = arith.constant dense<0.000000e+00> : vector<8x16xf32>
    %230 = tpu.matmul %228, %229, %cst_100 {dimension_numbers = #tpu.dot_dimension_numbers<[1], [1], [0], [0], [0, 0, 1, 0], [], []>} : vector<8x8xbf16>, vector<16x8xbf16>, vector<8x16xf32> -> vector<8x16xf32>
    %cst_101 = arith.constant 0.353553385 : f32
    %231 = vector.broadcast %cst_101 : f32 to vector<8x16xf32>
    %232 = arith.mulf %230, %231 : vector<8x16xf32>
    %cst_102 = arith.constant dense<0xFF800000> : vector<8xf32>
    %233 = vector.multi_reduction <maximumf>, %232, %cst_102 [1] : vector<8x16xf32> to vector<8xf32>
    %234 = vector.shape_cast %233 : vector<8xf32> to vector<8x1xf32>
    %235 = vector.broadcast %234 : vector<8x1xf32> to vector<8x16xf32>
    %236 = arith.subf %232, %235 : vector<8x16xf32>
    %237 = math.exp %236 : vector<8x16xf32>
    %cst_103 = arith.constant dense<0.000000e+00> : vector<8xf32>
    %238 = vector.multi_reduction <add>, %237, %cst_103 [1] : vector<8x16xf32> to vector<8xf32>
    %239 = vector.shape_cast %238 : vector<8xf32> to vector<8x1xf32>
    %240 = tpu.reciprocal %239 {approx = true} : vector<8x1xf32> -> vector<8x1xf32>
    %241 = arith.truncf %237 : vector<8x16xf32> to vector<8x16xbf16>
    %242 = vector.extract_strided_slice %206 {offsets = [0, 8], sizes = [16, 8], strides = [1, 1]} : vector<16x32xbf16> to vector<16x8xbf16>
    %cst_104 = arith.constant dense<0.000000e+00> : vector<8x8xf32>
    %243 = tpu.matmul %241, %242, %cst_104 {dimension_numbers = #tpu.dot_dimension_numbers<[1], [0], [0], [1], [0, 0, 1, 1], [], []>} : vector<8x16xbf16>, vector<16x8xbf16>, vector<8x8xf32> -> vector<8x8xf32>
    %244 = vector.broadcast %240 : vector<8x1xf32> to vector<8x8xf32>
    %245 = arith.mulf %243, %244 : vector<8x8xf32>
    %246 = arith.truncf %245 : vector<8x8xf32> to vector<8x8xbf16>
    %247 = vector.extract_strided_slice %18 {offsets = [8, 0], sizes = [8, 32], strides = [1, 1]} : vector<32x32xbf16> to vector<8x32xbf16>
    %cst_105 = arith.constant dense<0.000000e+00> : vector<8x32xf32>
    %248 = tpu.matmul %246, %247, %cst_105 {dimension_numbers = #tpu.dot_dimension_numbers<[1], [0], [0], [1], [0, 0, 1, 1], [], []>} : vector<8x8xbf16>, vector<8x32xbf16>, vector<8x32xf32> -> vector<8x32xf32>
    %249 = arith.addf %227, %248 : vector<8x32xf32>
    %250 = vector.extract_strided_slice %204 {offsets = [0, 16], sizes = [8, 8], strides = [1, 1]} : vector<8x32xbf16> to vector<8x8xbf16>
    %251 = vector.extract_strided_slice %205 {offsets = [0, 16], sizes = [16, 8], strides = [1, 1]} : vector<16x32xbf16> to vector<16x8xbf16>
    %cst_106 = arith.constant dense<0.000000e+00> : vector<8x16xf32>
    %252 = tpu.matmul %250, %251, %cst_106 {dimension_numbers = #tpu.dot_dimension_numbers<[1], [1], [0], [0], [0, 0, 1, 0], [], []>} : vector<8x8xbf16>, vector<16x8xbf16>, vector<8x16xf32> -> vector<8x16xf32>
    %cst_107 = arith.constant 0.353553385 : f32
    %253 = vector.broadcast %cst_107 : f32 to vector<8x16xf32>
    %254 = arith.mulf %252, %253 : vector<8x16xf32>
    %cst_108 = arith.constant dense<0xFF800000> : vector<8xf32>
    %255 = vector.multi_reduction <maximumf>, %254, %cst_108 [1] : vector<8x16xf32> to vector<8xf32>
    %256 = vector.shape_cast %255 : vector<8xf32> to vector<8x1xf32>
    %257 = vector.broadcast %256 : vector<8x1xf32> to vector<8x16xf32>
    %258 = arith.subf %254, %257 : vector<8x16xf32>
    %259 = math.exp %258 : vector<8x16xf32>
    %cst_109 = arith.constant dense<0.000000e+00> : vector<8xf32>
    %260 = vector.multi_reduction <add>, %259, %cst_109 [1] : vector<8x16xf32> to vector<8xf32>
    %261 = vector.shape_cast %260 : vector<8xf32> to vector<8x1xf32>
    %262 = tpu.reciprocal %261 {approx = true} : vector<8x1xf32> -> vector<8x1xf32>
    %263 = arith.truncf %259 : vector<8x16xf32> to vector<8x16xbf16>
    %264 = vector.extract_strided_slice %206 {offsets = [0, 16], sizes = [16, 8], strides = [1, 1]} : vector<16x32xbf16> to vector<16x8xbf16>
    %cst_110 = arith.constant dense<0.000000e+00> : vector<8x8xf32>
    %265 = tpu.matmul %263, %264, %cst_110 {dimension_numbers = #tpu.dot_dimension_numbers<[1], [0], [0], [1], [0, 0, 1, 1], [], []>} : vector<8x16xbf16>, vector<16x8xbf16>, vector<8x8xf32> -> vector<8x8xf32>
    %266 = vector.broadcast %262 : vector<8x1xf32> to vector<8x8xf32>
    %267 = arith.mulf %265, %266 : vector<8x8xf32>
    %268 = arith.truncf %267 : vector<8x8xf32> to vector<8x8xbf16>
    %269 = vector.extract_strided_slice %18 {offsets = [16, 0], sizes = [8, 32], strides = [1, 1]} : vector<32x32xbf16> to vector<8x32xbf16>
    %cst_111 = arith.constant dense<0.000000e+00> : vector<8x32xf32>
    %270 = tpu.matmul %268, %269, %cst_111 {dimension_numbers = #tpu.dot_dimension_numbers<[1], [0], [0], [1], [0, 0, 1, 1], [], []>} : vector<8x8xbf16>, vector<8x32xbf16>, vector<8x32xf32> -> vector<8x32xf32>
    %271 = arith.addf %249, %270 : vector<8x32xf32>
    %272 = vector.extract_strided_slice %204 {offsets = [0, 24], sizes = [8, 8], strides = [1, 1]} : vector<8x32xbf16> to vector<8x8xbf16>
    %273 = vector.extract_strided_slice %205 {offsets = [0, 24], sizes = [16, 8], strides = [1, 1]} : vector<16x32xbf16> to vector<16x8xbf16>
    %cst_112 = arith.constant dense<0.000000e+00> : vector<8x16xf32>
    %274 = tpu.matmul %272, %273, %cst_112 {dimension_numbers = #tpu.dot_dimension_numbers<[1], [1], [0], [0], [0, 0, 1, 0], [], []>} : vector<8x8xbf16>, vector<16x8xbf16>, vector<8x16xf32> -> vector<8x16xf32>
    %cst_113 = arith.constant 0.353553385 : f32
    %275 = vector.broadcast %cst_113 : f32 to vector<8x16xf32>
    %276 = arith.mulf %274, %275 : vector<8x16xf32>
    %cst_114 = arith.constant dense<0xFF800000> : vector<8xf32>
    %277 = vector.multi_reduction <maximumf>, %276, %cst_114 [1] : vector<8x16xf32> to vector<8xf32>
    %278 = vector.shape_cast %277 : vector<8xf32> to vector<8x1xf32>
    %279 = vector.broadcast %278 : vector<8x1xf32> to vector<8x16xf32>
    %280 = arith.subf %276, %279 : vector<8x16xf32>
    %281 = math.exp %280 : vector<8x16xf32>
    %cst_115 = arith.constant dense<0.000000e+00> : vector<8xf32>
    %282 = vector.multi_reduction <add>, %281, %cst_115 [1] : vector<8x16xf32> to vector<8xf32>
    %283 = vector.shape_cast %282 : vector<8xf32> to vector<8x1xf32>
    %284 = tpu.reciprocal %283 {approx = true} : vector<8x1xf32> -> vector<8x1xf32>
    %285 = arith.truncf %281 : vector<8x16xf32> to vector<8x16xbf16>
    %286 = vector.extract_strided_slice %206 {offsets = [0, 24], sizes = [16, 8], strides = [1, 1]} : vector<16x32xbf16> to vector<16x8xbf16>
    %cst_116 = arith.constant dense<0.000000e+00> : vector<8x8xf32>
    %287 = tpu.matmul %285, %286, %cst_116 {dimension_numbers = #tpu.dot_dimension_numbers<[1], [0], [0], [1], [0, 0, 1, 1], [], []>} : vector<8x16xbf16>, vector<16x8xbf16>, vector<8x8xf32> -> vector<8x8xf32>
    %288 = vector.broadcast %284 : vector<8x1xf32> to vector<8x8xf32>
    %289 = arith.mulf %287, %288 : vector<8x8xf32>
    %290 = arith.truncf %289 : vector<8x8xf32> to vector<8x8xbf16>
    %291 = vector.extract_strided_slice %18 {offsets = [24, 0], sizes = [8, 32], strides = [1, 1]} : vector<32x32xbf16> to vector<8x32xbf16>
    %cst_117 = arith.constant dense<0.000000e+00> : vector<8x32xf32>
    %292 = tpu.matmul %290, %291, %cst_117 {dimension_numbers = #tpu.dot_dimension_numbers<[1], [0], [0], [1], [0, 0, 1, 1], [], []>} : vector<8x8xbf16>, vector<8x32xbf16>, vector<8x32xf32> -> vector<8x32xf32>
    %293 = arith.addf %271, %292 : vector<8x32xf32>
    %294 = vector.broadcast %21 : vector<1x32xf32> to vector<8x32xf32>
    %295 = arith.addf %293, %294 : vector<8x32xf32>
    %296 = arith.addf %171, %295 : vector<8x32xf32>
    %297 = arith.index_cast %arg1 : i32 to index
    %c1_118 = arith.constant 1 : index
    %c0_119 = arith.constant 0 : index
    %c0_120 = arith.constant 0 : index
    %298 = vector.load %arg14[%297, %c1_118, %c0_119, %c0_120] : memref<2x3x1x32xf32, #tpu.memory_space<vmem>>, vector<1x1x1x32xf32>
    %299 = vector.shape_cast %298 : vector<1x1x1x32xf32> to vector<1x32xf32>
    %300 = arith.index_cast %arg1 : i32 to index
    %c1_121 = arith.constant 1 : index
    %c0_122 = arith.constant 0 : index
    %c0_123 = arith.constant 0 : index
    %301 = vector.load %arg15[%300, %c1_121, %c0_122, %c0_123] : memref<2x3x1x32xf32, #tpu.memory_space<vmem>>, vector<1x1x1x32xf32>
    %302 = vector.shape_cast %301 : vector<1x1x1x32xf32> to vector<1x32xf32>
    %cst_124 = arith.constant dense<0.000000e+00> : vector<8xf32>
    %303 = vector.multi_reduction <add>, %296, %cst_124 [1] : vector<8x32xf32> to vector<8xf32>
    %304 = vector.shape_cast %303 : vector<8xf32> to vector<8x1xf32>
    %cst_125 = arith.constant 3.200000e+01 : f32
    %305 = vector.broadcast %cst_125 : f32 to vector<8x1xf32>
    %306 = arith.divf %304, %305 : vector<8x1xf32>
    %307 = vector.broadcast %306 : vector<8x1xf32> to vector<8x32xf32>
    %308 = arith.subf %296, %307 : vector<8x32xf32>
    %309 = arith.mulf %308, %308 : vector<8x32xf32>
    %cst_126 = arith.constant dense<0.000000e+00> : vector<8xf32>
    %310 = vector.multi_reduction <add>, %309, %cst_126 [1] : vector<8x32xf32> to vector<8xf32>
    %311 = vector.shape_cast %310 : vector<8xf32> to vector<8x1xf32>
    %cst_127 = arith.constant 3.200000e+01 : f32
    %312 = vector.broadcast %cst_127 : f32 to vector<8x1xf32>
    %313 = arith.divf %311, %312 : vector<8x1xf32>
    %cst_128 = arith.constant 9.99999974E-6 : f32
    %314 = vector.broadcast %cst_128 : f32 to vector<8x1xf32>
    %315 = arith.addf %313, %314 : vector<8x1xf32>
    %316 = math.rsqrt %315 : vector<8x1xf32>
    %317 = vector.broadcast %316 : vector<8x1xf32> to vector<8x32xf32>
    %318 = arith.mulf %308, %317 : vector<8x32xf32>
    %319 = vector.broadcast %299 : vector<1x32xf32> to vector<8x32xf32>
    %320 = arith.mulf %318, %319 : vector<8x32xf32>
    %321 = vector.broadcast %302 : vector<1x32xf32> to vector<8x32xf32>
    %322 = arith.addf %320, %321 : vector<8x32xf32>
    %323 = arith.truncf %322 : vector<8x32xf32> to vector<8x32xbf16>
    %324 = arith.index_cast %arg1 : i32 to index
    %c0_129 = arith.constant 0 : index
    %c0_130 = arith.constant 0 : index
    %325 = vector.load %arg10[%324, %c0_129, %c0_130] : memref<2x32x64xbf16, #tpu.memory_space<vmem>>, vector<1x32x64xbf16>
    %326 = vector.shape_cast %325 : vector<1x32x64xbf16> to vector<32x64xbf16>
    %cst_131 = arith.constant dense<0.000000e+00> : vector<8x64xf32>
    %327 = tpu.matmul %323, %326, %cst_131 {dimension_numbers = #tpu.dot_dimension_numbers<[1], [0], [0], [1], [0, 0, 1, 1], [], []>} : vector<8x32xbf16>, vector<32x64xbf16>, vector<8x64xf32> -> vector<8x64xf32>
    %328 = arith.index_cast %arg1 : i32 to index
    %c0_132 = arith.constant 0 : index
    %c0_133 = arith.constant 0 : index
    %329 = vector.load %arg11[%328, %c0_132, %c0_133] : memref<2x1x64xf32, #tpu.memory_space<vmem>>, vector<1x1x64xf32>
    %330 = vector.shape_cast %329 : vector<1x1x64xf32> to vector<1x64xf32>
    %331 = vector.broadcast %330 : vector<1x64xf32> to vector<8x64xf32>
    %332 = arith.addf %327, %331 : vector<8x64xf32>
    %cst_134 = arith.constant 0.000000e+00 : f32
    %333 = vector.broadcast %cst_134 : f32 to vector<8x64xf32>
    %334 = arith.maximumf %332, %333 : vector<8x64xf32>
    %335 = arith.truncf %334 : vector<8x64xf32> to vector<8x64xbf16>
    %336 = arith.index_cast %arg1 : i32 to index
    %c0_135 = arith.constant 0 : index
    %c0_136 = arith.constant 0 : index
    %337 = vector.load %arg12[%336, %c0_135, %c0_136] : memref<2x64x32xbf16, #tpu.memory_space<vmem>>, vector<1x64x32xbf16>
    %338 = vector.shape_cast %337 : vector<1x64x32xbf16> to vector<64x32xbf16>
    %cst_137 = arith.constant dense<0.000000e+00> : vector<8x32xf32>
    %339 = tpu.matmul %335, %338, %cst_137 {dimension_numbers = #tpu.dot_dimension_numbers<[1], [0], [0], [1], [0, 0, 1, 1], [], []>} : vector<8x64xbf16>, vector<64x32xbf16>, vector<8x32xf32> -> vector<8x32xf32>
    %340 = arith.index_cast %arg1 : i32 to index
    %c0_138 = arith.constant 0 : index
    %c0_139 = arith.constant 0 : index
    %341 = vector.load %arg13[%340, %c0_138, %c0_139] : memref<2x1x32xf32, #tpu.memory_space<vmem>>, vector<1x1x32xf32>
    %342 = vector.shape_cast %341 : vector<1x1x32xf32> to vector<1x32xf32>
    %343 = vector.broadcast %342 : vector<1x32xf32> to vector<8x32xf32>
    %344 = arith.addf %339, %343 : vector<8x32xf32>
    %345 = arith.addf %322, %344 : vector<8x32xf32>
    %346 = arith.index_cast %arg1 : i32 to index
    %c2_140 = arith.constant 2 : index
    %c0_141 = arith.constant 0 : index
    %c0_142 = arith.constant 0 : index
    %347 = vector.load %arg14[%346, %c2_140, %c0_141, %c0_142] : memref<2x3x1x32xf32, #tpu.memory_space<vmem>>, vector<1x1x1x32xf32>
    %348 = vector.shape_cast %347 : vector<1x1x1x32xf32> to vector<1x32xf32>
    %349 = arith.index_cast %arg1 : i32 to index
    %c2_143 = arith.constant 2 : index
    %c0_144 = arith.constant 0 : index
    %c0_145 = arith.constant 0 : index
    %350 = vector.load %arg15[%349, %c2_143, %c0_144, %c0_145] : memref<2x3x1x32xf32, #tpu.memory_space<vmem>>, vector<1x1x1x32xf32>
    %351 = vector.shape_cast %350 : vector<1x1x1x32xf32> to vector<1x32xf32>
    %cst_146 = arith.constant dense<0.000000e+00> : vector<8xf32>
    %352 = vector.multi_reduction <add>, %345, %cst_146 [1] : vector<8x32xf32> to vector<8xf32>
    %353 = vector.shape_cast %352 : vector<8xf32> to vector<8x1xf32>
    %cst_147 = arith.constant 3.200000e+01 : f32
    %354 = vector.broadcast %cst_147 : f32 to vector<8x1xf32>
    %355 = arith.divf %353, %354 : vector<8x1xf32>
    %356 = vector.broadcast %355 : vector<8x1xf32> to vector<8x32xf32>
    %357 = arith.subf %345, %356 : vector<8x32xf32>
    %358 = arith.mulf %357, %357 : vector<8x32xf32>
    %cst_148 = arith.constant dense<0.000000e+00> : vector<8xf32>
    %359 = vector.multi_reduction <add>, %358, %cst_148 [1] : vector<8x32xf32> to vector<8xf32>
    %360 = vector.shape_cast %359 : vector<8xf32> to vector<8x1xf32>
    %cst_149 = arith.constant 3.200000e+01 : f32
    %361 = vector.broadcast %cst_149 : f32 to vector<8x1xf32>
    %362 = arith.divf %360, %361 : vector<8x1xf32>
    %cst_150 = arith.constant 9.99999974E-6 : f32
    %363 = vector.broadcast %cst_150 : f32 to vector<8x1xf32>
    %364 = arith.addf %362, %363 : vector<8x1xf32>
    %365 = math.rsqrt %364 : vector<8x1xf32>
    %366 = vector.broadcast %365 : vector<8x1xf32> to vector<8x32xf32>
    %367 = arith.mulf %357, %366 : vector<8x32xf32>
    %368 = vector.broadcast %348 : vector<1x32xf32> to vector<8x32xf32>
    %369 = arith.mulf %367, %368 : vector<8x32xf32>
    %370 = vector.broadcast %351 : vector<1x32xf32> to vector<8x32xf32>
    %371 = arith.addf %369, %370 : vector<8x32xf32>
    %c0_151 = arith.constant 0 : index
    %c0_152 = arith.constant 0 : index
    %372 = vector.load %arg19[%c0_151, %c0_152] : memref<8x32xf32, #tpu.memory_space<vmem>>, vector<8x32xf32>
    tpu.vector_store %arg19[%c0_151, %c0_152], %371 {strides = array<i32>} : memref<8x32xf32, #tpu.memory_space<vmem>>, vector<8x32xf32>,
    %c1_i32 = arith.constant 1 : i32
    %373 = arith.cmpi eq, %arg1, %c1_i32 : i32
    %374 = arith.extui %373 : i1 to i32
    %c0_i32_153 = arith.constant 0 : i32
    %375 = arith.cmpi ne, %374, %c0_i32_153 : i32
    scf.if %375 {
      %c0_154 = arith.constant 0 : index
      %c0_155 = arith.constant 0 : index
      %376 = vector.load %arg16[%c0_154, %c0_155] : memref<1x32xf32, #tpu.memory_space<vmem>>, vector<1x32xf32>
      %c0_156 = arith.constant 0 : index
      %c0_157 = arith.constant 0 : index
      %377 = vector.load %arg17[%c0_156, %c0_157] : memref<1x32xf32, #tpu.memory_space<vmem>>, vector<1x32xf32>
      %cst_158 = arith.constant dense<0.000000e+00> : vector<8xf32>
      %378 = vector.multi_reduction <add>, %371, %cst_158 [1] : vector<8x32xf32> to vector<8xf32>
      %379 = vector.shape_cast %378 : vector<8xf32> to vector<8x1xf32>
      %cst_159 = arith.constant 3.200000e+01 : f32
      %380 = vector.broadcast %cst_159 : f32 to vector<8x1xf32>
      %381 = arith.divf %379, %380 : vector<8x1xf32>
      %382 = vector.broadcast %381 : vector<8x1xf32> to vector<8x32xf32>
      %383 = arith.subf %371, %382 : vector<8x32xf32>
      %384 = arith.mulf %383, %383 : vector<8x32xf32>
      %cst_160 = arith.constant dense<0.000000e+00> : vector<8xf32>
      %385 = vector.multi_reduction <add>, %384, %cst_160 [1] : vector<8x32xf32> to vector<8xf32>
      %386 = vector.shape_cast %385 : vector<8xf32> to vector<8x1xf32>
      %cst_161 = arith.constant 3.200000e+01 : f32
      %387 = vector.broadcast %cst_161 : f32 to vector<8x1xf32>
      %388 = arith.divf %386, %387 : vector<8x1xf32>
      %cst_162 = arith.constant 9.99999974E-6 : f32
      %389 = vector.broadcast %cst_162 : f32 to vector<8x1xf32>
      %390 = arith.addf %388, %389 : vector<8x1xf32>
      %391 = math.rsqrt %390 : vector<8x1xf32>
      %392 = vector.broadcast %391 : vector<8x1xf32> to vector<8x32xf32>
      %393 = arith.mulf %383, %392 : vector<8x32xf32>
      %394 = vector.broadcast %376 : vector<1x32xf32> to vector<8x32xf32>
      %395 = arith.mulf %393, %394 : vector<8x32xf32>
      %396 = vector.broadcast %377 : vector<1x32xf32> to vector<8x32xf32>
      %397 = arith.addf %395, %396 : vector<8x32xf32>
      %c0_163 = arith.constant 0 : index
      %c0_164 = arith.constant 0 : index
      %c0_165 = arith.constant 0 : index
      %398 = vector.load %arg18[%c0_163, %c0_164, %c0_165] : memref<1x8x32xf32, #tpu.memory_space<vmem>>, vector<1x8x32xf32>
      %399 = vector.shape_cast %398 : vector<1x8x32xf32> to vector<8x32xf32>
      %400 = vector.shape_cast %397 : vector<8x32xf32> to vector<1x8x32xf32>
      tpu.vector_store %arg18[%c0_163, %c0_164, %c0_165], %400 {strides = array<i32>} : memref<1x8x32xf32, #tpu.memory_space<vmem>>, vector<1x8x32xf32>,
    } else {
    }
    return
  }
  func.func @transform_0(%arg0: i32, %arg1: i32) -> (i32, i32, i32) {
    %c0_i32 = arith.constant 0 : i32
    %c0_i32_0 = arith.constant 0 : i32
    %c0_i32_1 = arith.constant 0 : i32
    return %arg0, %c0_i32, %c0_i32_0 : i32, i32, i32
  }
  func.func @transform_1(%arg0: i32, %arg1: i32) -> (i32, i32, i32) {
    %c0_i32 = arith.constant 0 : i32
    %c0_i32_0 = arith.constant 0 : i32
    %c0_i32_1 = arith.constant 0 : i32
    return %arg0, %c0_i32, %c0_i32_0 : i32, i32, i32
  }
  func.func @transform_2(%arg0: i32, %arg1: i32) -> (i32, i32, i32) {
    %c0_i32 = arith.constant 0 : i32
    %c0_i32_0 = arith.constant 0 : i32
    %c0_i32_1 = arith.constant 0 : i32
    return %arg0, %c0_i32, %c0_i32_0 : i32, i32, i32
  }
  func.func @transform_3(%arg0: i32, %arg1: i32) -> (i32, i32, i32) {
    %c0_i32 = arith.constant 0 : i32
    %c0_i32_0 = arith.constant 0 : i32
    %c0_i32_1 = arith.constant 0 : i32
    return %arg0, %c0_i32, %c0_i32_0 : i32, i32, i32
  }
  func.func @transform_4(%arg0: i32, %arg1: i32) -> (i32, i32, i32, i32) {
    %c0_i32 = arith.constant 0 : i32
    %c0_i32_0 = arith.constant 0 : i32
    %c0_i32_1 = arith.constant 0 : i32
    %c0_i32_2 = arith.constant 0 : i32
    %c0_i32_3 = arith.constant 0 : i32
    return %c0_i32, %c0_i32_0, %c0_i32_1, %c0_i32_2 : i32, i32, i32, i32
  }
  func.func @transform_5(%arg0: i32, %arg1: i32) -> (i32, i32, i32, i32) {
    %c0_i32 = arith.constant 0 : i32
    %c0_i32_0 = arith.constant 0 : i32
    %c0_i32_1 = arith.constant 0 : i32
    %c0_i32_2 = arith.constant 0 : i32
    %c0_i32_3 = arith.constant 0 : i32
    return %c0_i32, %c0_i32_0, %c0_i32_1, %c0_i32_2 : i32, i32, i32, i32
  }
  func.func @transform_6(%arg0: i32, %arg1: i32) -> (i32, i32, i32, i32) {
    %c0_i32 = arith.constant 0 : i32
    %c0_i32_0 = arith.constant 0 : i32
    %c0_i32_1 = arith.constant 0 : i32
    %c0_i32_2 = arith.constant 0 : i32
    %c0_i32_3 = arith.constant 0 : i32
    return %c0_i32, %c0_i32_0, %c0_i32_1, %c0_i32_2 : i32, i32, i32, i32
  }
  func.func @transform_7(%arg0: i32, %arg1: i32) -> (i32, i32, i32, i32) {
    %c0_i32 = arith.constant 0 : i32
    %c0_i32_0 = arith.constant 0 : i32
    %c0_i32_1 = arith.constant 0 : i32
    %c0_i32_2 = arith.constant 0 : i32
    %c0_i32_3 = arith.constant 0 : i32
    return %c0_i32, %c0_i32_0, %c0_i32_1, %c0_i32_2 : i32, i32, i32, i32
  }
  func.func @transform_8(%arg0: i32, %arg1: i32) -> (i32, i32, i32) {
    %c0_i32 = arith.constant 0 : i32
    %c0_i32_0 = arith.constant 0 : i32
    %c0_i32_1 = arith.constant 0 : i32
    %c0_i32_2 = arith.constant 0 : i32
    return %c0_i32, %c0_i32_0, %c0_i32_1 : i32, i32, i32
  }
  func.func @transform_9(%arg0: i32, %arg1: i32) -> (i32, i32, i32) {
    %c0_i32 = arith.constant 0 : i32
    %c0_i32_0 = arith.constant 0 : i32
    %c0_i32_1 = arith.constant 0 : i32
    %c0_i32_2 = arith.constant 0 : i32
    return %c0_i32, %c0_i32_0, %c0_i32_1 : i32, i32, i32
  }
  func.func @transform_10(%arg0: i32, %arg1: i32) -> (i32, i32, i32) {
    %c0_i32 = arith.constant 0 : i32
    %c0_i32_0 = arith.constant 0 : i32
    %c0_i32_1 = arith.constant 0 : i32
    %c0_i32_2 = arith.constant 0 : i32
    return %c0_i32, %c0_i32_0, %c0_i32_1 : i32, i32, i32
  }
  func.func @transform_11(%arg0: i32, %arg1: i32) -> (i32, i32, i32) {
    %c0_i32 = arith.constant 0 : i32
    %c0_i32_0 = arith.constant 0 : i32
    %c0_i32_1 = arith.constant 0 : i32
    %c0_i32_2 = arith.constant 0 : i32
    return %c0_i32, %c0_i32_0, %c0_i32_1 : i32, i32, i32
  }
  func.func @transform_12(%arg0: i32, %arg1: i32) -> (i32, i32, i32, i32) {
    %c0_i32 = arith.constant 0 : i32
    %c0_i32_0 = arith.constant 0 : i32
    %c0_i32_1 = arith.constant 0 : i32
    %c0_i32_2 = arith.constant 0 : i32
    %c0_i32_3 = arith.constant 0 : i32
    return %c0_i32, %c0_i32_0, %c0_i32_1, %c0_i32_2 : i32, i32, i32, i32
  }
  func.func @transform_13(%arg0: i32, %arg1: i32) -> (i32, i32, i32, i32) {
    %c0_i32 = arith.constant 0 : i32
    %c0_i32_0 = arith.constant 0 : i32
    %c0_i32_1 = arith.constant 0 : i32
    %c0_i32_2 = arith.constant 0 : i32
    %c0_i32_3 = arith.constant 0 : i32
    return %c0_i32, %c0_i32_0, %c0_i32_1, %c0_i32_2 : i32, i32, i32, i32
  }
  func.func @transform_14(%arg0: i32, %arg1: i32) -> (i32, i32) {
    %c0_i32 = arith.constant 0 : i32
    %c0_i32_0 = arith.constant 0 : i32
    %c0_i32_1 = arith.constant 0 : i32
    return %c0_i32, %c0_i32_0 : i32, i32
  }
  func.func @transform_15(%arg0: i32, %arg1: i32) -> (i32, i32) {
    %c0_i32 = arith.constant 0 : i32
    %c0_i32_0 = arith.constant 0 : i32
    %c0_i32_1 = arith.constant 0 : i32
    return %c0_i32, %c0_i32_0 : i32, i32
  }
  func.func @transform_16(%arg0: i32, %arg1: i32) -> (i32, i32, i32) {
    %c0_i32 = arith.constant 0 : i32
    %c0_i32_0 = arith.constant 0 : i32
    %c0_i32_1 = arith.constant 0 : i32
    return %arg0, %c0_i32, %c0_i32_0 : i32, i32, i32
  }
}

</mosaic_0001>

<bundles_post_ra>
// kernel: transformer_decoder.1
= control target key start
LH: loop header
LB: loop body
LE: loop exit
PB: predicated region body
PF: predicated region fallthrough
CT: control target
= control target key end

     0   :  { %s5620_s0 = inlined_call_operand.hbm [shape: f32[2,8,32], index: 0, kind: input, shape index: {}]   ;;  %s5621_s1 = inlined_call_operand.hbm [shape: f32[2,16,32], index: 1, kind: input, shape index: {}]   ;;  %s5622_s2 = inlined_call_operand.hbm [shape: f32[2,8,32], index: 2, kind: input, shape index: {}]   ;;  %s5623_s3 = inlined_call_operand.hbm [shape: f32[2,16,32], index: 3, kind: input, shape index: {}]   ;;  %s5624_s4 = inlined_call_operand.hbm [shape: bf16[2,6,32,32], index: 4, kind: input, shape index: {}]   ;;  %s5625_s5 = inlined_call_operand.hbm [shape: f32[2,6,1,32], index: 5, kind: input, shape index: {}]   ;;  %s5626_s6 = inlined_call_operand.hbm [shape: bf16[2,2,32,32], index: 6, kind: input, shape index: {}]   ;;  %s5627_s7 = inlined_call_operand.hbm [shape: f32[2,2,1,32], index: 7, kind: input, shape index: {}]   ;;  %s5628_s8 = inlined_call_operand.hbm [shape: bf16[2,32,64], index: 8, kind: input, shape index: {}]   ;;  %s5629_s9 = inlined_call_operand.hbm [shape: f32[2,1,64], index: 9, kind: input, shape index: {}]   ;;  %s5630_s10 = inlined_call_operand.hbm [shape: bf16[2,64,32], index: 10, kind: input, shape index: {}]   ;;  %s5631_s11 = inlined_call_operand.hbm [shape: f32[2,1,32], index: 11, kind: input, shape index: {}]   ;;  %s5632_s12 = inlined_call_operand.hbm [shape: f32[2,3,1,32], index: 12, kind: input, shape index: {}]   ;;  %s5633_s13 = inlined_call_operand.hbm [shape: f32[2,3,1,32], index: 13, kind: input, shape index: {}]   ;;  %s5634_s14 = inlined_call_operand.hbm [shape: f32[1,32], index: 14, kind: input, shape index: {}]   ;;  %s5635_s15 = inlined_call_operand.hbm [shape: f32[1,32], index: 15, kind: input, shape index: {}]   ;;  %s5636_s16 = inlined_call_operand.hbm [shape: f32[2,8,32], index: 16, kind: output, shape index: {}]  }
   0x1   :  { %5678 = sst [smem:[#allocation52_spill]] %s5620_s0 }
   0x2   :  { %5679 = sst [smem:[#allocation53_spill]] %s5621_s1 }
   0x3   :  { %5680 = sst [smem:[#allocation54_spill]] %s5622_s2 }
   0x4   :  { %5681 = sst [smem:[#allocation55_spill]] %s5624_s4 }
   0x5   :  { %5682 = sst [smem:[#allocation56_spill]] %s5625_s5 }
   0x6   :  { %5683 = sst [smem:[#allocation57_spill]] %s5626_s6 }
   0x7   :  { %5684 = sst [smem:[#allocation58_spill]] %s5627_s7 }
   0x8   :  { %5685 = sst [smem:[#allocation59_spill]] %s5628_s8 }
   0x9   :  { %5686 = sst [smem:[#allocation60_spill]] %s5629_s9 }
   0xa   :  { %5687 = sst [smem:[#allocation61_spill]] %s5630_s10 }
   0xb   :  { %5688 = sst [smem:[#allocation62_spill]] %s5631_s11 }
   0xc   :  { %5689 = sst [smem:[#allocation63_spill]] %s5632_s12 }
   0xd   :  { %5690 = sst [smem:[#allocation64_spill]] %s5633_s13 }
   0xe   :  { %5691 = sst [smem:[#allocation65_spill]] %s5634_s14 }
   0xf   :  { %5692 = sst [smem:[#allocation66_spill]] %s5635_s15 }
  0x10   :  { %5693 = sst [smem:[#allocation67_spill]] %s5636_s16 }
  0x11   :  { %21 = vsyncpa [#allocation4], 0 }
  0x12   :  { %23 = vsyncpa [#allocation4 + $0x1], 0 }
  0x13   :  { %24 = vsyncpa [#allocation7], 0 }
  0x14   :  { %26 = vsyncpa [#allocation7 + $0x1], 0 }
  0x15   :  { %27 = vsyncpa [#allocation10], 0 }
  0x16   :  { %29 = vsyncpa [#allocation10 + $0x1], 0 }
  0x17   :  { %30 = vsyncpa [#allocation13], 0 }
  0x18   :  { %31 = vsyncpa [#allocation16], 0 }
  0x19   :  { %32 = vsyncpa [#allocation19], 0 }
  0x1a   :  { %33 = vsyncpa [#allocation22], 0 }
  0x1b   :  { %34 = vsyncpa [#allocation25], 0 }
  0x1c   :  { %35 = vsyncpa [#allocation28], 0 }
  0x1d   :  { %36 = vsyncpa [#allocation5], 0 }
  0x1e   :  { %38 = vsyncpa [#allocation5 + $0x1], 0  ;;  %s4667_s21 = smov 0   ;;  %s4669_s22 = smov 0  }
  0x1f   :  { %s4671_s23 = smov 0   ;;  %s4673_s24 = smov 0  }
  0x20   :  { %s4675_s25 = smov 0   ;;  %s4677_s26 = smov 0  }
  0x21   :  { %s4679_s27 = smov 0   ;;  %s4681_s28 = smov 0  }
  0x22 LB: > { %5694 = sst [smem:[#allocation41_spill]] %s4524_s21  ;;  %s4708_s29 = sadd.s32 4294967295, %s4552_s28   ;;  %s4552_s28 = sphi %s4681_s28, %s44_s28   ;;  %s4548_s27 = sphi %s4679_s27, %s5777_s27   ;;  %s4544_s26 = sphi %s4677_s26, %s5772_s26   ;;  %s4540_s25 = sphi %s4675_s25, %s5776_s25   ;;  %s4536_s24 = sphi %s4673_s24, %s5771_s24   ;;  %s4532_s23 = sphi %s4671_s23, %s5770_s23   ;;  %s4528_s22 = sphi %s4669_s22, %s5775_s22   ;;  %s4524_s21 = sphi %s4667_s21, %s5774_s21  }
  0x23   : > { %5695 = sst [smem:[#allocation42_spill]] %s4532_s23  ;;  %p3221_p0 = scmp.ge.s32.totalorder %s4552_s28, 1 }
  0x24   : > { %5696 = sst [smem:[#allocation43_spill]] %s4536_s24  ;;  %p5643_p1 = scmp.eq.s32.totalorder %s4708_s29, 0 }
  0x25   : > { %5697 = sst [smem:[#allocation44_spill]] %s4540_s25  ;;  %p443_p2 = scmp.lt.s32.totalorder %s4552_s28, 5 }
  0x26   : > { %5698 = sst [smem:[#allocation45_spill]] %s4544_s26  ;;  %s4554_s0 = smov [#allocation11]  }
  0x27   : > { %p4713_p3 = pnand %p3221_p0, %p443_p2  ;;  %s455_s17 = sshll.u32 %s4554_s0, 4  ;;  %s456_s17 = int_to_ptr.vmem [resolvable:$true] %s455_s17 }
  0x28   : > { %s4555_s19 = smov [#allocation12]   ;;  %s5702_s4 = sld [smem:[#allocation55_spill]] }
  0x29   : > { %s5699_s30 = scalar_select %p4713_p3, 1, 0 }
  0x2a   : > { %p3737_p4 = pneg %p4713_p3  ;;  %s468_s20 = sshll.u32 %s4555_s19, 4  ;;  %s4725_s20 = int_to_ptr.vmem [resolvable:$true] %s468_s20 }
  0x2b   : > { %5700 = sst [smem:[#allocation46_spill]] %s5699_s30 }
  0x2c   : > { %p4721_p5 = pnand %p3737_p4, %p5643_p1 }
  0x2e   : > { %s5701_s18 = scalar_select %p4721_p5, 1, 0 }
  0x2f   : > { %s3962_s24 = scalar_lea.hbm %s5702_s4, 3072  ;;  %p4735_p7 = pneg %p4721_p5 }
  0x30   : > { %p3963_p6 = scmp.ne.s32.totalorder %s5702_s4, %s3962_s24  ;;  %p3969_p10 = scmp.lt.u32.totalorder %s3962_s24, %s5702_s4 }
  0x31   : > { %s5703_s0 = scalar_select %p4735_p7, 1, 0 }
  0x32   : > { %p3965_p8 = pnand %p4735_p7, %p3963_p6 }
  0x34   : > { %p3966_p9 = pneg %p3965_p8 }
  0x36   : > { %p3971_p11 = pnand %p3969_p10, %p3966_p9 }
  0x38   : > { %3974 = shalt.err (!%p3971_p11)
}
  0x39   : > { %s3975_s16 = scalar_lea.vmem %s456_s17, 3072  ;;  %p3983_p2 = scmp.lt.s32.totalorder %s456_s17, %s456_s17 }
  0x3a   : > { %p3976_p12 = scmp.ne.s32.totalorder %s456_s17, %s3975_s16  ;;  %p3984_p4 = scmp.lt.s32.totalorder %s3975_s16, %s3975_s16 }
  0x3c   : > { %p3978_p13 = pnand %p3976_p12, %p4735_p7  ;;  %p3985_p1 = por %p3984_p4, %p3983_p2 }
  0x3e   : > { %p3979_p0 = pneg %p3978_p13 }
  0x40   : > { %p3986_p3 = pnand %p3985_p1, %p3979_p0 }
  0x42   : > { %3989 = shalt.err (!%p3986_p3)
}
  0x43   : > { %s5649_s2 = smov 64   ;;  %s5651_s15 = smov 4  }
  0x44   : > { %3740 = dma.hbm_to_vmem [thread:$0]  (!%p4721_p5), %s5702_s4, 3072, %s456_s17, [#allocation10], %s5649_s2, %s5649_s2, %s5651_s15  }
  0x45   : > { %s5704_s5 = sld [smem:[#allocation56_spill]] }
  0x4b   : > { %s3990_s14 = scalar_lea.hbm %s5704_s5, 192 }
  0x4c   : > { %p3991_p1 = scmp.ne.s32.totalorder %s5704_s5, %s3990_s14  ;;  %p3997_p8 = scmp.lt.u32.totalorder %s3990_s14, %s5704_s5 }
  0x4e   : > { %p3993_p3 = pnand %p3991_p1, %p4735_p7 }
  0x50   : > { %p3994_p6 = pneg %p3993_p3 }
  0x52   : > { %p3999_p9 = pnand %p3997_p8, %p3994_p6 }
  0x54   : > { %4002 = shalt.err (!%p3999_p9)
}
  0x55   : > { %s4003_s17 = scalar_lea.vmem %s4725_s20, 192  ;;  %p4011_p13 = scmp.lt.s32.totalorder %s4725_s20, %s4725_s20 }
  0x56   : > { %p4004_p10 = scmp.ne.s32.totalorder %s4725_s20, %s4003_s17  ;;  %p4012_p0 = scmp.lt.s32.totalorder %s4003_s17, %s4003_s17 }
  0x58   : > { %p4006_p11 = pnand %p4004_p10, %p4735_p7  ;;  %p4013_p2 = por %p4012_p0, %p4011_p13 }
  0x5a   : > { %p4007_p12 = pneg %p4006_p11 }
  0x5c   : > { %p4014_p4 = pnand %p4013_p2, %p4007_p12 }
  0x5e   : > { %4017 = shalt.err (!%p4014_p4)
}
  0x5f   : > { %s5655_s12 = smov 16   ;;  %s5656_s8 = smov 1  }
  0x60   : > { %3743 = dma.hbm_to_vmem [thread:$0]  (!%p4721_p5), %s5704_s5, 192, %s4725_s20, [#allocation13], %s5655_s12, %s5655_s12, %s5656_s8  }
  0x61   : > { %s4560_s24 = smov [#allocation15]   ;;  %s4561_s30 = smov [#allocation18]  }
  0x62   : > { %s494_s25 = sshll.u32 %s4560_s24, 4  ;;  %s520_s19 = sshll.u32 %s4561_s30, 4  ;;  %s495_s25 = int_to_ptr.vmem [resolvable:$true] %s494_s25  ;;  %s4780_s19 = int_to_ptr.vmem [resolvable:$true] %s520_s19 }
  0x63   : > { %s5705_s7 = sld [smem:[#allocation58_spill]] }
  0x69   : > { %s4018_s2 = scalar_lea.hbm %s5705_s7, 64 }
  0x6a   : > { %p4019_p1 = scmp.ne.s32.totalorder %s5705_s7, %s4018_s2  ;;  %p4025_p8 = scmp.lt.u32.totalorder %s4018_s2, %s5705_s7 }
  0x6c   : > { %p4021_p3 = pnand %p4019_p1, %p4735_p7 }
  0x6e   : > { %p4022_p6 = pneg %p4021_p3 }
  0x70   : > { %p4027_p9 = pnand %p4025_p8, %p4022_p6 }
  0x72   : > { %4030 = shalt.err (!%p4027_p9)
}
  0x73   : > { %s4031_s14 = scalar_lea.vmem %s495_s25, 64  ;;  %p4039_p13 = scmp.lt.s32.totalorder %s495_s25, %s495_s25 }
  0x74   : > { %p4032_p10 = scmp.ne.s32.totalorder %s495_s25, %s4031_s14  ;;  %p4040_p0 = scmp.lt.s32.totalorder %s4031_s14, %s4031_s14 }
  0x76   : > { %p4034_p11 = pnand %p4032_p10, %p4735_p7  ;;  %p4041_p2 = por %p4040_p0, %p4039_p13 }
  0x78   : > { %p4035_p12 = pneg %p4034_p11 }
  0x7a   : > { %p4042_p4 = pnand %p4041_p2, %p4035_p12 }
  0x7c   : > { %4045 = shalt.err (!%p4042_p4)
}
  0x7d   : > { %3749 = dma.hbm_to_vmem [thread:$0]  (!%p4721_p5), %s5705_s7, 64, %s495_s25, [#allocation16], %s5655_s12, %s5655_s12, %s5656_s8  }
  0x7e   : > { %s5706_s9 = sld [smem:[#allocation60_spill]] }
  0x84   : > { %s4046_s30 = scalar_lea.hbm %s5706_s9, 32 }
  0x85   : > { %p4047_p1 = scmp.ne.s32.totalorder %s5706_s9, %s4046_s30  ;;  %p4053_p8 = scmp.lt.u32.totalorder %s4046_s30, %s5706_s9 }
  0x87   : > { %p4049_p3 = pnand %p4047_p1, %p4735_p7 }
  0x89   : > { %p4050_p6 = pneg %p4049_p3 }
  0x8b   : > { %p4055_p9 = pnand %p4053_p8, %p4050_p6 }
  0x8d   : > { %4058 = shalt.err (!%p4055_p9)
}
  0x8e   : > { %s4059_s25 = scalar_lea.vmem %s4780_s19, 32  ;;  %p4067_p13 = scmp.lt.s32.totalorder %s4780_s19, %s4780_s19 }
  0x8f   : > { %p4060_p10 = scmp.ne.s32.totalorder %s4780_s19, %s4059_s25  ;;  %p4068_p0 = scmp.lt.s32.totalorder %s4059_s25, %s4059_s25 }
  0x91   : > { %p4062_p11 = pnand %p4060_p10, %p4735_p7  ;;  %p4069_p2 = por %p4068_p0, %p4067_p13 }
  0x93   : > { %p4063_p12 = pneg %p4062_p11 }
  0x95   : > { %p4070_p4 = pnand %p4069_p2, %p4063_p12 }
  0x97   : > { %4073 = shalt.err (!%p4070_p4)
}
  0x98   : > { %3755 = dma.hbm_to_vmem [thread:$0]  (!%p4721_p5), %s5706_s9, 32, %s4780_s19, [#allocation19], %s5655_s12, %s5655_s12, %s5656_s8  }
  0x99   : > { %s4562_s2 = smov [#allocation21]   ;;  %s4563_s24 = smov [#allocation24]  }
  0x9a   : > { %s546_s15 = sshll.u32 %s4562_s2, 4  ;;  %s572_s30 = sshll.u32 %s4563_s24, 4  ;;  %s547_s15 = int_to_ptr.vmem [resolvable:$true] %s546_s15  ;;  %s4829_s30 = int_to_ptr.vmem [resolvable:$true] %s572_s30 }
  0x9b   : > { %s5707_s11 = sld [smem:[#allocation62_spill]] }
  0xa1   : > { %s4074_s10 = scalar_lea.hbm %s5707_s11, 32 }
  0xa2   : > { %p4075_p1 = scmp.ne.s32.totalorder %s5707_s11, %s4074_s10  ;;  %p4081_p8 = scmp.lt.u32.totalorder %s4074_s10, %s5707_s11 }
  0xa4   : > { %p4077_p3 = pnand %p4075_p1, %p4735_p7 }
  0xa6   : > { %p4078_p6 = pneg %p4077_p3 }
  0xa8   : > { %p4083_p9 = pnand %p4081_p8, %p4078_p6 }
  0xaa   : > { %4086 = shalt.err (!%p4083_p9)
}
  0xab   : > { %s4087_s4 = scalar_lea.vmem %s547_s15, 32  ;;  %p4095_p13 = scmp.lt.s32.totalorder %s547_s15, %s547_s15 }
  0xac   : > { %p4088_p10 = scmp.ne.s32.totalorder %s547_s15, %s4087_s4  ;;  %p4096_p0 = scmp.lt.s32.totalorder %s4087_s4, %s4087_s4 }
  0xae   : > { %p4090_p11 = pnand %p4088_p10, %p4735_p7  ;;  %p4097_p2 = por %p4096_p0, %p4095_p13 }
  0xb0   : > { %p4091_p12 = pneg %p4090_p11 }
  0xb2   : > { %p4098_p4 = pnand %p4097_p2, %p4091_p12 }
  0xb4   : > { %4101 = shalt.err (!%p4098_p4)
}
  0xb5   : > { %3761 = dma.hbm_to_vmem [thread:$0]  (!%p4721_p5), %s5707_s11, 32, %s547_s15, [#allocation22], %s5655_s12, %s5655_s12, %s5656_s8  }
  0xb6   : > { %s5708_s13 = sld [smem:[#allocation64_spill]] }
  0xbc   : > { %s4102_s10 = scalar_lea.hbm %s5708_s13, 96 }
  0xbd   : > { %p4103_p1 = scmp.ne.s32.totalorder %s5708_s13, %s4102_s10  ;;  %p4109_p8 = scmp.lt.u32.totalorder %s4102_s10, %s5708_s13 }
  0xbf   : > { %p4105_p3 = pnand %p4103_p1, %p4735_p7 }
  0xc1   : > { %p4106_p6 = pneg %p4105_p3 }
  0xc3   : > { %p4111_p9 = pnand %p4109_p8, %p4106_p6 }
  0xc5   : > { %4114 = shalt.err (!%p4111_p9)
}
  0xc6   : > { %s4115_s15 = scalar_lea.vmem %s4829_s30, 96  ;;  %p4123_p13 = scmp.lt.s32.totalorder %s4829_s30, %s4829_s30 }
  0xc7   : > { %p4116_p10 = scmp.ne.s32.totalorder %s4829_s30, %s4115_s15  ;;  %p4124_p0 = scmp.lt.s32.totalorder %s4115_s15, %s4115_s15 }
  0xc9   : > { %p4118_p11 = pnand %p4116_p10, %p4735_p7  ;;  %p4125_p2 = por %p4124_p0, %p4123_p13 }
  0xcb   : > { %p4119_p12 = pneg %p4118_p11 }
  0xcd   : > { %p4126_p4 = pnand %p4125_p2, %p4119_p12 }
  0xcf   : > { %4129 = shalt.err (!%p4126_p4)
}
  0xd0   : > { %3767 = dma.hbm_to_vmem [thread:$0]  (!%p4721_p5), %s5708_s13, 96, %s4829_s30, [#allocation25], %s5655_s12, %s5655_s12, %s5656_s8  }
  0xd1   : > { %s3220_s24 = sadd.s32 4294967294, %s4552_s28   ;;  %s53_s16 = sadd.s32 1, %s4544_s26 }
  0xd2   : > { %p54_p1 = scmp.ge.s32.totalorder %s53_s16, 2  ;;  %s56_s17 = sadd.s32 1, %s4548_s27 }
  0xd3   : > { %s63_s10 = sadd.s32 1, %s4532_s23  ;;  %p70_p3 = scmp.ne.s32.totalorder %s4532_s23, %s4528_s22 }
  0xd4   : > { %s5779_s16 = smov (%p54_p1, %s53_s16), 0  ;;  %s5781_s17 = smov (!%p54_p1, %s56_s17), %s4548_s27 }
  0xd5   : > { %5709 = sst [smem:[#allocation47_spill]] %s5779_s16  ;;  %p71_p6 = scmp.eq.s32.totalorder %s4552_s28, 0 }
  0xd6   : > { %p76_p8 = scmp.ne.s32.totalorder %s4528_s22, %s4524_s21  ;;  %p58_p9 = scmp.ge.s32.totalorder %s5781_s17, 2 }
  0xd7   : > { %p430_p10 = scmp.eq.s32.totalorder %s4708_s29, 3  ;;  %p72_p11 = por %p71_p6, %p70_p3 }
  0xd8   : > { %p5710_p12 = scmp.eq.s32.totalorder %s4708_s29, 0  ;;  %s5783_s17 = smov (%p58_p9, %s5781_s17), 0 }
  0xd9   : > { %5712 = sst [smem:[#allocation48_spill]] %s5783_s17  ;;  %p4899_p0 = por %p430_p10, %p70_p3 }
  0xda   : > { %p4893_p13 = por %p5710_p12, %p76_p8  ;;  %p436_p2 = scmp.eq.s32.totalorder %s3220_s24, 3 }
  0xdb   : > { %s5713_s20 = scalar_select %p4899_p0, 1, 0 }
  0xdc   : > { %s5711_s30 = scalar_select %p4893_p13, 1, 0 }
  0xdd   : > { %5714 = sst [smem:[#allocation49_spill]] %s5713_s20  ;;  %s60_s25 = ssub.s32 %s4548_s27, %s5783_s17 }
  0xde   : > { %p3803_p4 = scmp.lt.s32.totalorder %s4552_s28, 4  ;;  %p61_p1 = scmp.eq.s32.totalorder %s60_s25, 0 }
  0xdf   : > { %p4906_p5 = por %p436_p2, %p76_p8  ;;  %s4911_s19 = sand.u32 1, %s4532_s23  }
  0xe0   : > { %p4913_p6 = pnand %p3803_p4, %p72_p11  ;;  %s5659_s2 = sand.u32 1, %s4552_s28  }
  0xe1   : > { %s5715_s14 = scalar_select %p4906_p5, 1, 0 }
  0xe2   : > { %s5717_s15 = scalar_select %p4913_p6, 1, 0 }
  0xe3   : > { %5716 = sst [smem:[#allocation50_spill]] %s5715_s14  ;;  %s5657_s24 = sshll.u32 %s4911_s19, 4 }
  0xe4   : > { %s4918_s4 = scalar_select %p61_p1, %s4532_s23, %s63_s10  }
  0xe5   : > { %s5658_s12 = sshll.u32 %s4548_s27, 8  ;;  %s5719_s1 = sld [smem:[#allocation53_spill]] }
  0xe6   : > { %5718 = sst [smem:[#allocation51_spill]] %s4918_s4  ;;  %s630_s7 = scalar_lea.vmem [#allocation6], %s5657_s24 }
  0xe7   : > { %s637_s9 = sshll.u32 %s630_s7, 4  ;;  %s4936_s10 = scalar_lea.sflag [#allocation7], %s5659_s2  ;;  %s4932_s9 = int_to_ptr.vmem [resolvable:$true] %s637_s9 }
  0xe8   : > { %p4942_p8 = pneg %p4913_p6 }
  0xea   : > { %s5720_s13 = scalar_select %p4942_p8, 1, 0 }
  0xeb   : > { %s4928_s5 = scalar_lea.hbm %s5719_s1, %s5658_s12  ;;  %s4135_s7 = scalar_lea.hbm %s5719_s1, 512 }
  0xec   : > { %s4130_s11 = scalar_lea.hbm %s4928_s5, 256  ;;  %p4136_p11 = scmp.lt.u32.totalorder %s4928_s5, %s5719_s1 }
  0xed   : > { %p4131_p3 = scmp.ne.s32.totalorder %s4928_s5, %s4130_s11  ;;  %p4137_p12 = scmp.lt.u32.totalorder %s4135_s7, %s4130_s11 }
  0xee   : > { %p4139_p4 = scmp.lt.u32.totalorder %s4130_s11, %s4928_s5 }
  0xef   : > { %p4133_p9 = pnand %p4942_p8, %p4131_p3  ;;  %p4138_p2 = por %p4137_p12, %p4136_p11 }
  0xf1   : > { %p4134_p10 = pneg %p4133_p9  ;;  %p4140_p1 = por %p4139_p4, %p4138_p2 }
  0xf3   : > { %p4141_p5 = pnand %p4140_p1, %p4134_p10 }
  0xf5   : > { %4144 = shalt.err (!%p4141_p5)
}
  0xf6   : > { %s4145_s2 = scalar_lea.vmem %s4932_s9, 256  ;;  %s4564_s8 = smov [#allocation6]  }
  0xf7   : > { %p4146_p3 = scmp.ne.s32.totalorder %s4932_s9, %s4145_s2  ;;  %s4150_s25 = sshll.u32 %s4564_s8, 4  ;;  %s4151_s25 = int_to_ptr.vmem [resolvable:$false] %s4150_s25 }
  0xf8   : > { %s4152_s12 = scalar_lea.vmem %s4151_s25, 512  ;;  %p4153_p13 = scmp.lt.s32.totalorder %s4932_s9, %s4151_s25 }
  0xf9   : > { %p4148_p9 = pnand %p4146_p3, %p4942_p8  ;;  %p4154_p7 = scmp.lt.s32.totalorder %s4152_s12, %s4145_s2 }
  0xfb   : > { %p4149_p0 = pneg %p4148_p9  ;;  %p4155_p11 = por %p4154_p7, %p4153_p13 }
  0xfd   : > { %p4156_p12 = pnand %p4155_p11, %p4149_p0 }
  0xff   : > { %4159 = shalt.err (!%p4156_p12)
}
 0x100   : > { %s5671_s11 = smov 128   ;;  %s5672_s24 = smov 8  }
 0x101   : > { %3780 = dma.hbm_to_vmem [thread:$0]  (!%p4913_p6), %s4928_s5, 256, %s4932_s9, %s4936_s10, %s5671_s11, %s5671_s11, %s5672_s24  }
 0x102   : > { %s5721_s7 = sshll.u32 %s4548_s27, 8  ;;  %s5722_s12 = sshll.u32 %s4911_s19, 4 }
 0x103   : > { %s4974_s25 = scalar_lea.hbm %s5623_s3, %s5721_s7  ;;  %s669_s1 = scalar_lea.vmem [#allocation9], %s5722_s12 }
 0x104   : > { %s676_s17 = sshll.u32 %s669_s1, 4  ;;  %s4567_s16 = smov [#allocation14]   ;;  %s4978_s17 = int_to_ptr.vmem [resolvable:$true] %s676_s17 }
 0x105   : > { %s481_s26 = sshll.u32 %s4567_s16, 4  ;;  %s5723_s6 = sld [smem:[#allocation57_spill]]  ;;  %s482_s26 = int_to_ptr.vmem [resolvable:$true] %s481_s26 }
 0x106   : > { %p5724_p7 = scmp.ne.s32.totalorder %s5703_s0, 0 }
 0x10b   : > { %s4160_s14 = scalar_lea.hbm %s5723_s6, 1024 }
 0x10c   : > { %p4161_p5 = scmp.ne.s32.totalorder %s5723_s6, %s4160_s14  ;;  %p4167_p10 = scmp.lt.u32.totalorder %s4160_s14, %s5723_s6 }
 0x10e   : > { %p4163_p13 = pnand %p4161_p5, %p5724_p7 }
 0x110   : > { %p4164_p0 = pneg %p4163_p13 }
 0x112   : > { %p4169_p2 = pnand %p4167_p10, %p4164_p0 }
 0x114   : > { %4172 = shalt.err (!%p4169_p2)
}
 0x115   : > { %s4173_s1 = scalar_lea.vmem %s482_s26, 1024  ;;  %p4181_p9 = scmp.lt.s32.totalorder %s482_s26, %s482_s26 }
 0x116   : > { %p4174_p4 = scmp.ne.s32.totalorder %s482_s26, %s4173_s1  ;;  %p4182_p11 = scmp.lt.s32.totalorder %s4173_s1, %s4173_s1 }
 0x118   : > { %p4176_p1 = pnand %p4174_p4, %p5724_p7  ;;  %p4183_p12 = por %p4182_p11, %p4181_p9 }
 0x11a   : > { %p4177_p3 = pneg %p4176_p1 }
 0x11c   : > { %p4184_p6 = pnand %p4183_p12, %p4177_p3 }
 0x11e   : > { %4187 = shalt.err (!%p4184_p6)
}
 0x11f   : > { %p5725_p5 = scmp.ne.s32.totalorder %s5701_s18, 0  ;;  %s5726_s21 = smov 4  }
 0x120   : > { %s5727_s23 = smov 64   ;;  %s4568_s4 = smov [#allocation17]  }
 0x121   : > { %3746 = dma.hbm_to_vmem [thread:$0]  (!%p5725_p5), %s5723_s6, 1024, %s482_s26, [#allocation13], %s5727_s23, %s5727_s23, %s5726_s21  }
 0x122   : > { %s507_s8 = sshll.u32 %s4568_s4, 4  ;;  %s4569_s2 = smov [#allocation20]   ;;  %s508_s8 = int_to_ptr.vmem [resolvable:$true] %s507_s8 }
 0x123   : > { %s533_s12 = sshll.u32 %s4569_s2, 4  ;;  %s5728_s7 = sld [smem:[#allocation59_spill]]  ;;  %s534_s12 = int_to_ptr.vmem [resolvable:$true] %s533_s12 }
 0x129   : > { %s4188_s1 = scalar_lea.hbm %s5728_s7, 512 }
 0x12a   : > { %p4189_p6 = scmp.ne.s32.totalorder %s5728_s7, %s4188_s1  ;;  %p4195_p10 = scmp.lt.u32.totalorder %s4188_s1, %s5728_s7 }
 0x12c   : > { %p4191_p13 = pnand %p4189_p6, %p5724_p7 }
 0x12e   : > { %p4192_p0 = pneg %p4191_p13 }
 0x130   : > { %p4197_p2 = pnand %p4195_p10, %p4192_p0 }
 0x132   : > { %4200 = shalt.err (!%p4197_p2)
}
 0x133   : > { %s4201_s26 = scalar_lea.vmem %s508_s8, 512  ;;  %p4209_p9 = scmp.lt.s32.totalorder %s508_s8, %s508_s8 }
 0x134   : > { %p4202_p4 = scmp.ne.s32.totalorder %s508_s8, %s4201_s26  ;;  %p4210_p11 = scmp.lt.s32.totalorder %s4201_s26, %s4201_s26 }
 0x136   : > { %p4204_p1 = pnand %p4202_p4, %p5724_p7  ;;  %p4211_p12 = por %p4210_p11, %p4209_p9 }
 0x138   : > { %p4205_p3 = pneg %p4204_p1 }
 0x13a   : > { %p4212_p8 = pnand %p4211_p12, %p4205_p3 }
 0x13c   : > { %4215 = shalt.err (!%p4212_p8)
}
 0x13d   : > { %3752 = dma.hbm_to_vmem [thread:$0]  (!%p5725_p5), %s5728_s7, 512, %s508_s8, [#allocation16], %s5727_s23, %s5727_s23, %s5726_s21  }
 0x13e   : > { %s5729_s4 = sld [smem:[#allocation61_spill]] }
 0x144   : > { %s4216_s2 = scalar_lea.hbm %s5729_s4, 1024 }
 0x145   : > { %p4217_p6 = scmp.ne.s32.totalorder %s5729_s4, %s4216_s2  ;;  %p4223_p0 = scmp.lt.u32.totalorder %s4216_s2, %s5729_s4 }
 0x147   : > { %p4219_p8 = pnand %p4217_p6, %p5724_p7 }
 0x149   : > { %p4220_p13 = pneg %p4219_p8 }
 0x14b   : > { %p4225_p10 = pnand %p4223_p0, %p4220_p13 }
 0x14d   : > { %4228 = shalt.err (!%p4225_p10)
}
 0x14e   : > { %s4229_s26 = scalar_lea.vmem %s534_s12, 1024  ;;  %p4237_p3 = scmp.lt.s32.totalorder %s534_s12, %s534_s12 }
 0x14f   : > { %p4230_p2 = scmp.ne.s32.totalorder %s534_s12, %s4229_s26  ;;  %p4238_p9 = scmp.lt.s32.totalorder %s4229_s26, %s4229_s26 }
 0x151   : > { %p4232_p4 = pnand %p4230_p2, %p5724_p7  ;;  %p4239_p11 = por %p4238_p9, %p4237_p3 }
 0x153   : > { %p4233_p1 = pneg %p4232_p4 }
 0x155   : > { %p4240_p12 = pnand %p4239_p11, %p4233_p1 }
 0x157   : > { %4243 = shalt.err (!%p4240_p12)
}
 0x158   : > { %3758 = dma.hbm_to_vmem [thread:$0]  (!%p5725_p5), %s5729_s4, 1024, %s534_s12, [#allocation19], %s5727_s23, %s5727_s23, %s5726_s21  }
 0x159   : > { %s4570_s11 = smov [#allocation23]   ;;  %s4571_s14 = smov [#allocation26]  }
 0x15a   : > { %s559_s24 = sshll.u32 %s4570_s11, 4  ;;  %s586_s2 = sshll.u32 %s4571_s14, 4  ;;  %s560_s24 = int_to_ptr.vmem [resolvable:$true] %s559_s24  ;;  %s587_s2 = int_to_ptr.vmem [resolvable:$true] %s586_s2 }
 0x15b   : > { %s5730_s1 = sld [smem:[#allocation63_spill]] }
 0x161   : > { %s4244_s16 = scalar_lea.hbm %s5730_s1, 96 }
 0x162   : > { %p4245_p6 = scmp.ne.s32.totalorder %s5730_s1, %s4244_s16  ;;  %p4251_p0 = scmp.lt.u32.totalorder %s4244_s16, %s5730_s1 }
 0x164   : > { %p4247_p8 = pnand %p4245_p6, %p5724_p7 }
 0x166   : > { %p4248_p13 = pneg %p4247_p8 }
 0x168   : > { %p4253_p10 = pnand %p4251_p0, %p4248_p13 }
 0x16a   : > { %4256 = shalt.err (!%p4253_p10)
}
 0x16b   : > { %s4257_s21 = scalar_lea.vmem %s560_s24, 96  ;;  %p4265_p3 = scmp.lt.s32.totalorder %s560_s24, %s560_s24 }
 0x16c   : > { %p4258_p2 = scmp.ne.s32.totalorder %s560_s24, %s4257_s21  ;;  %p4266_p9 = scmp.lt.s32.totalorder %s4257_s21, %s4257_s21 }
 0x16e   : > { %p4260_p4 = pnand %p4258_p2, %p5724_p7  ;;  %p4267_p11 = por %p4266_p9, %p4265_p3 }
 0x170   : > { %p4261_p1 = pneg %p4260_p4 }
 0x172   : > { %p4268_p12 = pnand %p4267_p11, %p4261_p1 }
 0x174   : > { %4271 = shalt.err (!%p4268_p12)
}
 0x175   : > { %s5731_s6 = smov 1   ;;  %s5732_s23 = smov 16  }
 0x176   : > { %3764 = dma.hbm_to_vmem [thread:$0]  (!%p5725_p5), %s5730_s1, 96, %s560_s24, [#allocation22], %s5732_s23, %s5732_s23, %s5731_s6  }
 0x177   : > { %s5733_s14 = sld [smem:[#allocation65_spill]] }
 0x17d   : > { %s4272_s5 = scalar_lea.hbm %s5733_s14, 16 }
 0x17e   : > { %p4273_p6 = scmp.ne.s32.totalorder %s5733_s14, %s4272_s5  ;;  %p4279_p0 = scmp.lt.u32.totalorder %s4272_s5, %s5733_s14 }
 0x180   : > { %p4275_p8 = pnand %p4273_p6, %p5724_p7 }
 0x182   : > { %p4276_p13 = pneg %p4275_p8 }
 0x184   : > { %p4281_p10 = pnand %p4279_p0, %p4276_p13 }
 0x186   : > { %4284 = shalt.err (!%p4281_p10)
}
 0x187   : > { %s4285_s21 = scalar_lea.vmem %s587_s2, 16  ;;  %s4292_s24 = scalar_lea.vmem %s587_s2, 32 }
 0x188   : > { %p4286_p2 = scmp.ne.s32.totalorder %s587_s2, %s4285_s21  ;;  %p4293_p3 = scmp.lt.s32.totalorder %s587_s2, %s587_s2 }
 0x189   : > { %p4294_p9 = scmp.lt.s32.totalorder %s4292_s24, %s4285_s21 }
 0x18a   : > { %p4288_p4 = pnand %p4286_p2, %p5724_p7 }
 0x18b   : > { %p4295_p11 = por %p4294_p9, %p4293_p3 }
 0x18c   : > { %p4289_p1 = pneg %p4288_p4 }
 0x18e   : > { %p4296_p12 = pnand %p4295_p11, %p4289_p1 }
 0x190   : > { %4299 = shalt.err (!%p4296_p12)
}
 0x191   : > { %3770 = dma.hbm_to_vmem [thread:$0]  (!%p5725_p5), %s5733_s14, 16, %s587_s2, [#allocation25]  }
 0x192   : > { %s4572_s12 = smov [#allocation27]   ;;  %s3235_s20 = sshll.u32 %s4911_s19, 3 }
 0x193   : > { %s597_s7 = sshll.u32 %s4572_s12, 4  ;;  %s5734_s9 = sld [smem:[#allocation66_spill]]  ;;  %s598_s7 = int_to_ptr.vmem [resolvable:$true] %s597_s7 }
 0x199   : > { %s4300_s16 = scalar_lea.hbm %s5734_s9, 16 }
 0x19a   : > { %p4301_p6 = scmp.ne.s32.totalorder %s5734_s9, %s4300_s16  ;;  %p4307_p0 = scmp.lt.u32.totalorder %s4300_s16, %s5734_s9 }
 0x19c   : > { %p4303_p8 = pnand %p4301_p6, %p5724_p7 }
 0x19e   : > { %p4304_p13 = pneg %p4303_p8 }
 0x1a0   : > { %p4309_p10 = pnand %p4307_p0, %p4304_p13 }
 0x1a2   : > { %4312 = shalt.err (!%p4309_p10)
}
 0x1a3   : > { %s4313_s2 = scalar_lea.vmem %s598_s7, 16  ;;  %s4320_s6 = scalar_lea.vmem %s598_s7, 32 }
 0x1a4   : > { %p4314_p2 = scmp.ne.s32.totalorder %s598_s7, %s4313_s2  ;;  %p4321_p3 = scmp.lt.s32.totalorder %s598_s7, %s598_s7 }
 0x1a5   : > { %p4322_p9 = scmp.lt.s32.totalorder %s4320_s6, %s4313_s2 }
 0x1a6   : > { %p4316_p4 = pnand %p4314_p2, %p5724_p7 }
 0x1a7   : > { %p4323_p11 = por %p4322_p9, %p4321_p3 }
 0x1a8   : > { %p4317_p1 = pneg %p4316_p4 }
 0x1aa   : > { %p4324_p12 = pnand %p4323_p11, %p4317_p1 }
 0x1ac   : > { %4327 = shalt.err (!%p4324_p12)
}
 0x1ad   : > { %3773 = dma.hbm_to_vmem [thread:$0]  (!%p5725_p5), %s5734_s9, 16, %s598_s7, [#allocation28]  }
 0x1ae   : > { %s3236_s0 = sshll.u32 %s4548_s27, 7  ;;  %s5735_s16 = sld [smem:[#allocation52_spill]] }
 0x1af   : > { %s612_s18 = scalar_lea.vmem [#allocation3], %s3235_s20  ;;  %s609_s21 = scalar_lea.sflag [#allocation4], %s4911_s19 }
 0x1b0   : > { %s619_s8 = sshll.u32 %s612_s18, 4  ;;  %p5736_p6 = scmp.ne.s32.totalorder %s5720_s13, 0  ;;  %s620_s8 = int_to_ptr.vmem [resolvable:$true] %s619_s8 }
 0x1b4   : > { %s5107_s26 = scalar_lea.hbm %s5735_s16, %s3236_s0  ;;  %s4333_s6 = scalar_lea.hbm %s5735_s16, 256 }
 0x1b5   : > { %s4328_s24 = scalar_lea.hbm %s5107_s26, 128  ;;  %p4334_p13 = scmp.lt.u32.totalorder %s5107_s26, %s5735_s16 }
 0x1b6   : > { %p4329_p7 = scmp.ne.s32.totalorder %s5107_s26, %s4328_s24  ;;  %p4335_p0 = scmp.lt.u32.totalorder %s4333_s6, %s4328_s24 }
 0x1b7   : > { %p4337_p2 = scmp.lt.u32.totalorder %s4328_s24, %s5107_s26 }
 0x1b8   : > { %p4331_p5 = pnand %p4329_p7, %p5736_p6  ;;  %p4336_p10 = por %p4335_p0, %p4334_p13 }
 0x1ba   : > { %p4332_p8 = pneg %p4331_p5  ;;  %p4338_p4 = por %p4337_p2, %p4336_p10 }
 0x1bc   : > { %p4339_p1 = pnand %p4338_p4, %p4332_p8 }
 0x1be   : > { %4342 = shalt.err (!%p4339_p1)
}
 0x1bf   : > { %s4343_s11 = scalar_lea.vmem %s620_s8, 128  ;;  %s4573_s5 = smov [#allocation3]  }
 0x1c0   : > { %p4344_p3 = scmp.ne.s32.totalorder %s620_s8, %s4343_s11  ;;  %s4348_s18 = sshll.u32 %s4573_s5, 4  ;;  %s4349_s18 = int_to_ptr.vmem [resolvable:$false] %s4348_s18 }
 0x1c1   : > { %s4350_s7 = scalar_lea.vmem %s4349_s18, 256  ;;  %p4351_p12 = scmp.lt.s32.totalorder %s620_s8, %s4349_s18 }
 0x1c2   : > { %p4346_p9 = pnand %p4344_p3, %p5736_p6  ;;  %p4352_p7 = scmp.lt.s32.totalorder %s4350_s7, %s4343_s11 }
 0x1c4   : > { %p4347_p11 = pneg %p4346_p9  ;;  %p4353_p5 = por %p4352_p7, %p4351_p12 }
 0x1c6   : > { %p4354_p0 = pnand %p4353_p5, %p4347_p11 }
 0x1c8   : > { %4357 = shalt.err (!%p4354_p0)
}
 0x1c9   : > { %p5737_p13 = scmp.ne.s32.totalorder %s5717_s15, 0  ;;  %s5738_s6 = sld [smem:[#allocation54_spill]] }
 0x1ca   : > { %s651_s12 = scalar_lea.vmem [#allocation8], %s3235_s20 }
 0x1cb   : > { %3777 = dma.hbm_to_vmem [thread:$0]  (!%p5737_p13), %s5107_s26, 128, %s620_s8, %s609_s21  }
 0x1cc   : > { %s658_s11 = sshll.u32 %s651_s12, 4  ;;  %s659_s11 = int_to_ptr.vmem [resolvable:$true] %s658_s11 }
 0x1cf   : > { %s5134_s23 = scalar_lea.hbm %s5738_s6, %s3236_s0  ;;  %s4363_s21 = scalar_lea.hbm %s5738_s6, 256 }
 0x1d0   : > { %s4358_s5 = scalar_lea.hbm %s5134_s23, 128  ;;  %p4364_p4 = scmp.lt.u32.totalorder %s5134_s23, %s5738_s6 }
 0x1d1   : > { %p4359_p8 = scmp.ne.s32.totalorder %s5134_s23, %s4358_s5  ;;  %p4365_p1 = scmp.lt.u32.totalorder %s4363_s21, %s4358_s5 }
 0x1d2   : > { %p4367_p9 = scmp.lt.u32.totalorder %s4358_s5, %s5134_s23 }
 0x1d3   : > { %p4361_p10 = pnand %p4359_p8, %p5736_p6  ;;  %p4366_p3 = por %p4365_p1, %p4364_p4 }
 0x1d5   : > { %p4362_p2 = pneg %p4361_p10  ;;  %p4368_p11 = por %p4367_p9, %p4366_p3 }
 0x1d7   : > { %p4369_p12 = pnand %p4368_p11, %p4362_p2 }
 0x1d9   : > { %4372 = shalt.err (!%p4369_p12)
}
 0x1da   : > { %s4373_s19 = scalar_lea.vmem %s659_s11, 128  ;;  %s4574_s20 = smov [#allocation8]  }
 0x1db   : > { %p4374_p7 = scmp.ne.s32.totalorder %s659_s11, %s4373_s19  ;;  %s4378_s7 = sshll.u32 %s4574_s20, 4  ;;  %s4379_s7 = int_to_ptr.vmem [resolvable:$false] %s4378_s7 }
 0x1dc   : > { %s4380_s24 = scalar_lea.vmem %s4379_s7, 256  ;;  %p4381_p8 = scmp.lt.s32.totalorder %s659_s11, %s4379_s7 }
 0x1dd   : > { %p4376_p5 = pnand %p4374_p7, %p5736_p6  ;;  %p4382_p10 = scmp.lt.s32.totalorder %s4380_s24, %s4373_s19 }
 0x1df   : > { %p4377_p0 = pneg %p4376_p5  ;;  %p4383_p13 = por %p4382_p10, %p4381_p8 }
 0x1e1   : > { %p4384_p1 = pnand %p4383_p13, %p4377_p0 }
 0x1e3   : > { %4387 = shalt.err (!%p4384_p1)
}
 0x1e4   : > { %p5739_p4 = scmp.ne.s32.totalorder %s5717_s15, 0  ;;  %s5740_s2 = sand.u32 1, %s4552_s28  }
 0x1e5   : > { %s5158_s12 = scalar_lea.sflag [#allocation10], %s5740_s2  ;;  %s4388_s5 = scalar_lea.hbm %s4974_s25, 256 }
 0x1e6   : > { %3783 = dma.hbm_to_vmem [thread:$0]  (!%p5739_p4), %s5134_s23, 128, %s659_s11, %s4936_s10  }
 0x1e7   : > { %p4389_p2 = scmp.ne.s32.totalorder %s4974_s25, %s4388_s5  ;;  %s4393_s21 = scalar_lea.hbm %s5623_s3, 512 }
 0x1e8   : > { %p4394_p9 = scmp.lt.u32.totalorder %s4974_s25, %s5623_s3  ;;  %p4395_p11 = scmp.lt.u32.totalorder %s4393_s21, %s4388_s5 }
 0x1e9   : > { %p4391_p3 = pnand %p4389_p2, %p5736_p6  ;;  %p4397_p7 = scmp.lt.u32.totalorder %s4388_s5, %s4974_s25 }
 0x1ea   : > { %p4396_p12 = por %p4395_p11, %p4394_p9 }
 0x1eb   : > { %p4392_p13 = pneg %p4391_p3 }
 0x1ec   : > { %p4398_p5 = por %p4397_p7, %p4396_p12 }
 0x1ee   : > { %p4399_p0 = pnand %p4398_p5, %p4392_p13 }
 0x1f0   : > { %4402 = shalt.err (!%p4399_p0)
}
 0x1f1   : > { %s4403_s10 = scalar_lea.vmem %s4978_s17, 256  ;;  %s4575_s23 = smov [#allocation9]  }
 0x1f2   : > { %p4404_p8 = scmp.ne.s32.totalorder %s4978_s17, %s4403_s10  ;;  %s4408_s11 = sshll.u32 %s4575_s23, 4  ;;  %s4409_s11 = int_to_ptr.vmem [resolvable:$false] %s4408_s11 }
 0x1f3   : > { %s4410_s19 = scalar_lea.vmem %s4409_s11, 512  ;;  %p4411_p2 = scmp.lt.s32.totalorder %s4978_s17, %s4409_s11 }
 0x1f4   : > { %p4406_p10 = pnand %p4404_p8, %p5736_p6  ;;  %p4412_p3 = scmp.lt.s32.totalorder %s4410_s19, %s4403_s10 }
 0x1f6   : > { %p4407_p1 = pneg %p4406_p10  ;;  %p4413_p9 = por %p4412_p3, %p4411_p2 }
 0x1f8   : > { %p4414_p11 = pnand %p4413_p9, %p4407_p1 }
 0x1fa   : > { %4417 = shalt.err (!%p4414_p11)
}
 0x1fb   : > { %s5741_s20 = smov 8   ;;  %s5742_s7 = smov 128  }
 0x1fc   : > { %3786 = dma.hbm_to_vmem [thread:$0]  (!%p5739_p4), %s4974_s25, 256, %s4978_s17, %s5158_s12, %s5742_s7, %s5742_s7, %s5741_s20  }
 0x1fd   : > { %s5743_s13 = sld [smem:[#allocation46_spill]] }
 0x203   : > { %p5744_p6 = scmp.ne.s32.totalorder %s5743_s13, 0 }
 0x204   : > { %s5188_s24 = sand.u32 (!%p5744_p6), 1, %s4528_s22   ;;  %p5745_p13 = scmp.ne.s32.totalorder (!%p5744_p6), %s5711_s30, 0 }
 0x205   : > { %688 = sbr.rel (%p5744_p6) target bundleno = 6550 (0x1996), region = 84  ;;  %s5191_s2 = sshll.u32 (!%p5744_p6), %s5188_s24, 3 }
 0x206   : > { %s691_s15 = scalar_lea.sflag (!%p5744_p6), [#allocation4], %s5188_s24  ;;  %s694_s5 = scalar_lea.vmem (!%p5744_p6), [#allocation3], %s5191_s2 }
 0x20c   : > { %4479 = dma.done.wait (%p5745_p13), %s691_s15, 128  }
 0x20d   : > { %4481 = vsyncadd (%p5745_p13), %s691_s15, 4294967168  ;;  %s699_s17 = sand.u32 1, %s4708_s29   ;;  %s3247_s25 = sshll.u32 %s5188_s24, 4 }
 0x20e   : > { %s700_s12 = scalar_lea.sflag [#allocation7], %s699_s17  ;;  %s5201_s26 = scalar_lea.vmem [#allocation6], %s3247_s25 }
 0x20f   : > { %4483 = dma.done.wait (%p5745_p13), %s700_s12, 384  }
 0x210   : > { %4485 = vsyncadd (%p5745_p13), %s700_s12, 4294966912  ;;  %s712_s8 = scalar_lea.vmem [#allocation8], %s5191_s2  ;;  %s718_s21 = scalar_lea.sflag [#allocation10], %s699_s17 }
 0x211   : > { %s5208_s18 = scalar_lea.vmem [#allocation9], %s3247_s25 }
 0x212   : > { %4487 = dma.done.wait (%p5745_p13), %s718_s21, 256  }
 0x213   : > { %4489 = vsyncadd (%p5745_p13), %s718_s21, 4294967040  ;;  %p5746_p4 = scmp.eq.s32.totalorder %s4708_s29, 0 }
 0x215   : > { %4491 = dma.done.wait (%p5746_p4), [#allocation10], 3072   ;;  %p5747_p12 = pmov %p5746_p4 }
 0x216   : > { %p5748_p7 = pmov %p5746_p4 }
 0x217   : > { %4493 = vsyncadd (%p5747_p12), [#allocation10], 4294964224 }
 0x218   : > { %4495 = dma.done.wait (%p5748_p7), [#allocation13], 1216   ;;  %p5749_p5 = pmov %p5746_p4 }
 0x219   : > { %p5750_p0 = pmov %p5746_p4 }
 0x21a   : > { %4497 = vsyncadd (%p5749_p5), [#allocation13], 4294966080 }
 0x21b   : > { %4499 = dma.done.wait (%p5750_p0), [#allocation16], 576   ;;  %p5751_p8 = pmov %p5750_p0 }
 0x21c   : > { %p5752_p10 = pmov %p5750_p0 }
 0x21d   : > { %4501 = vsyncadd (%p5751_p8), [#allocation16], 4294966720 }
 0x21e   : > { %4503 = dma.done.wait (%p5752_p10), [#allocation19], 1056   ;;  %p5753_p1 = pmov %p5750_p0 }
 0x21f   : > { %p5754_p2 = pmov %p5750_p0 }
 0x220   : > { %4505 = vsyncadd (%p5753_p1), [#allocation19], 4294966240 }
 0x221   : > { %4507 = dma.done.wait (%p5754_p2), [#allocation22], 128   ;;  %p5755_p3 = pmov %p5750_p0 }
 0x222   : > { %p5756_p9 = pmov %p5750_p0 }
 0x223   : > { %4509 = vsyncadd (%p5755_p3), [#allocation22], 4294967168 }
 0x224   : > { %4511 = dma.done.wait (%p5756_p9), [#allocation25], 112   ;;  %p5757_p11 = pmov %p5750_p0 }
 0x225   : > { %p5758_p6 = pmov %p5750_p0 }
 0x226   : > { %4513 = vsyncadd (%p5757_p11), [#allocation25], 4294967184 }
 0x227   : > { %4515 = dma.done.wait (%p5758_p6), [#allocation28], 16   ;;  %p5759_p13 = pmov %p5750_p0 }
 0x228   : > { %s832_s30 = scalar_lea.vmem [#allocation29], %s5191_s2  ;;  %s5760_s0 = sld [smem:[#allocation43_spill]] }
 0x229   : > { %4517 = vsyncadd (%p5759_p13), [#allocation28], 4294967280 }
 0x22e   : > { %p3263_p4 = scmp.ne.s32.totalorder %s5760_s0, 0 }
 0x22f   : > { %v838_v0 = vld [vmem:[%s694_s5] sm:$0xff] (!%p3263_p4)  ;;  %vm839_vm0 = vcmask (!%p3263_p4), 261120  }
 0x230   : > { %837 = sbr.rel (%p3263_p4) target bundleno = 567 (0x237), region = 152  ;;  %840 = vst.msk [vmem:[#allocation2] sm:$0xff] (!%p3263_p4), %vm839_vm0, %v838_v0 }
 0x237 PF: > { %s5761_s10 = sld [smem:[#allocation43_spill]]  ;;  %v4576_v1 = vmov 0.0   ;;  %v5249_v2 = vld [vmem:[#allocation2] sm:$0xff]  ;;  %vm4577_vm1 = vmmov 0   ;;  %vm917_vm2 = vcmask 261120   ;;  %vm1084_vm3 = vcmask 64512  }
 0x238   : > { %3467 = vmatprep.subr.bf16.mxu0 %v4576_v1  ;;  %3475 = vmatprep.subr.bf16.mxu1 %v4576_v1  ;;  %v5253_v3 = vld [vmem:[%s712_s8] sm:$0xff]  ;;  %v1019_v12 = vpack.c.bf16 %v5249_v2, %v5249_v2  ;;  %s4578_s20 = smov 120   ;;  %s4579_s7 = smov 112   ;;  %vm1146_vm4 = vcmask 1043456   ;;  %vm2029_vm5 = vcmask 130048   ;;  %vm2760_vm6 = vcmask 523264  }
 0x239   : > { %3471 = vmatprep.mubr.msk.bf16.mxu0 %vm4577_vm1, %v4576_v1  ;;  %3479 = vmatprep.mubr.msk.bf16.mxu1 %vm4577_vm1, %v4576_v1  ;;  %v867_v6 = vadd.f32 %v5253_v3, %v5249_v2  ;;  %s4580_s13 = smov 104  }
 0x23b   : > { %v898_v9 = vpack.c.bf16 %v867_v6, %v867_v6 }
 0x23d   : > { %s3390_s23 = smul.u32 96, %s5761_s10  ;;  %s3388_s15 = sshll.u32 %s5761_s10, 5 }
 0x23e   : > { %s889_s11 = smul.u32 6, %s5761_s10  ;;  %s5334_s5 = scalar_lea.vmem [#allocation20], %s3388_s15 }
 0x23f   : > { %s5259_s29 = scalar_lea.vmem [#allocation11], %s3390_s23  ;;  %s5336_s17 = scalar_lea.vmem [#allocation14], %s3388_s15 }
 0x240   : > { %v3904_v4 = vld [vmem:[%s5259_s29] sm:$0xff]   ;;  %v3905_v5 = vld [vmem:[%s5259_s29 + $0x10] sm:$0xff]   ;;  %v3906_v7 = vld [vmem:[%s5259_s29 + $0x8] sm:$0xff]   ;;  %s5287_s19 = scalar_lea.vmem [#allocation12], %s889_s11  ;;  %s3266_s25 = sshll.u32 %s5761_s10, 1 }
 0x241   : > { %3468 = vmatpush3.bf16.msra.mxu0 %v3904_v4  ;;  %3476 = vmatpush3.bf16.msra.mxu1 %v3905_v5  ;;  %v3907_v8 = vld [vmem:[%s5259_s29 + $0x18] sm:$0xff]   ;;  %v3908_v10 = vld [vmem:[%s5259_s29 + $0x20] sm:$0xff]   ;;  %v3909_v11 = vld [vmem:[%s5259_s29 + $0x28] sm:$0xff]   ;;  %s5400_s12 = scalar_lea.vmem [#allocation15], %s3266_s25  ;;  %s2653_s23 = scalar_lea.vmem [#allocation18], %s5761_s10 }
 0x242   : > { %3469 = vmatprep.subr.bf16.mxu0 %v4576_v1  ;;  %3477 = vmatprep.subr.bf16.mxu1 %v4576_v1  ;;  %v3292_v13 = vld [vmem:[%s5287_s19 + $0x1] ss:$0 sm:$0xff]  ;;  %v3288_v14 = vld [vmem:[%s5287_s19] ss:$0 sm:$0xff]  ;;  %v3296_v28 = vld [vmem:[%s5287_s19 + $0x2] ss:$0 sm:$0xff] }
 0x243   : > { %v850_v62 = vld [vmem:[%s5336_s17] sm:$0xf]  ;;  %v851_v6 = vld [vmem:[%s5336_s17 + $0x4] sm:$0xf]  ;;  %p3379_p12 = scmp.ne.s32.totalorder %s5761_s10, 1 }
 0x244   : > { %v1357_v5 = vsel %vm1146_vm4, %v850_v62, 0 }
 0x245   : > { %3470 = vmatpush3.bf16.msra.mxu0 %v3906_v7  ;;  %3478 = vmatpush3.bf16.msra.mxu1 %v3907_v8  ;;  %v1311_v7 = vsel %vm1146_vm4, %v851_v6, 0 }
 0x246   : > { %3483 = vmatprep.subr.bf16.mxu0 %v4576_v1  ;;  %3491 = vmatprep.subr.bf16.mxu1 %v4576_v1 }
 0x248   : > { %3472 = vmatmul.mubr.msk.bf16.vlgmr.msra.gmra.mrb[0].mxu0 %vm917_vm2, %v898_v9  ;;  %3480 = vmatmul.mubr.msk.bf16.vlgmr.msra.gmra.mrb[0].mxu1 %vm917_vm2, %v898_v9 }
 0x249   : > { %3484 = vmatpush3.bf16.msra.mxu0 %v3908_v10  ;;  %3487 = vmatprep.mubr.msk.bf16.mxu0 %vm4577_vm1, %v4576_v1 }
 0x24a   : > { %3485 = vmatprep.subr.bf16.mxu0 %v4576_v1  ;;  %3493 = vmatprep.mubr.msk.bf16.mxu1 %vm4577_vm1, %v4576_v1 }
 0x24d   : > { %3486 = vmatpush3.bf16.msra.mxu0 %v3909_v11 }
 0x24e   : > { %3497 = vmatprep.subr.bf16.mxu0 %v4576_v1 }
 0x250   : > { %3488 = vmatmul.mubr.msk.bf16.vlgmr.msra.gmra.mrb[4].mxu0 %vm917_vm2, %v1019_v12 }
 0x251   : > { %3499 = vmatprep.mubr.msk.bf16.mxu0 %vm4577_vm1, %v4576_v1 }
 0x31b   : > { %v955_v15 = vpop.f32.mrb[0].mxu0  ;;  %v1013_v16 = vpop.f32.mrb[0].mxu1 }
 0x31c   : > { %v3473_v17 = vpop.f32.mrb[1].mxu0  ;;  %v1014_v18 = vadd.f32 %v3292_v13, %v1013_v16  ;;  %v3481_v19 = vpop.f32.mrb[1].mxu1  ;;  %v956_v20 = vadd.f32 %v3288_v14, %v955_v15 }
 0x31d   : > { %v958_v21 = vpop.f32.mrb[2].mxu0  ;;  %v1016_v22 = vpop.f32.mrb[2].mxu1 }
 0x31e   : > { %v3474_v23 = vpop.f32.mrb[3].mxu0  ;;  %v5291_v24 = vpack.c.bf16 %v1014_v18, %v1014_v18  ;;  %v3482_v25 = vpop.f32.mrb[3].mxu1  ;;  %v5293_v26 = vpack.c.bf16 %v956_v20, %v956_v20 }
 0x320   : > { %1196 = vrot.lane.b32.xlu0 %v5291_v24, %s4578_s20  ;;  %v1089_v27 = vsel %vm1084_vm3, %v5291_v24, 0 }
 0x321   : > { %3492 = vmatpush3.bf16.xpose.msra.mxu1 %v1089_v27 }
 0x322   : > { %3503 = vmatprep.subr.bf16.mxu1 %v4576_v1 }
 0x323   : > { %v1075_v29 = vpop.f32.mrb[4].mxu0 }
 0x324   : > { %v1076_v30 = vadd.f32 %v3296_v28, %v1075_v29  ;;  %v3489_v31 = vpop.f32.mrb[5].mxu0  ;;  %1193 = vrot.lane.b32.xlu0 %v5293_v26, %s4578_s20 }
 0x325   : > { %v1078_v32 = vpop.f32.mrb[6].mxu0 }
 0x326   : > { %v5303_v33 = vpack.c.bf16 %v1076_v30, %v1076_v30  ;;  %v3490_v34 = vpop.f32.mrb[7].mxu0 }
 0x328   : > { %3494 = vmatmul.mubr.msk.bf16.vlgmr.msra.gmra.mrb[4].mxu1 %vm1084_vm3, %v5293_v26  ;;  %1257 = vrot.lane.b32.xlu0 %v5303_v33, %s4578_s20  ;;  %v1148_v44 = vsel %vm1146_vm4, %v5303_v33, 0 }
 0x329   : > { %3505 = vmatprep.mubr.msk.bf16.mxu1 %vm4577_vm1, %v4576_v1  ;;  %3498 = vmatpush3.bf16.msra.mxu0 %v1148_v44 }
 0x32a   : > { %3509 = vmatprep.subr.bf16.mxu0 %v4576_v1 }
 0x32c   : > { %1401 = vrot.lane.b32.xlu0 %v5291_v24, %s4579_s7 }
 0x392   : > { %v1197_v35 = vpop.permute.xlu0 %1196 }
 0x393   : > { %v1202_v36 = vsel %vm1084_vm3, %v1197_v35, 0 }
 0x394   : > { %3504 = vmatpush3.bf16.xpose.msra.mxu1 %v1202_v36 }
 0x395   : > { %3515 = vmatprep.subr.bf16.mxu1 %v4576_v1 }
 0x396   : > { %v1194_v37 = vpop.permute.xlu0 %1193 }
 0x39a   : > { %v1258_v55 = vpop.permute.xlu0 %1257 }
 0x39b   : > { %3506 = vmatmul.mubr.msk.bf16.vlgmr.msra.gmra.mrb[8].mxu1 %vm1084_vm3, %v1194_v37  ;;  %v1263_v56 = vsel %vm1146_vm4, %v1258_v55, 0 }
 0x39c   : > { %3517 = vmatprep.mubr.msk.bf16.mxu1 %vm4577_vm1, %v4576_v1  ;;  %3516 = vmatpush3.bf16.msra.mxu1 %v1311_v7 }
 0x39d   : > { %3527 = vmatprep.subr.bf16.mxu1 %v4576_v1 }
 0x39e   : > { %v1402_v8 = vpop.permute.xlu0 %1401 }
 0x39f   : > { %v1407_v28 = vsel %vm1084_vm3, %v1402_v8, 0 }
 0x3fb   : > { %v1125_v38 = vpop.f32.mrb[4].mxu1 }
 0x3fc   : > { %v1131_v39 = vmul.f32 0.35355338, %v1125_v38  ;;  %v3495_v40 = vpop.f32.mrb[5].mxu1 }
 0x3fd   : > { %v1128_v41 = vpop.f32.mrb[6].mxu1 }
 0x3fe   : > { %v3496_v42 = vpop.f32.mrb[7].mxu1  ;;  %v1132_v43 = vsel %vm1084_vm3, %v1131_v39, -inf }
 0x3ff   : > { %1133 = vmax.xlane.f32.xlu1 %v1132_v43 }
 0x46e   : > { %v1238_v45 = vpop.f32.mrb[8].mxu1 }
 0x46f   : > { %v1244_v46 = vmul.f32 0.35355338, %v1238_v45  ;;  %v3507_v47 = vpop.f32.mrb[9].mxu1 }
 0x470   : > { %v1241_v48 = vpop.f32.mrb[10].mxu1 }
 0x471   : > { %v3508_v49 = vpop.f32.mrb[11].mxu1  ;;  %v1245_v50 = vsel %vm1084_vm3, %v1244_v46, -inf }
 0x472   : > { %1246 = vmax.xlane.f32.xlu1 %v1245_v50 }
 0x48c   : > { %v1134_v51 = vpop.xlane.xlu1 %1133 }
 0x48d   : > { %v1135_v52 = vsub.f32 %v1131_v39, %v1134_v51 }
 0x48f   : > { %v1136_v53 = vmul.f32 1.442695, %v1135_v52 }
 0x491   : > { %3922 = vpow2.f32 %v1136_v53 }
 0x49b   : > { %v3923_v54 = vpop.eup %3922 }
 0x49c   : > { %v1138_v57 = vsel %vm1084_vm3, %v3923_v54, 0.0  ;;  %v1142_v58 = vpack.c.bf16 %v3923_v54, %v3923_v54  ;;  %v852_v54 = vld [vmem:[%s5336_s17 + $0x8] sm:$0xf] }
 0x49d   : > { %1139 = vadd.xlane.f32.xlu0 %v1138_v57  ;;  %v1515_v55 = vsel %vm1146_vm4, %v852_v54, 0  ;;  %v3912_v54 = vld [vmem:[%s5259_s29 + $0x30] sm:$0xff]  }
 0x49e   : > { %3500 = vmatmul.mubr.msk.bf16.vlgmr.msra.gmra.mrb[8].mxu0 %vm1084_vm3, %v1142_v58 }
 0x49f   : > { %3510 = vmatpush3.bf16.msra.mxu0 %v1263_v56  ;;  %3511 = vmatprep.mubr.msk.bf16.mxu0 %vm4577_vm1, %v4576_v1 }
 0x4a0   : > { %3521 = vmatprep.subr.bf16.mxu0 %v4576_v1 }
 0x4b3   : > { %1461 = vrot.lane.b32.xlu0 %v5303_v33, %s4579_s7 }
 0x4b7   : > { %1558 = vrot.lane.b32.xlu0 %v5293_v26, %s4580_s13 }
 0x4ff   : > { %v1247_v59 = vpop.xlane.xlu1 %1246 }
 0x500   : > { %v1248_v60 = vsub.f32 %v1244_v46, %v1247_v59 }
 0x502   : > { %v1249_v61 = vmul.f32 1.442695, %v1248_v60 }
 0x504   : > { %3924 = vpow2.f32 %v1249_v61 }
 0x50e   : > { %v3925_v63 = vpop.eup %3924 }
 0x50f   : > { %v1251_v0 = vsel %vm1084_vm3, %v3925_v63, 0.0  ;;  %v1255_v4 = vpack.c.bf16 %v3925_v63, %v3925_v63 }
 0x510   : > { %1252 = vadd.xlane.f32.xlu1 %v1251_v0 }
 0x511   : > { %3512 = vmatmul.mubr.msk.bf16.vlgmr.msra.gmra.mrb[12].mxu0 %vm1084_vm3, %v1255_v4 }
 0x512   : > { %3522 = vmatpush3.bf16.msra.mxu0 %v1357_v5  ;;  %3523 = vmatprep.mubr.msk.bf16.mxu0 %vm4577_vm1, %v4576_v1 }
 0x513   : > { %3533 = vmatprep.subr.bf16.mxu0 %v4576_v1 }
 0x521   : > { %1399 = vrot.lane.b32.xlu1 %v5293_v26, %s4579_s7 }
 0x52a   : > { %v1140_v9 = vpop.xlane.xlu0 %1139 }
 0x52b   : > { %3926 = vrcp.f32 %v1140_v9 }
 0x52e   : > { %v1462_v14 = vpop.permute.xlu0 %1461 }
 0x52f   : > { %v1467_v18 = vsel %vm1146_vm4, %v1462_v14, 0 }
 0x535   : > { %v3927_v10 = vpop.eup %3926 }
 0x571   : > { %v1184_v11 = vpop.f32.mrb[8].mxu0 }
 0x572   : > { %v1190_v12 = vmul.f32 %v3927_v10, %v1184_v11  ;;  %v3501_v13 = vpop.f32.mrb[9].mxu0 }
 0x573   : > { %v1187_v15 = vpop.f32.mrb[10].mxu0 }
 0x574   : > { %v1191_v16 = vpack.c.bf16 %v1190_v12, %v1190_v12  ;;  %v3502_v17 = vpop.f32.mrb[11].mxu0 }
 0x576   : > { %3524 = vmatmul.mubr.msk.bf16.vlgmr.msra.gmra.mrb[16].mxu0 %vm1084_vm3, %v1191_v16  ;;  %v853_v16 = vld [vmem:[%s5336_s17 + $0xc] sm:$0xf] }
 0x577   : > { %3534 = vmatpush3.bf16.msra.mxu0 %v1467_v18  ;;  %3535 = vmatprep.mubr.msk.bf16.mxu0 %vm4577_vm1, %v4576_v1  ;;  %v1674_v17 = vsel %vm1146_vm4, %v853_v16, 0  ;;  %v3333_v16 = vld [vmem:[%s5287_s19 + $0x3] ss:$0 sm:$0xff] }
 0x578   : > { %3545 = vmatprep.subr.bf16.mxu0 %v4576_v1 }
 0x59d   : > { %v1253_v19 = vpop.xlane.xlu1 %1252 }
 0x59e   : > { %3928 = vrcp.f32 %v1253_v19 }
 0x5a1   : > { %v1400_v29 = vpop.permute.xlu1 %1399 }
 0x5a8   : > { %v3929_v20 = vpop.eup %3928 }
 0x5e4   : > { %v1299_v21 = vpop.f32.mrb[12].mxu0 }
 0x5e5   : > { %v1305_v22 = vmul.f32 %v3929_v20, %v1299_v21  ;;  %v3513_v23 = vpop.f32.mrb[13].mxu0 }
 0x5e6   : > { %v1302_v25 = vpop.f32.mrb[14].mxu0 }
 0x5e7   : > { %v1306_v26 = vpack.c.bf16 %v1305_v22, %v1305_v22  ;;  %v3514_v27 = vpop.f32.mrb[15].mxu0 }
 0x5e9   : > { %3518 = vmatmul.mubr.msk.bf16.vlgmr.msra.gmra.mrb[12].mxu1 %vm1084_vm3, %v1306_v26 }
 0x5ea   : > { %3528 = vmatpush3.bf16.xpose.msra.mxu1 %v1407_v28  ;;  %3529 = vmatprep.mubr.msk.bf16.mxu1 %vm4577_vm1, %v4576_v1 }
 0x5eb   : > { %3539 = vmatprep.subr.bf16.mxu1 %v4576_v1 }
 0x5f1   : > { %3530 = vmatmul.mubr.msk.bf16.vlgmr.msra.gmra.mrb[16].mxu1 %vm1084_vm3, %v1400_v29 }
 0x5f2   : > { %3541 = vmatprep.mubr.msk.bf16.mxu1 %vm4577_vm1, %v4576_v1  ;;  %3540 = vmatpush3.bf16.msra.mxu1 %v1515_v55  ;;  %v3913_v55 = vld [vmem:[%s5259_s29 + $0x38] sm:$0xff]  }
 0x5f3   : > { %3551 = vmatprep.subr.bf16.mxu1 %v4576_v1 }
 0x649   : > { %v1393_v30 = vpop.f32.mrb[16].mxu0 }
 0x64a   : > { %v3525_v31 = vpop.f32.mrb[17].mxu0 }
 0x64b   : > { %v1396_v32 = vpop.f32.mrb[18].mxu0 }
 0x64c   : > { %v3526_v34 = vpop.f32.mrb[19].mxu0  ;;  %v3312_v32 = vld [vmem:[%s5400_s12] ss:$0 sm:$0xff] }
 0x6bc   : > { %v1347_v35 = vpop.f32.mrb[12].mxu1 }
 0x6bd   : > { %v5363_v36 = vadd.f32 %v1393_v30, %v1347_v35  ;;  %v3519_v37 = vpop.f32.mrb[13].mxu1 }
 0x6be   : > { %v1350_v38 = vpop.f32.mrb[14].mxu1 }
 0x6bf   : > { %v3520_v39 = vpop.f32.mrb[15].mxu1 }
 0x6c4   : > { %v1443_v40 = vpop.f32.mrb[16].mxu1 }
 0x6c5   : > { %v1449_v41 = vmul.f32 0.35355338, %v1443_v40  ;;  %v3531_v42 = vpop.f32.mrb[17].mxu1 }
 0x6c6   : > { %v1446_v43 = vpop.f32.mrb[18].mxu1 }
 0x6c7   : > { %v3532_v44 = vpop.f32.mrb[19].mxu1  ;;  %v1450_v45 = vsel %vm1084_vm3, %v1449_v41, -inf }
 0x6c8   : > { %1451 = vmax.xlane.f32.xlu1 %v1450_v45 }
 0x6d9   : > { %1560 = vrot.lane.b32.xlu1 %v5291_v24, %s4580_s13  ;;  %v1559_v24 = vpop.permute.xlu0 %1558 }
 0x755   : > { %v1452_v46 = vpop.xlane.xlu1 %1451 }
 0x756   : > { %v1453_v47 = vsub.f32 %v1449_v41, %v1452_v46 }
 0x758   : > { %v1454_v48 = vmul.f32 1.442695, %v1453_v47  ;;  %v3910_v47 = vld [vmem:[%s5259_s29 + $0x40] sm:$0xff]  }
 0x759   : > { %v1561_v50 = vpop.permute.xlu1 %1560 }
 0x75a   : > { %3930 = vpow2.f32 %v1454_v48  ;;  %v1566_v53 = vsel %vm1084_vm3, %v1561_v50, 0  ;;  %v3911_v48 = vld [vmem:[%s5259_s29 + $0x48] sm:$0xff]  }
 0x75b   : > { %v845_v50 = vld [vmem:[%s5208_s18] sm:$0xff] }
 0x764   : > { %v3931_v49 = vpop.eup %3930 }
 0x765   : > { %v1456_v51 = vsel %vm1084_vm3, %v3931_v49, 0.0  ;;  %v1460_v52 = vpack.c.bf16 %v3931_v49, %v3931_v49  ;;  %v842_v49 = vld [vmem:[%s5201_s26] sm:$0xff] }
 0x766   : > { %1457 = vadd.xlane.f32.xlu0 %v1456_v51  ;;  %v846_v51 = vld [vmem:[%s5208_s18 + $0x8] sm:$0xff]  ;;  %s3391_s18 = sshll.u32 %s5761_s10, 4 }
 0x767   : > { %3536 = vmatmul.mubr.msk.bf16.vlgmr.msra.gmra.mrb[20].mxu0 %vm1084_vm3, %v1460_v52  ;;  %v1759_v52 = vadd.f32 %v845_v50, %v842_v49  ;;  %s2648_s0 = scalar_lea.vmem [#allocation17], %s3391_s18 }
 0x768   : > { %3546 = vmatpush3.bf16.xpose.msra.mxu0 %v1566_v53  ;;  %3547 = vmatprep.mubr.msk.bf16.mxu0 %vm4577_vm1, %v4576_v1 }
 0x769   : > { %3557 = vmatprep.subr.bf16.mxu0 %v4576_v1 }
 0x76f   : > { %3548 = vmatmul.mubr.msk.bf16.vlgmr.msra.gmra.mrb[24].mxu0 %vm1084_vm3, %v1559_v24 }
 0x770   : > { %3559 = vmatprep.mubr.msk.bf16.mxu0 %vm4577_vm1, %v4576_v1  ;;  %3558 = vmatpush3.bf16.msra.mxu0 %v1674_v17 }
 0x771   : > { %3571 = vmatprep.subr.bf16.mxu0 %v4576_v1 }
 0x77c   : > { %1620 = vrot.lane.b32.xlu0 %v5303_v33, %s4580_s13 }
 0x7f3   : > { %v1458_v56 = vpop.xlane.xlu0 %1457 }
 0x7f4   : > { %3932 = vrcp.f32 %v1458_v56 }
 0x7f7   : > { %v1621_v61 = vpop.permute.xlu0 %1620 }
 0x7f8   : > { %v1626_v4 = vsel %vm1146_vm4, %v1621_v61, 0 }
 0x7fe   : > { %v3933_v57 = vpop.eup %3932 }
 0x83a   : > { %v1503_v58 = vpop.f32.mrb[20].mxu0 }
 0x83b   : > { %v1509_v59 = vmul.f32 %v3933_v57, %v1503_v58  ;;  %v3537_v60 = vpop.f32.mrb[21].mxu0 }
 0x83c   : > { %v1506_v62 = vpop.f32.mrb[22].mxu0 }
 0x83d   : > { %v1510_v63 = vpack.c.bf16 %v1509_v59, %v1509_v59  ;;  %v3538_v0 = vpop.f32.mrb[23].mxu0 }
 0x83f   : > { %3542 = vmatmul.mubr.msk.bf16.vlgmr.msra.gmra.mrb[20].mxu1 %vm1084_vm3, %v1510_v63 }
 0x840   : > { %3552 = vmatpush3.bf16.msra.mxu1 %v1626_v4  ;;  %3553 = vmatprep.mubr.msk.bf16.mxu1 %vm4577_vm1, %v4576_v1 }
 0x841   : > { %3563 = vmatprep.subr.bf16.mxu1 %v4576_v1 }
 0x842   : > { %v1602_v33 = vpop.f32.mrb[24].mxu0 }
 0x843   : > { %v1608_v5 = vmul.f32 0.35355338, %v1602_v33  ;;  %v3549_v6 = vpop.f32.mrb[25].mxu0 }
 0x844   : > { %v1605_v7 = vpop.f32.mrb[26].mxu0 }
 0x845   : > { %v3550_v8 = vpop.f32.mrb[27].mxu0  ;;  %v1609_v9 = vsel %vm1084_vm3, %v1608_v5, -inf }
 0x846   : > { %1610 = vmax.xlane.f32.xlu1 %v1609_v9 }
 0x8d3   : > { %v1611_v10 = vpop.xlane.xlu1 %1610 }
 0x8d4   : > { %v1612_v11 = vsub.f32 %v1608_v5, %v1611_v10  ;;  %v3337_v5 = vld [vmem:[%s5287_s19 + $0x4] ss:$0 sm:$0xff] }
 0x8d6   : > { %v1613_v12 = vmul.f32 1.442695, %v1612_v11 }
 0x8d8   : > { %3934 = vpow2.f32 %v1613_v12 }
 0x8e2   : > { %v3935_v13 = vpop.eup %3934 }
 0x8e3   : > { %v1615_v14 = vsel %vm1084_vm3, %v3935_v13, 0.0  ;;  %v1619_v15 = vpack.c.bf16 %v3935_v13, %v3935_v13  ;;  %v3914_v13 = vld [vmem:[%s5259_s29 + $0x50] sm:$0xff]  }
 0x8e4   : > { %1616 = vadd.xlane.f32.xlu1 %v1615_v14  ;;  %v3915_v14 = vld [vmem:[%s5259_s29 + $0x58] sm:$0xff]   ;;  %s2728_s29 = scalar_lea.vmem [#allocation21], %s5761_s10 }
 0x8e5   : > { %3554 = vmatmul.mubr.msk.bf16.vlgmr.msra.gmra.mrb[24].mxu1 %vm1084_vm3, %v1619_v15 }
 0x8e6   : > { %3567 = vmatprep.mubr.msk.bf16.mxu1 %vm4577_vm1, %v4576_v1  ;;  %3564 = vmatpush3.bf16.msra.mxu1 %v3912_v54 }
 0x8e7   : > { %3565 = vmatprep.subr.bf16.mxu1 %v4576_v1 }
 0x8ea   : > { %3566 = vmatpush3.bf16.msra.mxu1 %v3913_v55 }
 0x8eb   : > { %3579 = vmatprep.subr.bf16.mxu1 %v4576_v1 }
 0x912   : > { %v1551_v18 = vpop.f32.mrb[20].mxu1 }
 0x913   : > { %v1557_v19 = vadd.f32 %v1551_v18, %v5363_v36  ;;  %v3543_v20 = vpop.f32.mrb[21].mxu1 }
 0x914   : > { %v1554_v21 = vpop.f32.mrb[22].mxu1 }
 0x915   : > { %v3544_v22 = vpop.f32.mrb[23].mxu1 }
 0x971   : > { %v1617_v23 = vpop.xlane.xlu1 %1616 }
 0x972   : > { %3936 = vrcp.f32 %v1617_v23 }
 0x97c   : > { %v3937_v25 = vpop.eup %3936 }
 0x9b8   : > { %v1662_v26 = vpop.f32.mrb[24].mxu1 }
 0x9b9   : > { %v1668_v27 = vmul.f32 %v3937_v25, %v1662_v26  ;;  %v3555_v28 = vpop.f32.mrb[25].mxu1 }
 0x9ba   : > { %v1665_v29 = vpop.f32.mrb[26].mxu1 }
 0x9bb   : > { %v1669_v30 = vpack.c.bf16 %v1668_v27, %v1668_v27  ;;  %v3556_v31 = vpop.f32.mrb[27].mxu1 }
 0x9bd   : > { %3560 = vmatmul.mubr.msk.bf16.vlgmr.msra.gmra.mrb[28].mxu0 %vm1084_vm3, %v1669_v30 }
 0x9be   : > { %3575 = vmatprep.mubr.msk.bf16.mxu0 %vm4577_vm1, %v4576_v1  ;;  %3572 = vmatpush3.bf16.msra.mxu0 %v3910_v47 }
 0x9bf   : > { %3573 = vmatprep.subr.bf16.mxu0 %v4576_v1 }
 0x9c2   : > { %3574 = vmatpush3.bf16.msra.mxu0 %v3911_v48 }
 0x9c3   : > { %3587 = vmatprep.subr.bf16.mxu0 %v4576_v1 }
 0xa90   : > { %v1710_v34 = vpop.f32.mrb[28].mxu0 }
 0xa91   : > { %v1716_v35 = vadd.f32 %v1710_v34, %v1557_v19  ;;  %v3561_v36 = vpop.f32.mrb[29].mxu0  ;;  %v3341_v34 = vld [vmem:[%s5287_s19 + $0x5] ss:$0 sm:$0xff] }
 0xa92   : > { %v1713_v37 = vpop.f32.mrb[30].mxu0 }
 0xa93   : > { %v1723_v38 = vadd.f32 %v3312_v32, %v1716_v35  ;;  %v3562_v39 = vpop.f32.mrb[31].mxu0 }
 0xa95   : > { %v1724_v40 = vadd.f32 %v1723_v38, %v5249_v2  ;;  %v843_v2 = vld [vmem:[%s5201_s26 + $0x8] sm:$0xff]  ;;  %s1725_s26 = smul.u32 3, %s5761_s10 }
 0xa96   : > { %v1760_v53 = vadd.f32 %v846_v51, %v843_v2  ;;  %v1916_v15 = vpack.c.bf16 %v843_v2, %v842_v49 }
 0xa97   : > { %v1730_v41 = vsel %vm917_vm2, %v1724_v40, 0.0  ;;  %s5422_s8 = scalar_lea.vmem [#allocation23], %s1725_s26  ;;  %s5425_s21 = scalar_lea.vmem [#allocation24], %s1725_s26 }
 0xa98   : > { %1731 = vadd.xlane.f32.xlu1 %v1730_v41  ;;  %v1853_v24 = vpack.c.bf16 %v1760_v53, %v1759_v52  ;;  %v3313_v60 = vld [vmem:[%s5422_s8] ss:$0 sm:$0xff] }
 0xa99   : > { %v3314_v62 = vld [vmem:[%s5425_s21] ss:$0 sm:$0xff] }
 0xa9a   : > { %3576 = vmatmul.mubr.msk.bf16.vlgmr.msra.gmra.mrb[32].mxu0 %vm917_vm2, %v1853_v24 }
 0xa9b   : > { %3589 = vmatprep.mubr.msk.bf16.mxu0 %vm4577_vm1, %v4576_v1 }
 0xb25   : > { %v1732_v42 = vpop.xlane.xlu1 %1731 }
 0xb26   : > { %v1734_v43 = vmul.f32 0.03125, %v1732_v42 }
 0xb28   : > { %v1735_v44 = vsub.f32 %v1724_v40, %v1734_v43 }
 0xb2a   : > { %v1736_v45 = vmul.f32 %v1735_v44, %v1735_v44 }
 0xb2c   : > { %v1737_v46 = vsel %vm917_vm2, %v1736_v45, 0.0 }
 0xb2d   : > { %1738 = vadd.xlane.f32.xlu0 %v1737_v46 }
 0xb6d   : > { %v1909_v6 = vpop.f32.mrb[32].mxu0 }
 0xb6e   : > { %v1910_v7 = vadd.f32 %v3337_v5, %v1909_v6  ;;  %v3577_v8 = vpop.f32.mrb[33].mxu0 }
 0xb6f   : > { %v1912_v9 = vpop.f32.mrb[34].mxu0 }
 0xb70   : > { %v1913_v10 = vadd.f32 %v3337_v5, %v1912_v9  ;;  %v3578_v11 = vpop.f32.mrb[35].mxu0 }
 0xb72   : > { %v5436_v12 = vpack.c.bf16 %v1913_v10, %v1910_v7 }
 0xb74   : > { %2090 = vrot.lane.b32.xlu1 %v5436_v12, %s4578_s20 }
 0xbba   : > { %v1739_v56 = vpop.xlane.xlu0 %1738 }
 0xbbb   : > { %v1740_v57 = vmul.f32 0.03125, %v1739_v56  ;;  %v3269_v56 = vld [vmem:[%s5336_s17 + $0x10] sm:$0xf] }
 0xbbd   : > { %v1741_v58 = vadd.f32 1e-05, %v1740_v57 }
 0xbbf   : > { %3938 = vrsqrt.f32 %v1741_v58 }
 0xbc9   : > { %v3939_v59 = vpop.eup %3938 }
 0xbca   : > { %v1743_v61 = vmul.f32 %v3939_v59, %v1735_v44 }
 0xbcc   : > { %v1750_v63 = vmul.f32 %v3313_v60, %v1743_v61  ;;  %v2249_v60 = vsel %vm1146_vm4, %v3269_v56, 0  ;;  %v3270_v61 = vld [vmem:[%s5336_s17 + $0x14] sm:$0xf] }
 0xbce   : > { %v5428_v0 = vadd.f32 %v3314_v62, %v1750_v63  ;;  %v2203_v62 = vsel %vm1146_vm4, %v3270_v61, 0 }
 0xbd0   : > { %v1758_v4 = vadd.f32 %v5428_v0, %v5253_v3  ;;  %v1986_v3 = vsel %vm1084_vm3, %v5436_v12, 0 }
 0xbd1   : > { %3588 = vmatpush3.bf16.xpose.msra.mxu0 %v1986_v3 }
 0xbd2   : > { %v1791_v33 = vpack.c.bf16 %v1758_v4, %v1758_v4  ;;  %3599 = vmatprep.subr.bf16.mxu0 %v4576_v1 }
 0xbd4   : > { %3568 = vmatmul.mubr.msk.bf16.vlgmr.msra.gmra.mrb[28].mxu1 %vm917_vm2, %v1791_v33 }
 0xbd5   : > { %3583 = vmatprep.mubr.msk.bf16.mxu1 %vm4577_vm1, %v4576_v1  ;;  %3580 = vmatpush3.bf16.msra.mxu1 %v3914_v13 }
 0xbd6   : > { %3581 = vmatprep.subr.bf16.mxu1 %v4576_v1 }
 0xbd9   : > { %3582 = vmatpush3.bf16.msra.mxu1 %v3915_v14 }
 0xbda   : > { %3593 = vmatprep.subr.bf16.mxu1 %v4576_v1 }
 0xbdc   : > { %3584 = vmatmul.mubr.msk.bf16.vlgmr.msra.gmra.mrb[32].mxu1 %vm917_vm2, %v1916_v15 }
 0xbdd   : > { %3595 = vmatprep.mubr.msk.bf16.mxu1 %vm4577_vm1, %v4576_v1 }
 0xbe6   : > { %v2091_v18 = vpop.permute.xlu1 %2090 }
 0xbe7   : > { %v2096_v25 = vsel %vm1084_vm3, %v2091_v18, 0 }
 0xca7   : > { %v1847_v17 = vpop.f32.mrb[28].mxu1 }
 0xca8   : > { %v1848_v19 = vadd.f32 %v3333_v16, %v1847_v17  ;;  %v3569_v20 = vpop.f32.mrb[29].mxu1 }
 0xca9   : > { %v1850_v21 = vpop.f32.mrb[30].mxu1 }
 0xcaa   : > { %v1979_v22 = vpack.c.bf16 %v1848_v19, %v1848_v19  ;;  %v3570_v23 = vpop.f32.mrb[31].mxu1 }
 0xcac   : > { %2087 = vrot.lane.b32.xlu1 %v1979_v22, %s4578_s20  ;;  %3590 = vmatmul.mubr.msk.bf16.vlgmr.msra.gmra.mrb[36].mxu0 %vm1084_vm3, %v1979_v22 }
 0xcad   : > { %3600 = vmatpush3.bf16.xpose.msra.mxu0 %v2096_v25  ;;  %3601 = vmatprep.mubr.msk.bf16.mxu0 %vm4577_vm1, %v4576_v1 }
 0xcae   : > { %3611 = vmatprep.subr.bf16.mxu0 %v4576_v1 }
 0xcaf   : > { %v1972_v35 = vpop.f32.mrb[32].mxu1 }
 0xcb0   : > { %v1973_v36 = vadd.f32 %v3341_v34, %v1972_v35  ;;  %v3585_v37 = vpop.f32.mrb[33].mxu1 }
 0xcb1   : > { %v1975_v38 = vpop.f32.mrb[34].mxu1 }
 0xcb2   : > { %v1976_v39 = vadd.f32 %v3341_v34, %v1975_v38  ;;  %v3586_v40 = vpop.f32.mrb[35].mxu1 }
 0xcb4   : > { %v5465_v41 = vpack.c.bf16 %v1976_v39, %v1973_v36 }
 0xcb6   : > { %3594 = vmatpush3.bf16.msra.mxu1 %v5465_v41 }
 0xcb7   : > { %3605 = vmatprep.subr.bf16.mxu1 %v4576_v1 }
 0xd1e   : > { %v2088_v26 = vpop.permute.xlu1 %2087 }
 0xd1f   : > { %3602 = vmatmul.mubr.msk.bf16.vlgmr.msra.gmra.mrb[40].mxu0 %vm1084_vm3, %v2088_v26 }
 0xd20   : > { %3613 = vmatprep.mubr.msk.bf16.mxu0 %vm4577_vm1, %v4576_v1  ;;  %3612 = vmatpush3.bf16.msra.mxu0 %v2203_v62 }
 0xd21   : > { %3623 = vmatprep.subr.bf16.mxu0 %v4576_v1 }
 0xd7f   : > { %v2022_v27 = vpop.f32.mrb[36].mxu0 }
 0xd80   : > { %v2028_v28 = vmul.f32 0.35355338, %v2022_v27  ;;  %v3591_v29 = vpop.f32.mrb[37].mxu0 }
 0xd81   : > { %v2025_v30 = vpop.f32.mrb[38].mxu0 }
 0xd82   : > { %v3592_v31 = vpop.f32.mrb[39].mxu0  ;;  %v2030_v32 = vsel %vm2029_vm5, %v2028_v28, -inf }
 0xd83   : > { %2031 = vmax.xlane.f32.xlu1 %v2030_v32 }
 0xd94   : > { %2293 = vrot.lane.b32.xlu1 %v5436_v12, %s4579_s7 }
 0xd98   : > { %2291 = vrot.lane.b32.xlu1 %v1979_v22, %s4579_s7 }
 0xdf2   : > { %v2132_v42 = vpop.f32.mrb[40].mxu0 }
 0xdf3   : > { %v2138_v43 = vmul.f32 0.35355338, %v2132_v42  ;;  %v3603_v44 = vpop.f32.mrb[41].mxu0 }
 0xdf4   : > { %v2135_v45 = vpop.f32.mrb[42].mxu0 }
 0xdf5   : > { %v3604_v46 = vpop.f32.mrb[43].mxu0  ;;  %v2139_v47 = vsel %vm2029_vm5, %v2138_v43, -inf }
 0xdf6   : > { %2140 = vmax.xlane.f32.xlu0 %v2139_v47 }
 0xe0c   : > { %2151 = vrot.lane.b32.xlu0 %v5465_v41, %s4578_s20 }
 0xe10   : > { %v2032_v48 = vpop.xlane.xlu1 %2031 }
 0xe11   : > { %v2033_v49 = vsub.f32 %v2028_v28, %v2032_v48  ;;  %v3271_v48 = vld [vmem:[%s5336_s17 + $0x18] sm:$0xf] }
 0xe13   : > { %v2034_v2 = vmul.f32 1.442695, %v2033_v49  ;;  %v2405_v49 = vsel %vm1146_vm4, %v3271_v48, 0 }
 0xe14   : > { %v2294_v63 = vpop.permute.xlu1 %2293 }
 0xe15   : > { %3940 = vpow2.f32 %v2034_v2  ;;  %v2299_v21 = vsel %vm1084_vm3, %v2294_v63, 0 }
 0xe18   : > { %v2292_v4 = vpop.permute.xlu1 %2291 }
 0xe1f   : > { %v3941_v50 = vpop.eup %3940 }
 0xe20   : > { %v2036_v51 = vsel %vm2029_vm5, %v3941_v50, 0.0  ;;  %v2040_v52 = vpack.c.bf16 %v3941_v50, %v3941_v50 }
 0xe21   : > { %2037 = vadd.xlane.f32.xlu1 %v2036_v51 }
 0xe22   : > { %3596 = vmatmul.mubr.msk.bf16.vlgmr.msra.gmra.mrb[36].mxu1 %vm2029_vm5, %v2040_v52 }
 0xe23   : > { %3607 = vmatprep.mubr.msk.bf16.mxu1 %vm4577_vm1, %v4576_v1 }
 0xe32   : > { %2448 = vrot.lane.b32.xlu1 %v1979_v22, %s4580_s13 }
 0xe83   : > { %v2141_v53 = vpop.xlane.xlu0 %2140 }
 0xe84   : > { %v2142_v24 = vsub.f32 %v2138_v43, %v2141_v53 }
 0xe86   : > { %v2143_v54 = vmul.f32 1.442695, %v2142_v24 }
 0xe87   : > { %v2152_v55 = vpop.permute.xlu0 %2151 }
 0xe88   : > { %3942 = vpow2.f32 %v2143_v54  ;;  %3606 = vmatpush3.bf16.msra.mxu1 %v2152_v55 }
 0xe89   : > { %3617 = vmatprep.subr.bf16.mxu1 %v4576_v1 }
 0xe92   : > { %v3943_v57 = vpop.eup %3942 }
 0xe93   : > { %v2145_v58 = vsel %vm2029_vm5, %v3943_v57, 0.0  ;;  %v2149_v59 = vpack.c.bf16 %v3943_v57, %v3943_v57 }
 0xe94   : > { %2146 = vadd.xlane.f32.xlu0 %v2145_v58 }
 0xe95   : > { %3608 = vmatmul.mubr.msk.bf16.vlgmr.msra.gmra.mrb[40].mxu1 %vm2029_vm5, %v2149_v59 }
 0xe96   : > { %3618 = vmatpush3.bf16.msra.mxu1 %v2249_v60  ;;  %3619 = vmatprep.mubr.msk.bf16.mxu1 %vm4577_vm1, %v4576_v1 }
 0xe97   : > { %3629 = vmatprep.subr.bf16.mxu1 %v4576_v1 }
 0xeaa   : > { %2353 = vrot.lane.b32.xlu0 %v5465_v41, %s4579_s7 }
 0xeae   : > { %v2038_v33 = vpop.xlane.xlu1 %2037 }
 0xeaf   : > { %3944 = vrcp.f32 %v2038_v33 }
 0xeb9   : > { %v3945_v5 = vpop.eup %3944 }
 0xef5   : > { %v2078_v6 = vpop.f32.mrb[36].mxu1 }
 0xef6   : > { %v2084_v7 = vmul.f32 %v3945_v5, %v2078_v6  ;;  %v3597_v8 = vpop.f32.mrb[37].mxu1 }
 0xef7   : > { %v2081_v9 = vpop.f32.mrb[38].mxu1 }
 0xef8   : > { %v2085_v10 = vpack.c.bf16 %v2084_v7, %v2084_v7  ;;  %v3598_v11 = vpop.f32.mrb[39].mxu1  ;;  %v3272_v7 = vld [vmem:[%s5336_s17 + $0x1c] sm:$0xf] }
 0xef9   : > { %v2562_v8 = vsel %vm1146_vm4, %v3272_v7, 0 }
 0xefa   : > { %3620 = vmatmul.mubr.msk.bf16.vlgmr.msra.gmra.mrb[44].mxu1 %vm1084_vm3, %v2085_v10 }
 0xefb   : > { %3631 = vmatprep.mubr.msk.bf16.mxu1 %vm4577_vm1, %v4576_v1 }
 0xf21   : > { %v2147_v3 = vpop.xlane.xlu0 %2146 }
 0xf22   : > { %3946 = vrcp.f32 %v2147_v3 }
 0xf25   : > { %v2354_v13 = vpop.permute.xlu0 %2353 }
 0xf26   : > { %3630 = vmatpush3.bf16.msra.mxu1 %v2354_v13 }
 0xf27   : > { %3641 = vmatprep.subr.bf16.mxu1 %v4576_v1 }
 0xf2c   : > { %v3947_v14 = vpop.eup %3946 }
 0xf68   : > { %v2191_v15 = vpop.f32.mrb[40].mxu1 }
 0xf69   : > { %v2197_v16 = vmul.f32 %v3947_v14, %v2191_v15  ;;  %v3609_v17 = vpop.f32.mrb[41].mxu1 }
 0xf6a   : > { %v2194_v18 = vpop.f32.mrb[42].mxu1 }
 0xf6b   : > { %v2198_v19 = vpack.c.bf16 %v2197_v16, %v2197_v16  ;;  %v3610_v20 = vpop.f32.mrb[43].mxu1 }
 0xf6d   : > { %3614 = vmatmul.mubr.msk.bf16.vlgmr.msra.gmra.mrb[44].mxu0 %vm1084_vm3, %v2198_v19 }
 0xf6e   : > { %3624 = vmatpush3.bf16.xpose.msra.mxu0 %v2299_v21  ;;  %3625 = vmatprep.mubr.msk.bf16.mxu0 %vm4577_vm1, %v4576_v1 }
 0xf6f   : > { %3635 = vmatprep.subr.bf16.mxu0 %v4576_v1 }
 0xf75   : > { %3626 = vmatmul.mubr.msk.bf16.vlgmr.msra.gmra.mrb[48].mxu0 %vm1084_vm3, %v2292_v4 }
 0xf76   : > { %3637 = vmatprep.mubr.msk.bf16.mxu0 %vm4577_vm1, %v4576_v1  ;;  %3636 = vmatpush3.bf16.msra.mxu0 %v2405_v49 }
 0xf77   : > { %3647 = vmatprep.subr.bf16.mxu0 %v4576_v1 }
 0xfcd   : > { %v2285_v22 = vpop.f32.mrb[44].mxu1 }
 0xfce   : > { %v3621_v23 = vpop.f32.mrb[45].mxu1 }
 0xfcf   : > { %v2288_v25 = vpop.f32.mrb[46].mxu1 }
 0xfd0   : > { %v3622_v26 = vpop.f32.mrb[47].mxu1 }
0x1040   : > { %v2239_v27 = vpop.f32.mrb[44].mxu0 }
0x1041   : > { %v5502_v28 = vadd.f32 %v2285_v22, %v2239_v27  ;;  %v3615_v29 = vpop.f32.mrb[45].mxu0  ;;  %v3357_v22 = vld [vmem:[%s5400_s12 + $0x1] ss:$0 sm:$0xff] }
0x1042   : > { %v2242_v30 = vpop.f32.mrb[46].mxu0 }
0x1043   : > { %v3616_v31 = vpop.f32.mrb[47].mxu0 }
0x1048   : > { %v2335_v32 = vpop.f32.mrb[48].mxu0 }
0x1049   : > { %v2341_v34 = vmul.f32 0.35355338, %v2335_v32  ;;  %v3627_v35 = vpop.f32.mrb[49].mxu0 }
0x104a   : > { %v2338_v36 = vpop.f32.mrb[50].mxu0 }
0x104b   : > { %v3628_v37 = vpop.f32.mrb[51].mxu0  ;;  %v2342_v38 = vsel %vm2029_vm5, %v2341_v34, -inf }
0x104c   : > { %2343 = vmax.xlane.f32.xlu0 %v2342_v38  ;;  %v3916_v38 = vld [vmem:[%s2648_s0] sm:$0xff]  }
0x1062   : > { %2450 = vrot.lane.b32.xlu0 %v5436_v12, %s4580_s13  ;;  %v2449_v12 = vpop.permute.xlu1 %2448 }
0x10d9   : > { %v2344_v39 = vpop.xlane.xlu0 %2343 }
0x10da   : > { %v2345_v40 = vsub.f32 %v2341_v34, %v2344_v39  ;;  %v3917_v39 = vld [vmem:[%s2648_s0 + $0x8] sm:$0xff]  }
0x10dc   : > { %v2346_v42 = vmul.f32 1.442695, %v2345_v40  ;;  %v3919_v40 = vld [vmem:[%s5334_s5 + $0x8] sm:$0xff]  }
0x10dd   : > { %v2451_v44 = vpop.permute.xlu0 %2450 }
0x10de   : > { %3948 = vpow2.f32 %v2346_v42  ;;  %v2456_v47 = vsel %vm1084_vm3, %v2451_v44, 0 }
0x10e8   : > { %v3949_v43 = vpop.eup %3948 }
0x10e9   : > { %v2348_v45 = vsel %vm2029_vm5, %v3949_v43, 0.0  ;;  %v2352_v46 = vpack.c.bf16 %v3949_v43, %v3949_v43 }
0x10ea   : > { %2349 = vadd.xlane.f32.xlu0 %v2348_v45 }
0x10eb   : > { %3632 = vmatmul.mubr.msk.bf16.vlgmr.msra.gmra.mrb[48].mxu1 %vm2029_vm5, %v2352_v46  ;;  %v3360_v46 = vld [vmem:[%s5422_s8 + $0x1] ss:$0 sm:$0xff] }
0x10ec   : > { %3642 = vmatpush3.bf16.xpose.msra.mxu1 %v2456_v47  ;;  %3643 = vmatprep.mubr.msk.bf16.mxu1 %vm4577_vm1, %v4576_v1 }
0x10ed   : > { %3653 = vmatprep.subr.bf16.mxu1 %v4576_v1 }
0x10f3   : > { %3644 = vmatmul.mubr.msk.bf16.vlgmr.msra.gmra.mrb[52].mxu1 %vm1084_vm3, %v2449_v12  ;;  %v3361_v12 = vld [vmem:[%s5425_s21 + $0x1] ss:$0 sm:$0xff] }
0x10f4   : > { %3655 = vmatprep.mubr.msk.bf16.mxu1 %vm4577_vm1, %v4576_v1  ;;  %3654 = vmatpush3.bf16.msra.mxu1 %v2562_v8 }
0x10f5   : > { %3667 = vmatprep.subr.bf16.mxu1 %v4576_v1 }
0x1100   : > { %2510 = vrot.lane.b32.xlu0 %v5465_v41, %s4580_s13 }
0x1177   : > { %v2350_v2 = vpop.xlane.xlu0 %2349 }
0x1178   : > { %3950 = vrcp.f32 %v2350_v2 }
0x117b   : > { %v2511_v56 = vpop.permute.xlu0 %2510 }
0x1182   : > { %v3951_v50 = vpop.eup %3950 }
0x11be   : > { %v2393_v51 = vpop.f32.mrb[48].mxu1 }
0x11bf   : > { %v2399_v52 = vmul.f32 %v3951_v50, %v2393_v51  ;;  %v3633_v53 = vpop.f32.mrb[49].mxu1  ;;  %v3920_v50 = vld [vmem:[%s5334_s5 + $0x10] sm:$0xff]   ;;  %v3921_v51 = vld [vmem:[%s5334_s5 + $0x18] sm:$0xff]  }
0x11c0   : > { %v2396_v24 = vpop.f32.mrb[50].mxu1 }
0x11c1   : > { %v2400_v54 = vpack.c.bf16 %v2399_v52, %v2399_v52  ;;  %v3634_v55 = vpop.f32.mrb[51].mxu1  ;;  %v3364_v52 = vld [vmem:[%s2653_s23] ss:$0 sm:$0xff] }
0x11c3   : > { %3638 = vmatmul.mubr.msk.bf16.vlgmr.msra.gmra.mrb[52].mxu0 %vm1084_vm3, %v2400_v54 }
0x11c4   : > { %3648 = vmatpush3.bf16.msra.mxu0 %v2511_v56  ;;  %3649 = vmatprep.mubr.msk.bf16.mxu0 %vm4577_vm1, %v4576_v1 }
0x11c5   : > { %3659 = vmatprep.subr.bf16.mxu0 %v4576_v1 }
0x11c6   : > { %v2492_v41 = vpop.f32.mrb[52].mxu1 }
0x11c7   : > { %v2498_v57 = vmul.f32 0.35355338, %v2492_v41  ;;  %v3645_v58 = vpop.f32.mrb[53].mxu1 }
0x11c8   : > { %v2495_v59 = vpop.f32.mrb[54].mxu1  ;;  %v3369_v58 = vld [vmem:[%s2728_s29] ss:$0 sm:$0xff] }
0x11c9   : > { %v3646_v60 = vpop.f32.mrb[55].mxu1  ;;  %v2499_v61 = vsel %vm2029_vm5, %v2498_v57, -inf }
0x11ca   : > { %2500 = vmax.xlane.f32.xlu1 %v2499_v61 }
0x1257   : > { %v2501_v62 = vpop.xlane.xlu1 %2500 }
0x1258   : > { %v2502_v63 = vsub.f32 %v2498_v57, %v2501_v62 }
0x125a   : > { %v2503_v4 = vmul.f32 1.442695, %v2502_v63 }
0x125c   : > { %3952 = vpow2.f32 %v2503_v4 }
0x1266   : > { %v3953_v33 = vpop.eup %3952 }
0x1267   : > { %v2505_v5 = vsel %vm2029_vm5, %v3953_v33, 0.0  ;;  %v2509_v6 = vpack.c.bf16 %v3953_v33, %v3953_v33 }
0x1268   : > { %2506 = vadd.xlane.f32.xlu1 %v2505_v5 }
0x1269   : > { %3650 = vmatmul.mubr.msk.bf16.vlgmr.msra.gmra.mrb[56].mxu0 %vm2029_vm5, %v2509_v6 }
0x126a   : > { %3663 = vmatprep.mubr.msk.bf16.mxu0 %vm4577_vm1, %v4576_v1  ;;  %3660 = vmatpush3.bf16.msra.mxu0 %v3916_v38 }
0x126b   : > { %3661 = vmatprep.subr.bf16.mxu0 %v4576_v1 }
0x126e   : > { %3662 = vmatpush3.bf16.msra.mxu0 %v3917_v39 }
0x1296   : > { %v2441_v9 = vpop.f32.mrb[52].mxu0 }
0x1297   : > { %v2447_v10 = vadd.f32 %v2441_v9, %v5502_v28  ;;  %v3639_v11 = vpop.f32.mrb[53].mxu0 }
0x1298   : > { %v2444_v3 = vpop.f32.mrb[54].mxu0 }
0x1299   : > { %v3640_v13 = vpop.f32.mrb[55].mxu0 }
0x129a   : > { %v3377_v13 = vld [vmem:[%s5422_s8 + $0x2] ss:$0 sm:$0xff] }
0x12f5   : > { %v2507_v14 = vpop.xlane.xlu1 %2506 }
0x12f6   : > { %3954 = vrcp.f32 %v2507_v14 }
0x1300   : > { %v3955_v15 = vpop.eup %3954 }
0x133c   : > { %v2550_v16 = vpop.f32.mrb[56].mxu0 }
0x133d   : > { %v2556_v17 = vmul.f32 %v3955_v15, %v2550_v16  ;;  %v3651_v18 = vpop.f32.mrb[57].mxu0  ;;  %v3378_v15 = vld [vmem:[%s5425_s21 + $0x2] ss:$0 sm:$0xff] }
0x133e   : > { %v2553_v19 = vpop.f32.mrb[58].mxu0 }
0x133f   : > { %v2557_v20 = vpack.c.bf16 %v2556_v17, %v2556_v17  ;;  %v3652_v21 = vpop.f32.mrb[59].mxu0 }
0x1341   : > { %3656 = vmatmul.mubr.msk.bf16.vlgmr.msra.gmra.mrb[56].mxu1 %vm1084_vm3, %v2557_v20 }
0x1342   : > { %3675 = vmatprep.mubr.msk.bf16.mxu1 %vm4577_vm1, %v4576_v1 }
0x1414   : > { %v2598_v23 = vpop.f32.mrb[56].mxu1 }
0x1415   : > { %v2604_v25 = vadd.f32 %v2598_v23, %v2447_v10  ;;  %v3657_v26 = vpop.f32.mrb[57].mxu1 }
0x1416   : > { %v2601_v27 = vpop.f32.mrb[58].mxu1 }
0x1417   : > { %v2611_v28 = vadd.f32 %v3357_v22, %v2604_v25  ;;  %v3658_v29 = vpop.f32.mrb[59].mxu1 }
0x1418   : > { %v3380_v29 = vld [vmem:[#allocation26] ss:$0 sm:$0xff] (!%p3379_p12) }
0x1419   : > { %v2612_v30 = vadd.f32 %v2611_v28, %v5428_v0  ;;  %v3918_v0 = vld [vmem:[%s5334_s5] sm:$0xff]  }
0x141a   : > { %3668 = vmatpush3.bf16.msra.mxu1 %v3918_v0 }
0x141b   : > { %v2618_v31 = vsel %vm917_vm2, %v2612_v30, 0.0  ;;  %3669 = vmatprep.subr.bf16.mxu1 %v4576_v1 }
0x141c   : > { %2619 = vadd.xlane.f32.xlu0 %v2618_v31  ;;  %v3381_v31 = vld [vmem:[#allocation27] ss:$0 sm:$0xff] (!%p3379_p12) }
0x141e   : > { %3670 = vmatpush3.bf16.msra.mxu1 %v3919_v40 }
0x141f   : > { %3671 = vmatprep.subr.bf16.mxu1 %v4576_v1 }
0x1422   : > { %3672 = vmatpush3.bf16.msra.mxu1 %v3920_v50 }
0x1423   : > { %3673 = vmatprep.subr.bf16.mxu1 %v4576_v1 }
0x1426   : > { %3674 = vmatpush3.bf16.msra.mxu1 %v3921_v51 }
0x14a9   : > { %v2620_v32 = vpop.xlane.xlu0 %2619 }
0x14aa   : > { %v2621_v34 = vmul.f32 0.03125, %v2620_v32 }
0x14ac   : > { %v2622_v35 = vsub.f32 %v2612_v30, %v2621_v34 }
0x14ae   : > { %v2623_v36 = vmul.f32 %v2622_v35, %v2622_v35 }
0x14b0   : > { %v2624_v37 = vsel %vm917_vm2, %v2623_v36, 0.0 }
0x14b1   : > { %2625 = vadd.xlane.f32.xlu1 %v2624_v37 }
0x153e   : > { %v2626_v42 = vpop.xlane.xlu1 %2625 }
0x153f   : > { %v2627_v43 = vmul.f32 0.03125, %v2626_v42 }
0x1541   : > { %v2628_v44 = vadd.f32 1e-05, %v2627_v43 }
0x1543   : > { %3956 = vrsqrt.f32 %v2628_v44 }
0x154d   : > { %v3957_v45 = vpop.eup %3956 }
0x154e   : > { %v2630_v47 = vmul.f32 %v3957_v45, %v2622_v35 }
0x1550   : > { %v2637_v48 = vmul.f32 %v3360_v46, %v2630_v47 }
0x1552   : > { %v2644_v49 = vadd.f32 %v3361_v12, %v2637_v48 }
0x1554   : > { %v2645_v2 = vpack.c.bf16 %v2644_v49, %v2644_v49 }
0x1556   : > { %3664 = vmatmul.mubr.msk.bf16.vlgmr.msra.gmra.mrb[60].mxu0 %vm917_vm2, %v2645_v2 }
0x1629   : > { %v2710_v53 = vpop.f32.mrb[60].mxu0 }
0x162a   : > { %v2711_v24 = vadd.f32 %v3364_v52, %v2710_v53  ;;  %v3665_v54 = vpop.f32.mrb[61].mxu0 }
0x162b   : > { %v2713_v55 = vpop.f32.mrb[62].mxu0 }
0x162c   : > { %v2716_v56 = vmax.f32 %v2711_v24, 0.0  ;;  %v3666_v41 = vpop.f32.mrb[63].mxu0 }
0x162e   : > { %v2717_v57 = vpack.c.bf16 %v2716_v56, %v2716_v56 }
0x1630   : > { %3676 = vmatmul.mubr.msk.bf16.vlgmr.msra.gmra.mrb[60].mxu1 %vm2760_vm6, %v2717_v57 }
0x1703   : > { %v2798_v59 = vpop.f32.mrb[60].mxu1 }
0x1704   : > { %v2799_v60 = vadd.f32 %v3369_v58, %v2798_v59  ;;  %v3677_v61 = vpop.f32.mrb[61].mxu1 }
0x1705   : > { %v2801_v62 = vpop.f32.mrb[62].mxu1 }
0x1706   : > { %v3678_v1 = vpop.f32.mrb[63].mxu1  ;;  %v2804_v63 = vadd.f32 %v2799_v60, %v2644_v49 }
0x1708   : > { %v2810_v4 = vsel %vm917_vm2, %v2804_v63, 0.0 }
0x1709   : > { %2811 = vadd.xlane.f32.xlu1 %v2810_v4 }
0x1796   : > { %v2812_v33 = vpop.xlane.xlu1 %2811 }
0x1797   : > { %v2813_v5 = vmul.f32 0.03125, %v2812_v33 }
0x1799   : > { %v2814_v6 = vsub.f32 %v2804_v63, %v2813_v5 }
0x179b   : > { %v2815_v7 = vmul.f32 %v2814_v6, %v2814_v6 }
0x179d   : > { %v2816_v8 = vsel %vm917_vm2, %v2815_v7, 0.0 }
0x179e   : > { %2817 = vadd.xlane.f32.xlu1 %v2816_v8 }
0x182b   : > { %v2818_v9 = vpop.xlane.xlu1 %2817 }
0x182c   : > { %v2819_v10 = vmul.f32 0.03125, %v2818_v9 }
0x182e   : > { %v2820_v11 = vadd.f32 1e-05, %v2819_v10 }
0x1830   : > { %3958 = vrsqrt.f32 %v2820_v11 }
0x183a   : > { %v3959_v3 = vpop.eup %3958 }
0x183b   : > { %v2822_v14 = vmul.f32 %v3959_v3, %v2814_v6  ;;  %2841 = sbr.rel (%p3379_p12) target bundleno = 6523 (0x197b), region = 156 }
0x183d   : > { %v2829_v16 = vmul.f32 %v3377_v13, %v2822_v14 }
0x183f   : > { %v2836_v17 = vadd.f32 %v3378_v15, %v2829_v16 }
0x1841   : > { %2837 = vst.msk [vmem:[#allocation2] sm:$0xff] %vm917_vm2, %v2836_v17  ;;  %v2844_v18 = vsel (!%p3379_p12), %vm917_vm2, %v2836_v17, 0.0 }
0x1842   : > { %2845 = vadd.xlane.f32.xlu0 %v2844_v18 }
0x18cf   : > { %v2846_v19 = vpop.xlane.xlu0 %2845 }
0x18d0   : > { %v2847_v20 = vmul.f32 0.03125, %v2846_v19 }
0x18d2   : > { %v2848_v21 = vsub.f32 %v2836_v17, %v2847_v20 }
0x18d4   : > { %v2849_v22 = vmul.f32 %v2848_v21, %v2848_v21 }
0x18d6   : > { %v2850_v23 = vsel %vm917_vm2, %v2849_v22, 0.0 }
0x18d7   : > { %2851 = vadd.xlane.f32.xlu0 %v2850_v23 }
0x1964   : > { %v2852_v25 = vpop.xlane.xlu0 %2851 }
0x1965   : > { %v2853_v26 = vmul.f32 0.03125, %v2852_v25 }
0x1967   : > { %v2854_v27 = vadd.f32 1e-05, %v2853_v26 }
0x1969   : > { %3960 = vrsqrt.f32 %v2854_v27 }
0x1973   : > { %v3961_v28 = vpop.eup %3960 }
0x1974   : > { %v2856_v30 = vmul.f32 %v3961_v28, %v2848_v21 }
0x1976   : > { %v2863_v32 = vmul.f32 %v3380_v29, %v2856_v30 }
0x1978   : > { %v2870_v34 = vadd.f32 %v3381_v31, %v2863_v32 }
0x197a   : > { %2871 = vst.msk [vmem:[%s832_s30] sm:$0xff] %vm917_vm2, %v2870_v34 }
0x197b PF: > { %s5762_s10 = sld [smem:[#allocation44_spill]]  ;;  %s5763_s11 = sld [smem:[#allocation49_spill]] }
0x197c   : > { %s5764_s13 = sld [smem:[#allocation67_spill]]  ;;  %s2886_s5 = sshll.u32 %s832_s30, 4  ;;  %s2887_s5 = int_to_ptr.vmem [resolvable:$true] %s2886_s5 }
0x197d   : > { %s2873_s17 = scalar_lea.sflag [#allocation5], %s5188_s24  ;;  %s4418_s25 = scalar_lea.vmem %s2887_s5, 128 }
0x197e   : > { %p4419_p7 = scmp.ne.s32.totalorder %s2887_s5, %s4418_s25  ;;  %s4581_s12 = smov [#allocation29]  }
0x197f   : > { %s4422_s26 = sshll.u32 %s4581_s12, 4  ;;  %s4423_s26 = int_to_ptr.vmem [resolvable:$false] %s4422_s26 }
0x1980   : > { %s4424_s8 = scalar_lea.vmem %s4423_s26, 256  ;;  %p4425_p10 = scmp.lt.s32.totalorder %s2887_s5, %s4423_s26 }
0x1981   : > { %s3383_s19 = sshll.u32 %s5762_s10, 7  ;;  %p5765_p5 = scmp.ne.s32.totalorder %s5763_s11, 0 }
0x1982   : > { %s5570_s15 = scalar_lea.hbm %s5764_s13, %s3383_s19  ;;  %p4426_p1 = scmp.lt.s32.totalorder %s4424_s8, %s4418_s25 }
0x1983   : > { %p4420_p0 = pnand %p4419_p7, %p5765_p5 }
0x1984   : > { %p4427_p2 = por %p4426_p1, %p4425_p10 }
0x1985   : > { %p4421_p8 = pneg %p4420_p0 }
0x1987   : > { %p4428_p3 = pnand %p4427_p2, %p4421_p8 }
0x1989   : > { %4431 = shalt.err (!%p4428_p3)
}
0x198a   : > { %s4432_s24 = scalar_lea.hbm %s5570_s15, 128  ;;  %s4436_s21 = scalar_lea.hbm %s5764_s13, 256 }
0x198b   : > { %p4433_p9 = scmp.ne.s32.totalorder %s5570_s15, %s4432_s24  ;;  %p4437_p13 = scmp.lt.u32.totalorder %s5570_s15, %s5764_s13 }
0x198c   : > { %p4438_p4 = scmp.lt.u32.totalorder %s4436_s21, %s4432_s24  ;;  %p4440_p7 = scmp.lt.u32.totalorder %s4432_s24, %s5570_s15 }
0x198d   : > { %p4434_p11 = pnand %p4433_p9, %p5765_p5 }
0x198e   : > { %p4439_p12 = por %p4438_p4, %p4437_p13 }
0x198f   : > { %p4435_p6 = pneg %p4434_p11 }
0x1990   : > { %p4441_p0 = por %p4440_p7, %p4439_p12 }
0x1992   : > { %p4442_p8 = pnand %p4441_p0, %p4435_p6 }
0x1994   : > { %4445 = shalt.err (!%p4442_p8)
}
0x1995   : > { %3735 = dma.vmem_to_hbm [thread:$0]  (%p5765_p5), %s2887_s5, 128, %s5570_s15, %s2873_s17  }
0x1996 PF: > { %s5766_s23 = sld [smem:[#allocation41_spill]]  ;;  %s5767_s29 = sld [smem:[#allocation50_spill]] }
0x1997   : > { %p3816_p10 = scmp.ge.s32.totalorder %s4552_s28, 2 }
0x199c   : > { %s2898_s10 = sand.u32 1, %s5766_s23   ;;  %p5768_p1 = scmp.ne.s32.totalorder %s5767_s29, 0 }
0x199d   : > { %s2899_s19 = scalar_lea.sflag [#allocation5], %s2898_s10 }
0x199e   : > { %p3788_p2 = pnand %p3816_p10, %p5768_p1 }
0x19a0   : > { %4519 = dma.done.wait (!%p3788_p2), %s2899_s19, 128  }
0x19a1   : > { %4521 = vsyncadd (!%p3788_p2), %s2899_s19, 4294967168  ;;  %s44_s28 = sadd.s32 1, %s4552_s28   ;;  %s5769_s20 = sld [smem:[#allocation42_spill]] }
0x19a2   : > { %p41_p3 = scmp.ge.s32.totalorder %s44_s28, 6   ;;  %s5770_s23 = sld [smem:[#allocation51_spill]] }
0x19a3   : > { %s5771_s24 = sld [smem:[#allocation45_spill]]  ;;  %s5772_s26 = sld [smem:[#allocation47_spill]] }
0x19a4   : > { %s5773_s11 = sld [smem:[#allocation48_spill]]  ;;  %s5774_s21 = smov %s4528_s22 }
0x19a5   : > { %s5776_s25 = smov %s4548_s27  ;;  %43 = sbr.rel (!%p41_p3) target bundleno = 34 (0x22), region = 248 }
0x19a7   : > { %s5775_s22 = smov %s5769_s20 }
0x19aa   : > { %s5777_s27 = smov %s5773_s11 }
0x19ac   :  { %2904 = vsyncpa [#allocation4], 1 }
0x19ad   :  { %2906 = vsyncpa [#allocation4 + $0x1], 1 }
0x19ae   :  { %2907 = vsyncpa [#allocation7], 1 }
0x19af   :  { %2909 = vsyncpa [#allocation7 + $0x1], 1 }
0x19b0   :  { %2910 = vsyncpa [#allocation10], 1 }
0x19b1   :  { %2912 = vsyncpa [#allocation10 + $0x1], 1 }
0x19b2   :  { %2913 = vsyncpa [#allocation13], 1 }
0x19b3   :  { %2914 = vsyncpa [#allocation16], 1 }
0x19b4   :  { %2915 = vsyncpa [#allocation19], 1 }
0x19b5   :  { %2916 = vsyncpa [#allocation22], 1 }
0x19b6   :  { %2917 = vsyncpa [#allocation25], 1 }
0x19b7   :  { %2918 = vsyncpa [#allocation28], 1 }
0x19b8   :  { %2919 = vsyncpa [#allocation5], 1 }
0x19b9   :  { %2921 = vsyncpa [#allocation5 + $0x1], 1 }

</bundles_post_ra>
